<compile_context>
chip_gen: v6e
topology: v6e:2x2x1
jax: 0.10.0
libtpu: 0.0.40
codegen_flags: <defaults>
</compile_context>

<pallas_src>
import functools

import jax
import jax.numpy as jnp
from jax import lax
from jax.experimental import pallas as pl
from jax.experimental.pallas import tpu as pltpu

_VMEM_LIMIT = 32 * 1024 * 1024


def _pick_tile(n, target, quantum=1):
    """Largest tile <= target that divides n and is a multiple of `quantum`,
    falling back to the full dimension (always a legal block size)."""
    if n <= target:
        return n
    for t in range(target, 0, -1):
        if n % t == 0 and t % quantum == 0:
            return t
    return n


# --------------------------------------------------------------------------
# Conv2d(3x3, pad=1) + ReLU + MaxPool2d((2,1)), fused, tiled over (batch, T-chunk)
# --------------------------------------------------------------------------
def _conv_relu_pool_kernel(x_ref, w_ref, b_ref, o_ref):
    # x_ref: (1, 1, F+2, tT+2, Ci) halo-padded (batch, time-chunk) block
    # w_ref: (9, Ci, Co) taps ordered df*3 + dt ; b_ref: (1, Co) f32
    # o_ref: (1, Fh, tT, Co) conv + ReLU + MaxPool((2,1)) output tile
    Fp2, tTp2, Ci = x_ref.shape[2], x_ref.shape[3], x_ref.shape[4]
    F, tT = Fp2 - 2, tTp2 - 2
    Co = w_ref.shape[2]
    Fh = o_ref.shape[1]

    acc = jnp.zeros((F * tT, Co), jnp.float32)
    for df in range(3):
        for dt in range(3):
            a = x_ref[0, 0, df:df + F, dt:dt + tT, :]              # (F, tT, Ci)
            tap = w_ref[df * 3 + dt]                               # (Ci, Co)
            if Ci == 1:
                # First conv (Ci=1): 9 shifted broadcast-FMAs on the VPU;
                # a K=1 GEMM would waste the MXU.
                acc = acc + (a.reshape(F * tT, 1).astype(jnp.float32)
                             * tap.astype(jnp.float32))
            else:
                # Ci>1: shifted-slice matmul on the MXU (bf16 in, f32 acc).
                acc = acc + jnp.dot(a.reshape(F * tT, Ci), tap,
                                    preferred_element_type=jnp.float32)
    y = jnp.maximum(acc + b_ref[...], 0.0).reshape(F, tT, Co)       # bias + ReLU
    y = y[:2 * Fh].reshape(Fh, 2, tT, Co)                           # MaxPool2d((2,1))
    o_ref[0] = jnp.max(y, axis=1).astype(o_ref.dtype)


def conv_relu_pool(x, w, b, out_dtype=jnp.bfloat16):
    """x: (B, F, T, Ci) channels-last -> (B, F//2, T, Co).

    w: (9, Ci, Co) with tap index df*3+dt (== PyTorch conv.weight (Co,Ci,3,3)
    permuted to (kh,kw,Ci,Co) and reshaped); b: (Co,) = conv bias.
    """
    B, F, T, Ci = x.shape
    Co = w.shape[-1]
    Fh = F // 2
    tT = _pick_tile(T, 128, 8)
    nT = T // tT

    # Pad once and build self-contained halo blocks along T, so the grid needs
    # no overlapping BlockSpecs (and no 9x im2col / row-reorder transpose in HBM).
    xp = jnp.pad(x, ((0, 0), (1, 1), (1, 1), (0, 0)))
    xb = jnp.stack([xp[:, :, j * tT:j * tT + tT + 2, :] for j in range(nT)], axis=1)

    return pl.pallas_call(
        _conv_relu_pool_kernel,
        out_shape=jax.ShapeDtypeStruct((B, Fh, T, Co), out_dtype),
        grid=(B, nT),
        in_specs=[
            pl.BlockSpec((1, 1, F + 2, tT + 2, Ci), lambda bi, ti: (bi, ti, 0, 0, 0)),
            pl.BlockSpec((9, Ci, Co), lambda bi, ti: (0, 0, 0)),
            pl.BlockSpec((1, Co), lambda bi, ti: (0, 0)),
        ],
        out_specs=pl.BlockSpec((1, Fh, tT, Co), lambda bi, ti: (bi, 0, ti, 0)),
        compiler_params=pltpu.CompilerParams(
            dimension_semantics=("parallel", "parallel"),
            vmem_limit_bytes=_VMEM_LIMIT),
    )(xb, w, b.reshape(1, Co))


# --------------------------------------------------------------------------
# Tiled GEMM + bias (+ optional sigmoid): used for the hoisted LSTM input
# projections and the final Linear+Sigmoid.
# --------------------------------------------------------------------------
def _gemm_bias_act_kernel(x_ref, w_ref, b_ref, o_ref, acc_ref, *, act):
    @pl.when(pl.program_id(2) == 0)
    def _():
        acc_ref[...] = jnp.zeros_like(acc_ref)

    acc_ref[...] += jnp.dot(x_ref[...], w_ref[...],
                            preferred_element_type=jnp.float32)

    @pl.when(pl.program_id(2) == pl.num_programs(2) - 1)
    def _():
        y = acc_ref[...] + b_ref[...]
        if act == "sigmoid":
            y = jax.nn.sigmoid(y)
        o_ref[...] = y.astype(o_ref.dtype)


def gemm_bias_act(x, w, b, act=None, out_dtype=jnp.float32):
    """y = act(x @ w + b), tiled over (M, N, K); bf16 operands, f32 accumulation."""
    M, K = x.shape
    N = w.shape[1]
    tm = _pick_tile(M, 256, 8)
    tn = _pick_tile(N, 256, 128)
    tk = _pick_tile(K, 512, 128)
    return pl.pallas_call(
        functools.partial(_gemm_bias_act_kernel, act=act),
        out_shape=jax.ShapeDtypeStruct((M, N), out_dtype),
        grid=(M // tm, N // tn, K // tk),
        in_specs=[pl.BlockSpec((tm, tk), lambda i, j, k: (i, k)),
                  pl.BlockSpec((tk, tn), lambda i, j, k: (k, j)),
                  pl.BlockSpec((1, tn), lambda i, j, k: (0, j))],
        out_specs=pl.BlockSpec((tm, tn), lambda i, j, k: (i, j)),
        scratch_shapes=[pltpu.VMEM((tm, tn), jnp.float32)],
        compiler_params=pltpu.CompilerParams(
            dimension_semantics=("parallel", "parallel", "arbitrary"),
            vmem_limit_bytes=_VMEM_LIMIT),
    )(x, w, b.reshape(1, N))


# --------------------------------------------------------------------------
# Bidirectional LSTM recurrence (both directions fused in one kernel).
# Input projections (x @ W_ih + b_ih + b_hh) are precomputed by gemm_bias_act.
# --------------------------------------------------------------------------
def _bilstm_recurrent_kernel(gxf_ref, gxb_ref, whf_ref, whb_ref,
                             of_ref, ob_ref, hf, cf, hb, cb):
    # gxf/gxb: (tT, B, 4H) precomputed gates for fwd / bwd.  gxb's BlockSpec
    #   reverses the chunk index so the bwd direction walks time backwards.
    # whf/whb: (H, 4H) recurrent weights, gate-column order (i, f, o, g).
    # of/ob:   (tT, B, H) per-direction hidden-state outputs.
    # hf/cf/hb/cb: (B, H) f32 carries, persistent across the time-chunk grid.
    tT = gxf_ref.shape[0]
    H = whf_ref.shape[0]

    @pl.when(pl.program_id(0) == 0)
    def _():
        hf[...] = jnp.zeros_like(hf)
        cf[...] = jnp.zeros_like(cf)
        hb[...] = jnp.zeros_like(hb)
        cb[...] = jnp.zeros_like(cb)

    def cell(gx, h, c, w):
        gates = gx + jnp.dot(h, w, preferred_element_type=jnp.float32)
        sig = jax.nn.sigmoid(gates[:, :3 * H])       # i, f, o in one contiguous block
        g = jnp.tanh(gates[:, 3 * H:])
        c_new = sig[:, H:2 * H] * c + sig[:, :H] * g
        h_new = sig[:, 2 * H:3 * H] * jnp.tanh(c_new)
        return h_new, c_new

    def step(s, carry):
        # forward direction: local time s (global time increasing)
        h_new, c_new = cell(gxf_ref[s], hf[...], cf[...], whf_ref[...])
        hf[...] = h_new
        cf[...] = c_new
        of_ref[s] = h_new
        # backward direction: local time tT-1-s of the reversed chunk
        sb = tT - 1 - s
        h_new, c_new = cell(gxb_ref[sb], hb[...], cb[...], whb_ref[...])
        hb[...] = h_new
        cb[...] = c_new
        ob_ref[sb] = h_new
        return carry

    lax.fori_loop(0, tT, step, 0)


def bilstm_recurrent(gx, whh_f, whh_b, H):
    """gx: (T, B, 8H), columns [0:4H] fwd / [4H:8H] bwd (gate order i,f,o,g).

    Returns (out_fwd, out_bwd), each (T, B, H).  Assumes 4H % 128 == 0 for
    lane-aligned direction slicing (true for H=32, 256, ...).
    """
    T, B, _ = gx.shape
    tT = _pick_tile(T, 128, 1)
    nT = T // tT
    return pl.pallas_call(
        _bilstm_recurrent_kernel,
        out_shape=(jax.ShapeDtypeStruct((T, B, H), jnp.float32),
                   jax.ShapeDtypeStruct((T, B, H), jnp.float32)),
        grid=(nT,),
        in_specs=[
            pl.BlockSpec((tT, B, 4 * H), lambda k: (k, 0, 0)),           # fwd gates
            pl.BlockSpec((tT, B, 4 * H), lambda k: (nT - 1 - k, 0, 1)),  # bwd gates
            pl.BlockSpec((H, 4 * H), lambda k: (0, 0)),
            pl.BlockSpec((H, 4 * H), lambda k: (0, 0)),
        ],
        out_specs=(pl.BlockSpec((tT, B, H), lambda k: (k, 0, 0)),
                   pl.BlockSpec((tT, B, H), lambda k: (nT - 1 - k, 0, 0))),
        scratch_shapes=[pltpu.VMEM((B, H), jnp.float32),
                        pltpu.VMEM((B, H), jnp.float32),
                        pltpu.VMEM((B, H), jnp.float32),
                        pltpu.VMEM((B, H), jnp.float32)],
        compiler_params=pltpu.CompilerParams(
            dimension_semantics=("arbitrary",),
            vmem_limit_bytes=_VMEM_LIMIT),
    )(gx, gx, whh_f, whh_b)


# --------------------------------------------------------------------------
# Full forward
# --------------------------------------------------------------------------
def crnn_transcriber_forward(x, params, *, hidden_size, num_notes):
    B, _, T = x.shape
    Hd = hidden_size

    # CNN: Conv(1->32)+ReLU+Pool, Conv(32->64)+ReLU+Pool (channels-last).
    h = x[..., None]                                               # (B, F, T, 1) f32
    h = conv_relu_pool(h, params["conv1_w"], params["conv1_b"])    # (B, F/2, T, 32) bf16
    h = conv_relu_pool(h, params["conv2_w"], params["conv2_b"])    # (B, F/4, T, 64) bf16

    # Feature assembly: single transpose to time-major (T, B, C*F4) with the
    # PyTorch (c, f) feature ordering; the LSTM stack stays time-major from here.
    Fh, C = h.shape[1], h.shape[3]
    seq = jnp.transpose(h, (2, 0, 3, 1)).reshape(T, B, C * Fh)

    # 2-layer bidirectional LSTM.
    for layer in range(2):
        # Hoisted input projection for BOTH directions: one MXU-friendly GEMM
        # over all timesteps (bias = b_ih + b_hh folded in).
        gx = gemm_bias_act(
            seq.reshape(T * B, -1).astype(jnp.bfloat16),
            params[f"wih_l{layer}"], params[f"b_l{layer}"],
        ).reshape(T, B, 8 * Hd)
        out_f, out_b = bilstm_recurrent(
            gx, params[f"whh_l{layer}_fwd"], params[f"whh_l{layer}_bwd"], Hd)
        seq = jnp.concatenate([out_f, out_b], axis=-1)             # (T, B, 2H)

    # Linear + Sigmoid.
    probs = gemm_bias_act(seq.reshape(T * B, 2 * Hd).astype(jnp.bfloat16),
                          params["fc_w"], params["fc_b"], act="sigmoid")
    return jnp.transpose(probs.reshape(T, B, num_notes), (1, 0, 2))


# --------------------------------------------------------------------------
# Deterministic synthetic parameters.  Layouts (vs. the PyTorch module):
#   conv*_w : conv.weight (Co,Ci,3,3) -> permute(2,3,1,0) -> reshape(9,Ci,Co)
#   wih_l*  : [W_ih_fwd^T | W_ih_bwd^T] with gate columns reordered (i,f,o,g), (D, 8H)
#   b_l*    : (b_ih + b_hh) for both directions, same column order, (8H,)
#   whh_*   : W_hh^T with gate columns reordered (i,f,o,g), (H, 4H)
#   fc_w    : fc.weight^T, (2H, num_notes)
# --------------------------------------------------------------------------
def init_params(key, n_mels, hidden_size, num_notes):
    keys = iter(jax.random.split(key, 64))

    def u(shape, scale, dtype=jnp.float32):
        return jax.random.uniform(next(keys), shape, jnp.float32,
                                  -scale, scale).astype(dtype)

    p = {}
    p["conv1_w"] = u((9, 1, 32), 1.0 / 3.0)                         # VPU path, keep f32
    p["conv1_b"] = u((32,), 1.0 / 3.0)
    p["conv2_w"] = u((9, 32, 64), (9.0 * 32.0) ** -0.5, jnp.bfloat16)
    p["conv2_b"] = u((64,), (9.0 * 32.0) ** -0.5)

    D0 = 64 * (n_mels // 4)
    H = hidden_size
    k = float(H) ** -0.5
    for layer in range(2):
        D = D0 if layer == 0 else 2 * H
        p[f"wih_l{layer}"] = u((D, 8 * H), k, jnp.bfloat16)          # both directions
        p[f"b_l{layer}"] = u((8 * H,), k) + u((8 * H,), k)           # b_ih + b_hh
        p[f"whh_l{layer}_fwd"] = u((H, 4 * H), k)
        p[f"whh_l{layer}_bwd"] = u((H, 4 * H), k)
    kf = float(2 * H) ** -0.5
    p["fc_w"] = u((2 * H, num_notes), kf, jnp.bfloat16)
    p["fc_b"] = u((num_notes,), kf)
    return p


if __name__ == "__main__":
    # Small shapes consistent with the module's forward.
    B, n_mels, T = 2, 16, 8
    hidden_size, num_notes = 32, 16

    key = jax.random.PRNGKey(0)
    kx, kp = jax.random.split(key)
    x = jax.random.normal(kx, (B, n_mels, T), jnp.float32)
    params = init_params(kp, n_mels, hidden_size, num_notes)

    fwd = jax.jit(functools.partial(crnn_transcriber_forward,
                                    hidden_size=hidden_size, num_notes=num_notes))
    out = fwd(x, params)
    jax.block_until_ready(out)
    assert out.shape == (B, T, num_notes)
    assert bool(jnp.all(jnp.isfinite(out)))
    print("KERNEL_OK")
</pallas_src>

<mosaic_0001>
module attributes {stable_mosaic.version = 11 : i64} {
  func.func @_conv_relu_pool_kernel(%arg0: i32, %arg1: i32, %arg2: memref<1x1x18x10x1xf32, #tpu.memory_space<vmem>>, %arg3: memref<9x1x32xf32, #tpu.memory_space<vmem>>, %arg4: memref<1x32xf32, #tpu.memory_space<vmem>>, %arg5: memref<1x8x8x32xbf16, #tpu.memory_space<vmem>>) attributes {dimension_semantics = [#tpu.dimension_semantics<parallel>, #tpu.dimension_semantics<parallel>], iteration_bounds = array<i64: 2, 1>, scalar_prefetch = 0 : i64, scratch_operands = 0 : i64, tpu.core_type = #tpu.core_type<tc>, window_params = [{transform_indices = @transform_0, window_bounds = array<i64: 1, 1, 18, 10, 1>}, {pipeline_mode = #tpu.pipeline_mode<synchronous>, transform_indices = @transform_1, window_bounds = array<i64: 9, 1, 32>}, {pipeline_mode = #tpu.pipeline_mode<synchronous>, transform_indices = @transform_2, window_bounds = array<i64: 1, 32>}, {transform_indices = @transform_3, window_bounds = array<i64: 1, 8, 8, 32>}]} {
    %cst = arith.constant 0.000000e+00 : f32
    %0 = vector.broadcast %cst : f32 to vector<128x32xf32>
    %c0 = arith.constant 0 : index
    %c0_0 = arith.constant 0 : index
    %c0_1 = arith.constant 0 : index
    %c0_2 = arith.constant 0 : index
    %c0_3 = arith.constant 0 : index
    %1 = vector.load %arg2[%c0, %c0_0, %c0_1, %c0_2, %c0_3] : memref<1x1x18x10x1xf32, #tpu.memory_space<vmem>>, vector<1x1x16x8x1xf32>
    %2 = vector.shape_cast %1 : vector<1x1x16x8x1xf32> to vector<16x8x1xf32>
    %c0_4 = arith.constant 0 : index
    %c0_5 = arith.constant 0 : index
    %c0_6 = arith.constant 0 : index
    %3 = vector.load %arg3[%c0_4, %c0_5, %c0_6] : memref<9x1x32xf32, #tpu.memory_space<vmem>>, vector<1x1x32xf32>
    %4 = vector.shape_cast %3 : vector<1x1x32xf32> to vector<1x32xf32>
    %5 = vector.shape_cast %2 : vector<16x8x1xf32> to vector<128x1xf32>
    %6 = vector.broadcast %5 : vector<128x1xf32> to vector<128x32xf32>
    %7 = vector.broadcast %4 : vector<1x32xf32> to vector<128x32xf32>
    %8 = arith.mulf %6, %7 : vector<128x32xf32>
    %9 = arith.addf %0, %8 : vector<128x32xf32>
    %c0_7 = arith.constant 0 : index
    %c0_8 = arith.constant 0 : index
    %c0_9 = arith.constant 0 : index
    %c1 = arith.constant 1 : index
    %c0_10 = arith.constant 0 : index
    %10 = vector.load %arg2[%c0_7, %c0_8, %c0_9, %c1, %c0_10] : memref<1x1x18x10x1xf32, #tpu.memory_space<vmem>>, vector<1x1x16x8x1xf32>
    %11 = vector.shape_cast %10 : vector<1x1x16x8x1xf32> to vector<16x8x1xf32>
    %c1_11 = arith.constant 1 : index
    %c0_12 = arith.constant 0 : index
    %c0_13 = arith.constant 0 : index
    %12 = vector.load %arg3[%c1_11, %c0_12, %c0_13] : memref<9x1x32xf32, #tpu.memory_space<vmem>>, vector<1x1x32xf32>
    %13 = vector.shape_cast %12 : vector<1x1x32xf32> to vector<1x32xf32>
    %14 = vector.shape_cast %11 : vector<16x8x1xf32> to vector<128x1xf32>
    %15 = vector.broadcast %14 : vector<128x1xf32> to vector<128x32xf32>
    %16 = vector.broadcast %13 : vector<1x32xf32> to vector<128x32xf32>
    %17 = arith.mulf %15, %16 : vector<128x32xf32>
    %18 = arith.addf %9, %17 : vector<128x32xf32>
    %c0_14 = arith.constant 0 : index
    %c0_15 = arith.constant 0 : index
    %c0_16 = arith.constant 0 : index
    %c2 = arith.constant 2 : index
    %c0_17 = arith.constant 0 : index
    %19 = vector.load %arg2[%c0_14, %c0_15, %c0_16, %c2, %c0_17] : memref<1x1x18x10x1xf32, #tpu.memory_space<vmem>>, vector<1x1x16x8x1xf32>
    %20 = vector.shape_cast %19 : vector<1x1x16x8x1xf32> to vector<16x8x1xf32>
    %c2_18 = arith.constant 2 : index
    %c0_19 = arith.constant 0 : index
    %c0_20 = arith.constant 0 : index
    %21 = vector.load %arg3[%c2_18, %c0_19, %c0_20] : memref<9x1x32xf32, #tpu.memory_space<vmem>>, vector<1x1x32xf32>
    %22 = vector.shape_cast %21 : vector<1x1x32xf32> to vector<1x32xf32>
    %23 = vector.shape_cast %20 : vector<16x8x1xf32> to vector<128x1xf32>
    %24 = vector.broadcast %23 : vector<128x1xf32> to vector<128x32xf32>
    %25 = vector.broadcast %22 : vector<1x32xf32> to vector<128x32xf32>
    %26 = arith.mulf %24, %25 : vector<128x32xf32>
    %27 = arith.addf %18, %26 : vector<128x32xf32>
    %c0_21 = arith.constant 0 : index
    %c0_22 = arith.constant 0 : index
    %c1_23 = arith.constant 1 : index
    %c0_24 = arith.constant 0 : index
    %c0_25 = arith.constant 0 : index
    %28 = vector.load %arg2[%c0_21, %c0_22, %c1_23, %c0_24, %c0_25] : memref<1x1x18x10x1xf32, #tpu.memory_space<vmem>>, vector<1x1x16x8x1xf32>
    %29 = vector.shape_cast %28 : vector<1x1x16x8x1xf32> to vector<16x8x1xf32>
    %c3 = arith.constant 3 : index
    %c0_26 = arith.constant 0 : index
    %c0_27 = arith.constant 0 : index
    %30 = vector.load %arg3[%c3, %c0_26, %c0_27] : memref<9x1x32xf32, #tpu.memory_space<vmem>>, vector<1x1x32xf32>
    %31 = vector.shape_cast %30 : vector<1x1x32xf32> to vector<1x32xf32>
    %32 = vector.shape_cast %29 : vector<16x8x1xf32> to vector<128x1xf32>
    %33 = vector.broadcast %32 : vector<128x1xf32> to vector<128x32xf32>
    %34 = vector.broadcast %31 : vector<1x32xf32> to vector<128x32xf32>
    %35 = arith.mulf %33, %34 : vector<128x32xf32>
    %36 = arith.addf %27, %35 : vector<128x32xf32>
    %c0_28 = arith.constant 0 : index
    %c0_29 = arith.constant 0 : index
    %c1_30 = arith.constant 1 : index
    %c1_31 = arith.constant 1 : index
    %c0_32 = arith.constant 0 : index
    %37 = vector.load %arg2[%c0_28, %c0_29, %c1_30, %c1_31, %c0_32] : memref<1x1x18x10x1xf32, #tpu.memory_space<vmem>>, vector<1x1x16x8x1xf32>
    %38 = vector.shape_cast %37 : vector<1x1x16x8x1xf32> to vector<16x8x1xf32>
    %c4 = arith.constant 4 : index
    %c0_33 = arith.constant 0 : index
    %c0_34 = arith.constant 0 : index
    %39 = vector.load %arg3[%c4, %c0_33, %c0_34] : memref<9x1x32xf32, #tpu.memory_space<vmem>>, vector<1x1x32xf32>
    %40 = vector.shape_cast %39 : vector<1x1x32xf32> to vector<1x32xf32>
    %41 = vector.shape_cast %38 : vector<16x8x1xf32> to vector<128x1xf32>
    %42 = vector.broadcast %41 : vector<128x1xf32> to vector<128x32xf32>
    %43 = vector.broadcast %40 : vector<1x32xf32> to vector<128x32xf32>
    %44 = arith.mulf %42, %43 : vector<128x32xf32>
    %45 = arith.addf %36, %44 : vector<128x32xf32>
    %c0_35 = arith.constant 0 : index
    %c0_36 = arith.constant 0 : index
    %c1_37 = arith.constant 1 : index
    %c2_38 = arith.constant 2 : index
    %c0_39 = arith.constant 0 : index
    %46 = vector.load %arg2[%c0_35, %c0_36, %c1_37, %c2_38, %c0_39] : memref<1x1x18x10x1xf32, #tpu.memory_space<vmem>>, vector<1x1x16x8x1xf32>
    %47 = vector.shape_cast %46 : vector<1x1x16x8x1xf32> to vector<16x8x1xf32>
    %c5 = arith.constant 5 : index
    %c0_40 = arith.constant 0 : index
    %c0_41 = arith.constant 0 : index
    %48 = vector.load %arg3[%c5, %c0_40, %c0_41] : memref<9x1x32xf32, #tpu.memory_space<vmem>>, vector<1x1x32xf32>
    %49 = vector.shape_cast %48 : vector<1x1x32xf32> to vector<1x32xf32>
    %50 = vector.shape_cast %47 : vector<16x8x1xf32> to vector<128x1xf32>
    %51 = vector.broadcast %50 : vector<128x1xf32> to vector<128x32xf32>
    %52 = vector.broadcast %49 : vector<1x32xf32> to vector<128x32xf32>
    %53 = arith.mulf %51, %52 : vector<128x32xf32>
    %54 = arith.addf %45, %53 : vector<128x32xf32>
    %c0_42 = arith.constant 0 : index
    %c0_43 = arith.constant 0 : index
    %c2_44 = arith.constant 2 : index
    %c0_45 = arith.constant 0 : index
    %c0_46 = arith.constant 0 : index
    %55 = vector.load %arg2[%c0_42, %c0_43, %c2_44, %c0_45, %c0_46] : memref<1x1x18x10x1xf32, #tpu.memory_space<vmem>>, vector<1x1x16x8x1xf32>
    %56 = vector.shape_cast %55 : vector<1x1x16x8x1xf32> to vector<16x8x1xf32>
    %c6 = arith.constant 6 : index
    %c0_47 = arith.constant 0 : index
    %c0_48 = arith.constant 0 : index
    %57 = vector.load %arg3[%c6, %c0_47, %c0_48] : memref<9x1x32xf32, #tpu.memory_space<vmem>>, vector<1x1x32xf32>
    %58 = vector.shape_cast %57 : vector<1x1x32xf32> to vector<1x32xf32>
    %59 = vector.shape_cast %56 : vector<16x8x1xf32> to vector<128x1xf32>
    %60 = vector.broadcast %59 : vector<128x1xf32> to vector<128x32xf32>
    %61 = vector.broadcast %58 : vector<1x32xf32> to vector<128x32xf32>
    %62 = arith.mulf %60, %61 : vector<128x32xf32>
    %63 = arith.addf %54, %62 : vector<128x32xf32>
    %c0_49 = arith.constant 0 : index
    %c0_50 = arith.constant 0 : index
    %c2_51 = arith.constant 2 : index
    %c1_52 = arith.constant 1 : index
    %c0_53 = arith.constant 0 : index
    %64 = vector.load %arg2[%c0_49, %c0_50, %c2_51, %c1_52, %c0_53] : memref<1x1x18x10x1xf32, #tpu.memory_space<vmem>>, vector<1x1x16x8x1xf32>
    %65 = vector.shape_cast %64 : vector<1x1x16x8x1xf32> to vector<16x8x1xf32>
    %c7 = arith.constant 7 : index
    %c0_54 = arith.constant 0 : index
    %c0_55 = arith.constant 0 : index
    %66 = vector.load %arg3[%c7, %c0_54, %c0_55] : memref<9x1x32xf32, #tpu.memory_space<vmem>>, vector<1x1x32xf32>
    %67 = vector.shape_cast %66 : vector<1x1x32xf32> to vector<1x32xf32>
    %68 = vector.shape_cast %65 : vector<16x8x1xf32> to vector<128x1xf32>
    %69 = vector.broadcast %68 : vector<128x1xf32> to vector<128x32xf32>
    %70 = vector.broadcast %67 : vector<1x32xf32> to vector<128x32xf32>
    %71 = arith.mulf %69, %70 : vector<128x32xf32>
    %72 = arith.addf %63, %71 : vector<128x32xf32>
    %c0_56 = arith.constant 0 : index
    %c0_57 = arith.constant 0 : index
    %c2_58 = arith.constant 2 : index
    %c2_59 = arith.constant 2 : index
    %c0_60 = arith.constant 0 : index
    %73 = vector.load %arg2[%c0_56, %c0_57, %c2_58, %c2_59, %c0_60] : memref<1x1x18x10x1xf32, #tpu.memory_space<vmem>>, vector<1x1x16x8x1xf32>
    %74 = vector.shape_cast %73 : vector<1x1x16x8x1xf32> to vector<16x8x1xf32>
    %c8 = arith.constant 8 : index
    %c0_61 = arith.constant 0 : index
    %c0_62 = arith.constant 0 : index
    %75 = vector.load %arg3[%c8, %c0_61, %c0_62] : memref<9x1x32xf32, #tpu.memory_space<vmem>>, vector<1x1x32xf32>
    %76 = vector.shape_cast %75 : vector<1x1x32xf32> to vector<1x32xf32>
    %77 = vector.shape_cast %74 : vector<16x8x1xf32> to vector<128x1xf32>
    %78 = vector.broadcast %77 : vector<128x1xf32> to vector<128x32xf32>
    %79 = vector.broadcast %76 : vector<1x32xf32> to vector<128x32xf32>
    %80 = arith.mulf %78, %79 : vector<128x32xf32>
    %81 = arith.addf %72, %80 : vector<128x32xf32>
    %c0_63 = arith.constant 0 : index
    %c0_64 = arith.constant 0 : index
    %82 = vector.load %arg4[%c0_63, %c0_64] : memref<1x32xf32, #tpu.memory_space<vmem>>, vector<1x32xf32>
    %83 = vector.broadcast %82 : vector<1x32xf32> to vector<128x32xf32>
    %84 = arith.addf %81, %83 : vector<128x32xf32>
    %cst_65 = arith.constant 0.000000e+00 : f32
    %85 = vector.broadcast %cst_65 : f32 to vector<128x32xf32>
    %86 = arith.maximumf %84, %85 : vector<128x32xf32>
    %87 = vector.shape_cast %86 : vector<128x32xf32> to vector<16x8x32xf32>
    %88 = vector.shape_cast %87 : vector<16x8x32xf32> to vector<8x2x8x32xf32>
    %cst_66 = arith.constant dense<0xFF800000> : vector<8x8x32xf32>
    %89 = vector.multi_reduction <maximumf>, %88, %cst_66 [1] : vector<8x2x8x32xf32> to vector<8x8x32xf32>
    %90 = arith.truncf %89 : vector<8x8x32xf32> to vector<8x8x32xbf16>
    %c0_67 = arith.constant 0 : index
    %c0_68 = arith.constant 0 : index
    %c0_69 = arith.constant 0 : index
    %c0_70 = arith.constant 0 : index
    %91 = vector.load %arg5[%c0_67, %c0_68, %c0_69, %c0_70] : memref<1x8x8x32xbf16, #tpu.memory_space<vmem>>, vector<1x8x8x32xbf16>
    %92 = vector.shape_cast %91 : vector<1x8x8x32xbf16> to vector<8x8x32xbf16>
    %93 = vector.shape_cast %90 : vector<8x8x32xbf16> to vector<1x8x8x32xbf16>
    tpu.vector_store %arg5[%c0_67, %c0_68, %c0_69, %c0_70], %93 {strides = array<i32>} : memref<1x8x8x32xbf16, #tpu.memory_space<vmem>>, vector<1x8x8x32xbf16>,
    return
  }
  func.func @transform_0(%arg0: i32, %arg1: i32) -> (i32, i32, i32, i32, i32) {
    %c0_i32 = arith.constant 0 : i32
    %c0_i32_0 = arith.constant 0 : i32
    %c0_i32_1 = arith.constant 0 : i32
    %c0_i32_2 = arith.constant 0 : i32
    return %arg0, %arg1, %c0_i32, %c0_i32_0, %c0_i32_1 : i32, i32, i32, i32, i32
  }
  func.func @transform_1(%arg0: i32, %arg1: i32) -> (i32, i32, i32) {
    %c0_i32 = arith.constant 0 : i32
    %c0_i32_0 = arith.constant 0 : i32
    %c0_i32_1 = arith.constant 0 : i32
    %c0_i32_2 = arith.constant 0 : i32
    return %c0_i32, %c0_i32_0, %c0_i32_1 : i32, i32, i32
  }
  func.func @transform_2(%arg0: i32, %arg1: i32) -> (i32, i32) {
    %c0_i32 = arith.constant 0 : i32
    %c0_i32_0 = arith.constant 0 : i32
    %c0_i32_1 = arith.constant 0 : i32
    return %c0_i32, %c0_i32_0 : i32, i32
  }
  func.func @transform_3(%arg0: i32, %arg1: i32) -> (i32, i32, i32, i32) {
    %c0_i32 = arith.constant 0 : i32
    %c0_i32_0 = arith.constant 0 : i32
    %c0_i32_1 = arith.constant 0 : i32
    return %arg0, %c0_i32, %arg1, %c0_i32_0 : i32, i32, i32, i32
  }
}

module attributes {stable_mosaic.version = 11 : i64} {
  func.func @_conv_relu_pool_kernel(%arg0: i32, %arg1: i32, %arg2: memref<1x1x10x10x32xbf16, #tpu.memory_space<vmem>>, %arg3: memref<9x32x64xbf16, #tpu.memory_space<vmem>>, %arg4: memref<1x64xf32, #tpu.memory_space<vmem>>, %arg5: memref<1x4x8x64xbf16, #tpu.memory_space<vmem>>) attributes {dimension_semantics = [#tpu.dimension_semantics<parallel>, #tpu.dimension_semantics<parallel>], iteration_bounds = array<i64: 2, 1>, scalar_prefetch = 0 : i64, scratch_operands = 0 : i64, tpu.core_type = #tpu.core_type<tc>, window_params = [{transform_indices = @transform_0, window_bounds = array<i64: 1, 1, 10, 10, 32>}, {pipeline_mode = #tpu.pipeline_mode<synchronous>, transform_indices = @transform_1, window_bounds = array<i64: 9, 32, 64>}, {pipeline_mode = #tpu.pipeline_mode<synchronous>, transform_indices = @transform_2, window_bounds = array<i64: 1, 64>}, {transform_indices = @transform_3, window_bounds = array<i64: 1, 4, 8, 64>}]} {
    %cst = arith.constant 0.000000e+00 : f32
    %0 = vector.broadcast %cst : f32 to vector<64x64xf32>
    %c0 = arith.constant 0 : index
    %c0_0 = arith.constant 0 : index
    %c0_1 = arith.constant 0 : index
    %c0_2 = arith.constant 0 : index
    %c0_3 = arith.constant 0 : index
    %1 = vector.load %arg2[%c0, %c0_0, %c0_1, %c0_2, %c0_3] : memref<1x1x10x10x32xbf16, #tpu.memory_space<vmem>>, vector<1x1x8x8x32xbf16>
    %2 = vector.shape_cast %1 : vector<1x1x8x8x32xbf16> to vector<8x8x32xbf16>
    %c0_4 = arith.constant 0 : index
    %c0_5 = arith.constant 0 : index
    %c0_6 = arith.constant 0 : index
    %3 = vector.load %arg3[%c0_4, %c0_5, %c0_6] : memref<9x32x64xbf16, #tpu.memory_space<vmem>>, vector<1x32x64xbf16>
    %4 = vector.shape_cast %3 : vector<1x32x64xbf16> to vector<32x64xbf16>
    %5 = vector.shape_cast %2 : vector<8x8x32xbf16> to vector<64x32xbf16>
    %cst_7 = arith.constant dense<0.000000e+00> : vector<64x64xf32>
    %6 = tpu.matmul %5, %4, %cst_7 {dimension_numbers = #tpu.dot_dimension_numbers<[1], [0], [0], [1], [0, 0, 1, 1], [], []>} : vector<64x32xbf16>, vector<32x64xbf16>, vector<64x64xf32> -> vector<64x64xf32>
    %7 = arith.addf %0, %6 : vector<64x64xf32>
    %c0_8 = arith.constant 0 : index
    %c0_9 = arith.constant 0 : index
    %c0_10 = arith.constant 0 : index
    %c1 = arith.constant 1 : index
    %c0_11 = arith.constant 0 : index
    %8 = vector.load %arg2[%c0_8, %c0_9, %c0_10, %c1, %c0_11] : memref<1x1x10x10x32xbf16, #tpu.memory_space<vmem>>, vector<1x1x8x8x32xbf16>
    %9 = vector.shape_cast %8 : vector<1x1x8x8x32xbf16> to vector<8x8x32xbf16>
    %c1_12 = arith.constant 1 : index
    %c0_13 = arith.constant 0 : index
    %c0_14 = arith.constant 0 : index
    %10 = vector.load %arg3[%c1_12, %c0_13, %c0_14] : memref<9x32x64xbf16, #tpu.memory_space<vmem>>, vector<1x32x64xbf16>
    %11 = vector.shape_cast %10 : vector<1x32x64xbf16> to vector<32x64xbf16>
    %12 = vector.shape_cast %9 : vector<8x8x32xbf16> to vector<64x32xbf16>
    %cst_15 = arith.constant dense<0.000000e+00> : vector<64x64xf32>
    %13 = tpu.matmul %12, %11, %cst_15 {dimension_numbers = #tpu.dot_dimension_numbers<[1], [0], [0], [1], [0, 0, 1, 1], [], []>} : vector<64x32xbf16>, vector<32x64xbf16>, vector<64x64xf32> -> vector<64x64xf32>
    %14 = arith.addf %7, %13 : vector<64x64xf32>
    %c0_16 = arith.constant 0 : index
    %c0_17 = arith.constant 0 : index
    %c0_18 = arith.constant 0 : index
    %c2 = arith.constant 2 : index
    %c0_19 = arith.constant 0 : index
    %15 = vector.load %arg2[%c0_16, %c0_17, %c0_18, %c2, %c0_19] : memref<1x1x10x10x32xbf16, #tpu.memory_space<vmem>>, vector<1x1x8x8x32xbf16>
    %16 = vector.shape_cast %15 : vector<1x1x8x8x32xbf16> to vector<8x8x32xbf16>
    %c2_20 = arith.constant 2 : index
    %c0_21 = arith.constant 0 : index
    %c0_22 = arith.constant 0 : index
    %17 = vector.load %arg3[%c2_20, %c0_21, %c0_22] : memref<9x32x64xbf16, #tpu.memory_space<vmem>>, vector<1x32x64xbf16>
    %18 = vector.shape_cast %17 : vector<1x32x64xbf16> to vector<32x64xbf16>
    %19 = vector.shape_cast %16 : vector<8x8x32xbf16> to vector<64x32xbf16>
    %cst_23 = arith.constant dense<0.000000e+00> : vector<64x64xf32>
    %20 = tpu.matmul %19, %18, %cst_23 {dimension_numbers = #tpu.dot_dimension_numbers<[1], [0], [0], [1], [0, 0, 1, 1], [], []>} : vector<64x32xbf16>, vector<32x64xbf16>, vector<64x64xf32> -> vector<64x64xf32>
    %21 = arith.addf %14, %20 : vector<64x64xf32>
    %c0_24 = arith.constant 0 : index
    %c0_25 = arith.constant 0 : index
    %c1_26 = arith.constant 1 : index
    %c0_27 = arith.constant 0 : index
    %c0_28 = arith.constant 0 : index
    %22 = vector.load %arg2[%c0_24, %c0_25, %c1_26, %c0_27, %c0_28] : memref<1x1x10x10x32xbf16, #tpu.memory_space<vmem>>, vector<1x1x8x8x32xbf16>
    %23 = vector.shape_cast %22 : vector<1x1x8x8x32xbf16> to vector<8x8x32xbf16>
    %c3 = arith.constant 3 : index
    %c0_29 = arith.constant 0 : index
    %c0_30 = arith.constant 0 : index
    %24 = vector.load %arg3[%c3, %c0_29, %c0_30] : memref<9x32x64xbf16, #tpu.memory_space<vmem>>, vector<1x32x64xbf16>
    %25 = vector.shape_cast %24 : vector<1x32x64xbf16> to vector<32x64xbf16>
    %26 = vector.shape_cast %23 : vector<8x8x32xbf16> to vector<64x32xbf16>
    %cst_31 = arith.constant dense<0.000000e+00> : vector<64x64xf32>
    %27 = tpu.matmul %26, %25, %cst_31 {dimension_numbers = #tpu.dot_dimension_numbers<[1], [0], [0], [1], [0, 0, 1, 1], [], []>} : vector<64x32xbf16>, vector<32x64xbf16>, vector<64x64xf32> -> vector<64x64xf32>
    %28 = arith.addf %21, %27 : vector<64x64xf32>
    %c0_32 = arith.constant 0 : index
    %c0_33 = arith.constant 0 : index
    %c1_34 = arith.constant 1 : index
    %c1_35 = arith.constant 1 : index
    %c0_36 = arith.constant 0 : index
    %29 = vector.load %arg2[%c0_32, %c0_33, %c1_34, %c1_35, %c0_36] : memref<1x1x10x10x32xbf16, #tpu.memory_space<vmem>>, vector<1x1x8x8x32xbf16>
    %30 = vector.shape_cast %29 : vector<1x1x8x8x32xbf16> to vector<8x8x32xbf16>
    %c4 = arith.constant 4 : index
    %c0_37 = arith.constant 0 : index
    %c0_38 = arith.constant 0 : index
    %31 = vector.load %arg3[%c4, %c0_37, %c0_38] : memref<9x32x64xbf16, #tpu.memory_space<vmem>>, vector<1x32x64xbf16>
    %32 = vector.shape_cast %31 : vector<1x32x64xbf16> to vector<32x64xbf16>
    %33 = vector.shape_cast %30 : vector<8x8x32xbf16> to vector<64x32xbf16>
    %cst_39 = arith.constant dense<0.000000e+00> : vector<64x64xf32>
    %34 = tpu.matmul %33, %32, %cst_39 {dimension_numbers = #tpu.dot_dimension_numbers<[1], [0], [0], [1], [0, 0, 1, 1], [], []>} : vector<64x32xbf16>, vector<32x64xbf16>, vector<64x64xf32> -> vector<64x64xf32>
    %35 = arith.addf %28, %34 : vector<64x64xf32>
    %c0_40 = arith.constant 0 : index
    %c0_41 = arith.constant 0 : index
    %c1_42 = arith.constant 1 : index
    %c2_43 = arith.constant 2 : index
    %c0_44 = arith.constant 0 : index
    %36 = vector.load %arg2[%c0_40, %c0_41, %c1_42, %c2_43, %c0_44] : memref<1x1x10x10x32xbf16, #tpu.memory_space<vmem>>, vector<1x1x8x8x32xbf16>
    %37 = vector.shape_cast %36 : vector<1x1x8x8x32xbf16> to vector<8x8x32xbf16>
    %c5 = arith.constant 5 : index
    %c0_45 = arith.constant 0 : index
    %c0_46 = arith.constant 0 : index
    %38 = vector.load %arg3[%c5, %c0_45, %c0_46] : memref<9x32x64xbf16, #tpu.memory_space<vmem>>, vector<1x32x64xbf16>
    %39 = vector.shape_cast %38 : vector<1x32x64xbf16> to vector<32x64xbf16>
    %40 = vector.shape_cast %37 : vector<8x8x32xbf16> to vector<64x32xbf16>
    %cst_47 = arith.constant dense<0.000000e+00> : vector<64x64xf32>
    %41 = tpu.matmul %40, %39, %cst_47 {dimension_numbers = #tpu.dot_dimension_numbers<[1], [0], [0], [1], [0, 0, 1, 1], [], []>} : vector<64x32xbf16>, vector<32x64xbf16>, vector<64x64xf32> -> vector<64x64xf32>
    %42 = arith.addf %35, %41 : vector<64x64xf32>
    %c0_48 = arith.constant 0 : index
    %c0_49 = arith.constant 0 : index
    %c2_50 = arith.constant 2 : index
    %c0_51 = arith.constant 0 : index
    %c0_52 = arith.constant 0 : index
    %43 = vector.load %arg2[%c0_48, %c0_49, %c2_50, %c0_51, %c0_52] : memref<1x1x10x10x32xbf16, #tpu.memory_space<vmem>>, vector<1x1x8x8x32xbf16>
    %44 = vector.shape_cast %43 : vector<1x1x8x8x32xbf16> to vector<8x8x32xbf16>
    %c6 = arith.constant 6 : index
    %c0_53 = arith.constant 0 : index
    %c0_54 = arith.constant 0 : index
    %45 = vector.load %arg3[%c6, %c0_53, %c0_54] : memref<9x32x64xbf16, #tpu.memory_space<vmem>>, vector<1x32x64xbf16>
    %46 = vector.shape_cast %45 : vector<1x32x64xbf16> to vector<32x64xbf16>
    %47 = vector.shape_cast %44 : vector<8x8x32xbf16> to vector<64x32xbf16>
    %cst_55 = arith.constant dense<0.000000e+00> : vector<64x64xf32>
    %48 = tpu.matmul %47, %46, %cst_55 {dimension_numbers = #tpu.dot_dimension_numbers<[1], [0], [0], [1], [0, 0, 1, 1], [], []>} : vector<64x32xbf16>, vector<32x64xbf16>, vector<64x64xf32> -> vector<64x64xf32>
    %49 = arith.addf %42, %48 : vector<64x64xf32>
    %c0_56 = arith.constant 0 : index
    %c0_57 = arith.constant 0 : index
    %c2_58 = arith.constant 2 : index
    %c1_59 = arith.constant 1 : index
    %c0_60 = arith.constant 0 : index
    %50 = vector.load %arg2[%c0_56, %c0_57, %c2_58, %c1_59, %c0_60] : memref<1x1x10x10x32xbf16, #tpu.memory_space<vmem>>, vector<1x1x8x8x32xbf16>
    %51 = vector.shape_cast %50 : vector<1x1x8x8x32xbf16> to vector<8x8x32xbf16>
    %c7 = arith.constant 7 : index
    %c0_61 = arith.constant 0 : index
    %c0_62 = arith.constant 0 : index
    %52 = vector.load %arg3[%c7, %c0_61, %c0_62] : memref<9x32x64xbf16, #tpu.memory_space<vmem>>, vector<1x32x64xbf16>
    %53 = vector.shape_cast %52 : vector<1x32x64xbf16> to vector<32x64xbf16>
    %54 = vector.shape_cast %51 : vector<8x8x32xbf16> to vector<64x32xbf16>
    %cst_63 = arith.constant dense<0.000000e+00> : vector<64x64xf32>
    %55 = tpu.matmul %54, %53, %cst_63 {dimension_numbers = #tpu.dot_dimension_numbers<[1], [0], [0], [1], [0, 0, 1, 1], [], []>} : vector<64x32xbf16>, vector<32x64xbf16>, vector<64x64xf32> -> vector<64x64xf32>
    %56 = arith.addf %49, %55 : vector<64x64xf32>
    %c0_64 = arith.constant 0 : index
    %c0_65 = arith.constant 0 : index
    %c2_66 = arith.constant 2 : index
    %c2_67 = arith.constant 2 : index
    %c0_68 = arith.constant 0 : index
    %57 = vector.load %arg2[%c0_64, %c0_65, %c2_66, %c2_67, %c0_68] : memref<1x1x10x10x32xbf16, #tpu.memory_space<vmem>>, vector<1x1x8x8x32xbf16>
    %58 = vector.shape_cast %57 : vector<1x1x8x8x32xbf16> to vector<8x8x32xbf16>
    %c8 = arith.constant 8 : index
    %c0_69 = arith.constant 0 : index
    %c0_70 = arith.constant 0 : index
    %59 = vector.load %arg3[%c8, %c0_69, %c0_70] : memref<9x32x64xbf16, #tpu.memory_space<vmem>>, vector<1x32x64xbf16>
    %60 = vector.shape_cast %59 : vector<1x32x64xbf16> to vector<32x64xbf16>
    %61 = vector.shape_cast %58 : vector<8x8x32xbf16> to vector<64x32xbf16>
    %cst_71 = arith.constant dense<0.000000e+00> : vector<64x64xf32>
    %62 = tpu.matmul %61, %60, %cst_71 {dimension_numbers = #tpu.dot_dimension_numbers<[1], [0], [0], [1], [0, 0, 1, 1], [], []>} : vector<64x32xbf16>, vector<32x64xbf16>, vector<64x64xf32> -> vector<64x64xf32>
    %63 = arith.addf %56, %62 : vector<64x64xf32>
    %c0_72 = arith.constant 0 : index
    %c0_73 = arith.constant 0 : index
    %64 = vector.load %arg4[%c0_72, %c0_73] : memref<1x64xf32, #tpu.memory_space<vmem>>, vector<1x64xf32>
    %65 = vector.broadcast %64 : vector<1x64xf32> to vector<64x64xf32>
    %66 = arith.addf %63, %65 : vector<64x64xf32>
    %cst_74 = arith.constant 0.000000e+00 : f32
    %67 = vector.broadcast %cst_74 : f32 to vector<64x64xf32>
    %68 = arith.maximumf %66, %67 : vector<64x64xf32>
    %69 = vector.shape_cast %68 : vector<64x64xf32> to vector<8x8x64xf32>
    %70 = vector.shape_cast %69 : vector<8x8x64xf32> to vector<4x2x8x64xf32>
    %cst_75 = arith.constant dense<0xFF800000> : vector<4x8x64xf32>
    %71 = vector.multi_reduction <maximumf>, %70, %cst_75 [1] : vector<4x2x8x64xf32> to vector<4x8x64xf32>
    %72 = arith.truncf %71 : vector<4x8x64xf32> to vector<4x8x64xbf16>
    %c0_76 = arith.constant 0 : index
    %c0_77 = arith.constant 0 : index
    %c0_78 = arith.constant 0 : index
    %c0_79 = arith.constant 0 : index
    %73 = vector.load %arg5[%c0_76, %c0_77, %c0_78, %c0_79] : memref<1x4x8x64xbf16, #tpu.memory_space<vmem>>, vector<1x4x8x64xbf16>
    %74 = vector.shape_cast %73 : vector<1x4x8x64xbf16> to vector<4x8x64xbf16>
    %75 = vector.shape_cast %72 : vector<4x8x64xbf16> to vector<1x4x8x64xbf16>
    tpu.vector_store %arg5[%c0_76, %c0_77, %c0_78, %c0_79], %75 {strides = array<i32>} : memref<1x4x8x64xbf16, #tpu.memory_space<vmem>>, vector<1x4x8x64xbf16>,
    return
  }
  func.func @transform_0(%arg0: i32, %arg1: i32) -> (i32, i32, i32, i32, i32) {
    %c0_i32 = arith.constant 0 : i32
    %c0_i32_0 = arith.constant 0 : i32
    %c0_i32_1 = arith.constant 0 : i32
    %c0_i32_2 = arith.constant 0 : i32
    return %arg0, %arg1, %c0_i32, %c0_i32_0, %c0_i32_1 : i32, i32, i32, i32, i32
  }
  func.func @transform_1(%arg0: i32, %arg1: i32) -> (i32, i32, i32) {
    %c0_i32 = arith.constant 0 : i32
    %c0_i32_0 = arith.constant 0 : i32
    %c0_i32_1 = arith.constant 0 : i32
    %c0_i32_2 = arith.constant 0 : i32
    return %c0_i32, %c0_i32_0, %c0_i32_1 : i32, i32, i32
  }
  func.func @transform_2(%arg0: i32, %arg1: i32) -> (i32, i32) {
    %c0_i32 = arith.constant 0 : i32
    %c0_i32_0 = arith.constant 0 : i32
    %c0_i32_1 = arith.constant 0 : i32
    return %c0_i32, %c0_i32_0 : i32, i32
  }
  func.func @transform_3(%arg0: i32, %arg1: i32) -> (i32, i32, i32, i32) {
    %c0_i32 = arith.constant 0 : i32
    %c0_i32_0 = arith.constant 0 : i32
    %c0_i32_1 = arith.constant 0 : i32
    return %arg0, %c0_i32, %arg1, %c0_i32_0 : i32, i32, i32, i32
  }
}

module attributes {stable_mosaic.version = 11 : i64} {
  func.func @_gemm_bias_act_kernel(%arg0: i32, %arg1: i32, %arg2: i32, %arg3: memref<16x256xbf16, #tpu.memory_space<vmem>>, %arg4: memref<256x256xbf16, #tpu.memory_space<vmem>>, %arg5: memref<1x256xf32, #tpu.memory_space<vmem>>, %arg6: memref<16x256xf32, #tpu.memory_space<vmem>>, %arg7: memref<16x256xf32, #tpu.memory_space<vmem>>) attributes {dimension_semantics = [#tpu.dimension_semantics<parallel>, #tpu.dimension_semantics<parallel>, #tpu.dimension_semantics<arbitrary>], iteration_bounds = array<i64: 1, 1, 1>, scalar_prefetch = 0 : i64, scratch_operands = 1 : i64, tpu.core_type = #tpu.core_type<tc>, window_params = [{transform_indices = @transform_0, window_bounds = array<i64: 16, 256>}, {transform_indices = @transform_1, window_bounds = array<i64: 256, 256>}, {transform_indices = @transform_2, window_bounds = array<i64: 1, 256>}, {transform_indices = @transform_3, window_bounds = array<i64: 16, 256>}]} {
    %c0_i32 = arith.constant 0 : i32
    %0 = arith.cmpi eq, %arg2, %c0_i32 : i32
    %1 = arith.extui %0 : i1 to i32
    %c0_i32_0 = arith.constant 0 : i32
    %2 = arith.cmpi ne, %1, %c0_i32_0 : i32
    scf.if %2 {
      %cst_10 = arith.constant 0.000000e+00 : f32
      %12 = vector.broadcast %cst_10 : f32 to vector<16x256xf32>
      %c0_11 = arith.constant 0 : index
      %c0_12 = arith.constant 0 : index
      %13 = vector.load %arg7[%c0_11, %c0_12] : memref<16x256xf32, #tpu.memory_space<vmem>>, vector<16x256xf32>
      tpu.vector_store %arg7[%c0_11, %c0_12], %12 {strides = array<i32>} : memref<16x256xf32, #tpu.memory_space<vmem>>, vector<16x256xf32>,
    } else {
    }
    %c0 = arith.constant 0 : index
    %c0_1 = arith.constant 0 : index
    %3 = vector.load %arg7[%c0, %c0_1] : memref<16x256xf32, #tpu.memory_space<vmem>>, vector<16x256xf32>
    %c0_2 = arith.constant 0 : index
    %c0_3 = arith.constant 0 : index
    %4 = vector.load %arg3[%c0_2, %c0_3] : memref<16x256xbf16, #tpu.memory_space<vmem>>, vector<16x256xbf16>
    %c0_4 = arith.constant 0 : index
    %c0_5 = arith.constant 0 : index
    %5 = vector.load %arg4[%c0_4, %c0_5] : memref<256x256xbf16, #tpu.memory_space<vmem>>, vector<256x256xbf16>
    %cst = arith.constant dense<0.000000e+00> : vector<16x256xf32>
    %6 = tpu.matmul %4, %5, %cst {dimension_numbers = #tpu.dot_dimension_numbers<[1], [0], [0], [1], [0, 0, 1, 1], [], []>} : vector<16x256xbf16>, vector<256x256xbf16>, vector<16x256xf32> -> vector<16x256xf32>
    %7 = arith.addf %3, %6 : vector<16x256xf32>
    %c0_6 = arith.constant 0 : index
    %c0_7 = arith.constant 0 : index
    %8 = vector.load %arg7[%c0_6, %c0_7] : memref<16x256xf32, #tpu.memory_space<vmem>>, vector<16x256xf32>
    tpu.vector_store %arg7[%c0_6, %c0_7], %7 {strides = array<i32>} : memref<16x256xf32, #tpu.memory_space<vmem>>, vector<16x256xf32>,
    %c0_i32_8 = arith.constant 0 : i32
    %9 = arith.cmpi eq, %arg2, %c0_i32_8 : i32
    %10 = arith.extui %9 : i1 to i32
    %c0_i32_9 = arith.constant 0 : i32
    %11 = arith.cmpi ne, %10, %c0_i32_9 : i32
    scf.if %11 {
      %c0_10 = arith.constant 0 : index
      %c0_11 = arith.constant 0 : index
      %12 = vector.load %arg7[%c0_10, %c0_11] : memref<16x256xf32, #tpu.memory_space<vmem>>, vector<16x256xf32>
      %c0_12 = arith.constant 0 : index
      %c0_13 = arith.constant 0 : index
      %13 = vector.load %arg5[%c0_12, %c0_13] : memref<1x256xf32, #tpu.memory_space<vmem>>, vector<1x256xf32>
      %14 = vector.broadcast %13 : vector<1x256xf32> to vector<16x256xf32>
      %15 = arith.addf %12, %14 : vector<16x256xf32>
      %c0_14 = arith.constant 0 : index
      %c0_15 = arith.constant 0 : index
      %16 = vector.load %arg6[%c0_14, %c0_15] : memref<16x256xf32, #tpu.memory_space<vmem>>, vector<16x256xf32>
      tpu.vector_store %arg6[%c0_14, %c0_15], %15 {strides = array<i32>} : memref<16x256xf32, #tpu.memory_space<vmem>>, vector<16x256xf32>,
    } else {
    }
    return
  }
  func.func @transform_0(%arg0: i32, %arg1: i32, %arg2: i32) -> (i32, i32) {
    %c0_i32 = arith.constant 0 : i32
    return %arg0, %arg2 : i32, i32
  }
  func.func @transform_1(%arg0: i32, %arg1: i32, %arg2: i32) -> (i32, i32) {
    %c0_i32 = arith.constant 0 : i32
    return %arg2, %arg1 : i32, i32
  }
  func.func @transform_2(%arg0: i32, %arg1: i32, %arg2: i32) -> (i32, i32) {
    %c0_i32 = arith.constant 0 : i32
    %c0_i32_0 = arith.constant 0 : i32
    return %c0_i32, %arg1 : i32, i32
  }
  func.func @transform_3(%arg0: i32, %arg1: i32, %arg2: i32) -> (i32, i32) {
    %c0_i32 = arith.constant 0 : i32
    return %arg0, %arg1 : i32, i32
  }
}

module attributes {stable_mosaic.version = 11 : i64} {
  func.func @_bilstm_recurrent_kernel(%arg0: i32, %arg1: memref<8x2x128xf32, #tpu.memory_space<vmem>>, %arg2: memref<8x2x128xf32, #tpu.memory_space<vmem>>, %arg3: memref<32x128xf32, #tpu.memory_space<vmem>>, %arg4: memref<32x128xf32, #tpu.memory_space<vmem>>, %arg5: memref<8x2x32xf32, #tpu.memory_space<vmem>>, %arg6: memref<8x2x32xf32, #tpu.memory_space<vmem>>, %arg7: memref<2x32xf32, #tpu.memory_space<vmem>>, %arg8: memref<2x32xf32, #tpu.memory_space<vmem>>, %arg9: memref<2x32xf32, #tpu.memory_space<vmem>>, %arg10: memref<2x32xf32, #tpu.memory_space<vmem>>) attributes {dimension_semantics = [#tpu.dimension_semantics<arbitrary>], iteration_bounds = array<i64: 1>, scalar_prefetch = 0 : i64, scratch_operands = 4 : i64, tpu.core_type = #tpu.core_type<tc>, window_params = [{transform_indices = @transform_0, window_bounds = array<i64: 8, 2, 128>}, {transform_indices = @transform_1, window_bounds = array<i64: 8, 2, 128>}, {pipeline_mode = #tpu.pipeline_mode<synchronous>, transform_indices = @transform_2, window_bounds = array<i64: 32, 128>}, {pipeline_mode = #tpu.pipeline_mode<synchronous>, transform_indices = @transform_3, window_bounds = array<i64: 32, 128>}, {transform_indices = @transform_4, window_bounds = array<i64: 8, 2, 32>}, {transform_indices = @transform_5, window_bounds = array<i64: 8, 2, 32>}]} {
    %c0_i32 = arith.constant 0 : i32
    %0 = arith.cmpi eq, %arg0, %c0_i32 : i32
    %1 = arith.extui %0 : i1 to i32
    %c0_i32_0 = arith.constant 0 : i32
    %2 = arith.cmpi ne, %1, %c0_i32_0 : i32
    scf.if %2 {
      %cst = arith.constant 0.000000e+00 : f32
      %4 = vector.broadcast %cst : f32 to vector<2x32xf32>
      %c0 = arith.constant 0 : index
      %c0_3 = arith.constant 0 : index
      %5 = vector.load %arg7[%c0, %c0_3] : memref<2x32xf32, #tpu.memory_space<vmem>>, vector<2x32xf32>
      tpu.vector_store %arg7[%c0, %c0_3], %4 {strides = array<i32>} : memref<2x32xf32, #tpu.memory_space<vmem>>, vector<2x32xf32>,
      %cst_4 = arith.constant 0.000000e+00 : f32
      %6 = vector.broadcast %cst_4 : f32 to vector<2x32xf32>
      %c0_5 = arith.constant 0 : index
      %c0_6 = arith.constant 0 : index
      %7 = vector.load %arg8[%c0_5, %c0_6] : memref<2x32xf32, #tpu.memory_space<vmem>>, vector<2x32xf32>
      tpu.vector_store %arg8[%c0_5, %c0_6], %6 {strides = array<i32>} : memref<2x32xf32, #tpu.memory_space<vmem>>, vector<2x32xf32>,
      %cst_7 = arith.constant 0.000000e+00 : f32
      %8 = vector.broadcast %cst_7 : f32 to vector<2x32xf32>
      %c0_8 = arith.constant 0 : index
      %c0_9 = arith.constant 0 : index
      %9 = vector.load %arg9[%c0_8, %c0_9] : memref<2x32xf32, #tpu.memory_space<vmem>>, vector<2x32xf32>
      tpu.vector_store %arg9[%c0_8, %c0_9], %8 {strides = array<i32>} : memref<2x32xf32, #tpu.memory_space<vmem>>, vector<2x32xf32>,
      %cst_10 = arith.constant 0.000000e+00 : f32
      %10 = vector.broadcast %cst_10 : f32 to vector<2x32xf32>
      %c0_11 = arith.constant 0 : index
      %c0_12 = arith.constant 0 : index
      %11 = vector.load %arg10[%c0_11, %c0_12] : memref<2x32xf32, #tpu.memory_space<vmem>>, vector<2x32xf32>
      tpu.vector_store %arg10[%c0_11, %c0_12], %10 {strides = array<i32>} : memref<2x32xf32, #tpu.memory_space<vmem>>, vector<2x32xf32>,
    } else {
    }
    %c0_i32_1 = arith.constant 0 : i32
    %c8_i32 = arith.constant 8 : i32
    %3 = arith.addi %c0_i32_1, %c8_i32 : i32
    %c1_i32 = arith.constant 1 : i32
    scf.for %arg11 = %c0_i32_1 to %3 step %c1_i32  : i32 {
      %4 = arith.index_cast %arg11 : i32 to index
      %c0 = arith.constant 0 : index
      %c0_3 = arith.constant 0 : index
      %5 = vector.load %arg1[%4, %c0, %c0_3] : memref<8x2x128xf32, #tpu.memory_space<vmem>>, vector<1x2x128xf32>
      %6 = vector.shape_cast %5 : vector<1x2x128xf32> to vector<2x128xf32>
      %c0_4 = arith.constant 0 : index
      %c0_5 = arith.constant 0 : index
      %7 = vector.load %arg7[%c0_4, %c0_5] : memref<2x32xf32, #tpu.memory_space<vmem>>, vector<2x32xf32>
      %c0_6 = arith.constant 0 : index
      %c0_7 = arith.constant 0 : index
      %8 = vector.load %arg8[%c0_6, %c0_7] : memref<2x32xf32, #tpu.memory_space<vmem>>, vector<2x32xf32>
      %c0_8 = arith.constant 0 : index
      %c0_9 = arith.constant 0 : index
      %9 = vector.load %arg3[%c0_8, %c0_9] : memref<32x128xf32, #tpu.memory_space<vmem>>, vector<32x128xf32>
      %cst = arith.constant dense<0.000000e+00> : vector<2x128xf32>
      %10 = tpu.matmul %7, %9, %cst {dimension_numbers = #tpu.dot_dimension_numbers<[1], [0], [0], [1], [0, 0, 1, 1], [], []>} : vector<2x32xf32>, vector<32x128xf32>, vector<2x128xf32> -> vector<2x128xf32>
      %11 = arith.addf %6, %10 : vector<2x128xf32>
      %12 = vector.extract_strided_slice %11 {offsets = [0, 0], sizes = [2, 96], strides = [1, 1]} : vector<2x128xf32> to vector<2x96xf32>
      %13 = arith.negf %12 : vector<2x96xf32>
      %14 = math.exp %13 : vector<2x96xf32>
      %cst_10 = arith.constant 1.000000e+00 : f32
      %15 = vector.broadcast %cst_10 : f32 to vector<2x96xf32>
      %16 = arith.addf %15, %14 : vector<2x96xf32>
      %17 = arith.divf %15, %16 : vector<2x96xf32>
      %18 = vector.extract_strided_slice %11 {offsets = [0, 96], sizes = [2, 32], strides = [1, 1]} : vector<2x128xf32> to vector<2x32xf32>
      %19 = math.tanh %18 : vector<2x32xf32>
      %20 = vector.extract_strided_slice %17 {offsets = [0, 32], sizes = [2, 32], strides = [1, 1]} : vector<2x96xf32> to vector<2x32xf32>
      %21 = arith.mulf %20, %8 : vector<2x32xf32>
      %22 = vector.extract_strided_slice %17 {offsets = [0, 0], sizes = [2, 32], strides = [1, 1]} : vector<2x96xf32> to vector<2x32xf32>
      %23 = arith.mulf %22, %19 : vector<2x32xf32>
      %24 = arith.addf %21, %23 : vector<2x32xf32>
      %25 = vector.extract_strided_slice %17 {offsets = [0, 64], sizes = [2, 32], strides = [1, 1]} : vector<2x96xf32> to vector<2x32xf32>
      %26 = math.tanh %24 : vector<2x32xf32>
      %27 = arith.mulf %25, %26 : vector<2x32xf32>
      %c0_11 = arith.constant 0 : index
      %c0_12 = arith.constant 0 : index
      %28 = vector.load %arg7[%c0_11, %c0_12] : memref<2x32xf32, #tpu.memory_space<vmem>>, vector<2x32xf32>
      tpu.vector_store %arg7[%c0_11, %c0_12], %27 {strides = array<i32>} : memref<2x32xf32, #tpu.memory_space<vmem>>, vector<2x32xf32>,
      %c0_13 = arith.constant 0 : index
      %c0_14 = arith.constant 0 : index
      %29 = vector.load %arg8[%c0_13, %c0_14] : memref<2x32xf32, #tpu.memory_space<vmem>>, vector<2x32xf32>
      tpu.vector_store %arg8[%c0_13, %c0_14], %24 {strides = array<i32>} : memref<2x32xf32, #tpu.memory_space<vmem>>, vector<2x32xf32>,
      %30 = arith.index_cast %arg11 : i32 to index
      %c0_15 = arith.constant 0 : index
      %c0_16 = arith.constant 0 : index
      %31 = vector.load %arg5[%30, %c0_15, %c0_16] : memref<8x2x32xf32, #tpu.memory_space<vmem>>, vector<1x2x32xf32>
      %32 = vector.shape_cast %31 : vector<1x2x32xf32> to vector<2x32xf32>
      %33 = vector.shape_cast %27 : vector<2x32xf32> to vector<1x2x32xf32>
      tpu.vector_store %arg5[%30, %c0_15, %c0_16], %33 {strides = array<i32>} : memref<8x2x32xf32, #tpu.memory_space<vmem>>, vector<1x2x32xf32>,
      %c7_i32 = arith.constant 7 : i32
      %34 = arith.subi %c7_i32, %arg11 : i32
      %35 = arith.index_cast %34 : i32 to index
      %c0_17 = arith.constant 0 : index
      %c0_18 = arith.constant 0 : index
      %36 = vector.load %arg2[%35, %c0_17, %c0_18] : memref<8x2x128xf32, #tpu.memory_space<vmem>>, vector<1x2x128xf32>
      %37 = vector.shape_cast %36 : vector<1x2x128xf32> to vector<2x128xf32>
      %c0_19 = arith.constant 0 : index
      %c0_20 = arith.constant 0 : index
      %38 = vector.load %arg9[%c0_19, %c0_20] : memref<2x32xf32, #tpu.memory_space<vmem>>, vector<2x32xf32>
      %c0_21 = arith.constant 0 : index
      %c0_22 = arith.constant 0 : index
      %39 = vector.load %arg10[%c0_21, %c0_22] : memref<2x32xf32, #tpu.memory_space<vmem>>, vector<2x32xf32>
      %c0_23 = arith.constant 0 : index
      %c0_24 = arith.constant 0 : index
      %40 = vector.load %arg4[%c0_23, %c0_24] : memref<32x128xf32, #tpu.memory_space<vmem>>, vector<32x128xf32>
      %cst_25 = arith.constant dense<0.000000e+00> : vector<2x128xf32>
      %41 = tpu.matmul %38, %40, %cst_25 {dimension_numbers = #tpu.dot_dimension_numbers<[1], [0], [0], [1], [0, 0, 1, 1], [], []>} : vector<2x32xf32>, vector<32x128xf32>, vector<2x128xf32> -> vector<2x128xf32>
      %42 = arith.addf %37, %41 : vector<2x128xf32>
      %43 = vector.extract_strided_slice %42 {offsets = [0, 0], sizes = [2, 96], strides = [1, 1]} : vector<2x128xf32> to vector<2x96xf32>
      %44 = arith.negf %43 : vector<2x96xf32>
      %45 = math.exp %44 : vector<2x96xf32>
      %cst_26 = arith.constant 1.000000e+00 : f32
      %46 = vector.broadcast %cst_26 : f32 to vector<2x96xf32>
      %47 = arith.addf %46, %45 : vector<2x96xf32>
      %48 = arith.divf %46, %47 : vector<2x96xf32>
      %49 = vector.extract_strided_slice %42 {offsets = [0, 96], sizes = [2, 32], strides = [1, 1]} : vector<2x128xf32> to vector<2x32xf32>
      %50 = math.tanh %49 : vector<2x32xf32>
      %51 = vector.extract_strided_slice %48 {offsets = [0, 32], sizes = [2, 32], strides = [1, 1]} : vector<2x96xf32> to vector<2x32xf32>
      %52 = arith.mulf %51, %39 : vector<2x32xf32>
      %53 = vector.extract_strided_slice %48 {offsets = [0, 0], sizes = [2, 32], strides = [1, 1]} : vector<2x96xf32> to vector<2x32xf32>
      %54 = arith.mulf %53, %50 : vector<2x32xf32>
      %55 = arith.addf %52, %54 : vector<2x32xf32>
      %56 = vector.extract_strided_slice %48 {offsets = [0, 64], sizes = [2, 32], strides = [1, 1]} : vector<2x96xf32> to vector<2x32xf32>
      %57 = math.tanh %55 : vector<2x32xf32>
      %58 = arith.mulf %56, %57 : vector<2x32xf32>
      %c0_27 = arith.constant 0 : index
      %c0_28 = arith.constant 0 : index
      %59 = vector.load %arg9[%c0_27, %c0_28] : memref<2x32xf32, #tpu.memory_space<vmem>>, vector<2x32xf32>
      tpu.vector_store %arg9[%c0_27, %c0_28], %58 {strides = array<i32>} : memref<2x32xf32, #tpu.memory_space<vmem>>, vector<2x32xf32>,
      %c0_29 = arith.constant 0 : index
      %c0_30 = arith.constant 0 : index
      %60 = vector.load %arg10[%c0_29, %c0_30] : memref<2x32xf32, #tpu.memory_space<vmem>>, vector<2x32xf32>
      tpu.vector_store %arg10[%c0_29, %c0_30], %55 {strides = array<i32>} : memref<2x32xf32, #tpu.memory_space<vmem>>, vector<2x32xf32>,
      %61 = arith.index_cast %34 : i32 to index
      %c0_31 = arith.constant 0 : index
      %c0_32 = arith.constant 0 : index
      %62 = vector.load %arg6[%61, %c0_31, %c0_32] : memref<8x2x32xf32, #tpu.memory_space<vmem>>, vector<1x2x32xf32>
      %63 = vector.shape_cast %62 : vector<1x2x32xf32> to vector<2x32xf32>
      %64 = vector.shape_cast %58 : vector<2x32xf32> to vector<1x2x32xf32>
      tpu.vector_store %arg6[%61, %c0_31, %c0_32], %64 {strides = array<i32>} : memref<8x2x32xf32, #tpu.memory_space<vmem>>, vector<1x2x32xf32>,
    }
    %c8_i32_2 = arith.constant 8 : i32
    return
  }
  func.func @transform_0(%arg0: i32) -> (i32, i32, i32) {
    %c0_i32 = arith.constant 0 : i32
    %c0_i32_0 = arith.constant 0 : i32
    %c0_i32_1 = arith.constant 0 : i32
    return %arg0, %c0_i32, %c0_i32_0 : i32, i32, i32
  }
  func.func @transform_1(%arg0: i32) -> (i32, i32, i32) {
    %c0_i32 = arith.constant 0 : i32
    %0 = arith.subi %c0_i32, %arg0 : i32
    %c0_i32_0 = arith.constant 0 : i32
    %c1_i32 = arith.constant 1 : i32
    %c0_i32_1 = arith.constant 0 : i32
    return %0, %c0_i32_0, %c1_i32 : i32, i32, i32
  }
  func.func @transform_2(%arg0: i32) -> (i32, i32) {
    %c0_i32 = arith.constant 0 : i32
    %c0_i32_0 = arith.constant 0 : i32
    %c0_i32_1 = arith.constant 0 : i32
    return %c0_i32, %c0_i32_0 : i32, i32
  }
  func.func @transform_3(%arg0: i32) -> (i32, i32) {
    %c0_i32 = arith.constant 0 : i32
    %c0_i32_0 = arith.constant 0 : i32
    %c0_i32_1 = arith.constant 0 : i32
    return %c0_i32, %c0_i32_0 : i32, i32
  }
  func.func @transform_4(%arg0: i32) -> (i32, i32, i32) {
    %c0_i32 = arith.constant 0 : i32
    %c0_i32_0 = arith.constant 0 : i32
    %c0_i32_1 = arith.constant 0 : i32
    return %arg0, %c0_i32, %c0_i32_0 : i32, i32, i32
  }
  func.func @transform_5(%arg0: i32) -> (i32, i32, i32) {
    %c0_i32 = arith.constant 0 : i32
    %0 = arith.subi %c0_i32, %arg0 : i32
    %c0_i32_0 = arith.constant 0 : i32
    %c0_i32_1 = arith.constant 0 : i32
    %c0_i32_2 = arith.constant 0 : i32
    return %0, %c0_i32_0, %c0_i32_1 : i32, i32, i32
  }
}

module attributes {stable_mosaic.version = 11 : i64} {
  func.func @_gemm_bias_act_kernel(%arg0: i32, %arg1: i32, %arg2: i32, %arg3: memref<16x64xbf16, #tpu.memory_space<vmem>>, %arg4: memref<64x256xbf16, #tpu.memory_space<vmem>>, %arg5: memref<1x256xf32, #tpu.memory_space<vmem>>, %arg6: memref<16x256xf32, #tpu.memory_space<vmem>>, %arg7: memref<16x256xf32, #tpu.memory_space<vmem>>) attributes {dimension_semantics = [#tpu.dimension_semantics<parallel>, #tpu.dimension_semantics<parallel>, #tpu.dimension_semantics<arbitrary>], iteration_bounds = array<i64: 1, 1, 1>, scalar_prefetch = 0 : i64, scratch_operands = 1 : i64, tpu.core_type = #tpu.core_type<tc>, window_params = [{transform_indices = @transform_0, window_bounds = array<i64: 16, 64>}, {transform_indices = @transform_1, window_bounds = array<i64: 64, 256>}, {transform_indices = @transform_2, window_bounds = array<i64: 1, 256>}, {transform_indices = @transform_3, window_bounds = array<i64: 16, 256>}]} {
    %c0_i32 = arith.constant 0 : i32
    %0 = arith.cmpi eq, %arg2, %c0_i32 : i32
    %1 = arith.extui %0 : i1 to i32
    %c0_i32_0 = arith.constant 0 : i32
    %2 = arith.cmpi ne, %1, %c0_i32_0 : i32
    scf.if %2 {
      %cst_10 = arith.constant 0.000000e+00 : f32
      %12 = vector.broadcast %cst_10 : f32 to vector<16x256xf32>
      %c0_11 = arith.constant 0 : index
      %c0_12 = arith.constant 0 : index
      %13 = vector.load %arg7[%c0_11, %c0_12] : memref<16x256xf32, #tpu.memory_space<vmem>>, vector<16x256xf32>
      tpu.vector_store %arg7[%c0_11, %c0_12], %12 {strides = array<i32>} : memref<16x256xf32, #tpu.memory_space<vmem>>, vector<16x256xf32>,
    } else {
    }
    %c0 = arith.constant 0 : index
    %c0_1 = arith.constant 0 : index
    %3 = vector.load %arg7[%c0, %c0_1] : memref<16x256xf32, #tpu.memory_space<vmem>>, vector<16x256xf32>
    %c0_2 = arith.constant 0 : index
    %c0_3 = arith.constant 0 : index
    %4 = vector.load %arg3[%c0_2, %c0_3] : memref<16x64xbf16, #tpu.memory_space<vmem>>, vector<16x64xbf16>
    %c0_4 = arith.constant 0 : index
    %c0_5 = arith.constant 0 : index
    %5 = vector.load %arg4[%c0_4, %c0_5] : memref<64x256xbf16, #tpu.memory_space<vmem>>, vector<64x256xbf16>
    %cst = arith.constant dense<0.000000e+00> : vector<16x256xf32>
    %6 = tpu.matmul %4, %5, %cst {dimension_numbers = #tpu.dot_dimension_numbers<[1], [0], [0], [1], [0, 0, 1, 1], [], []>} : vector<16x64xbf16>, vector<64x256xbf16>, vector<16x256xf32> -> vector<16x256xf32>
    %7 = arith.addf %3, %6 : vector<16x256xf32>
    %c0_6 = arith.constant 0 : index
    %c0_7 = arith.constant 0 : index
    %8 = vector.load %arg7[%c0_6, %c0_7] : memref<16x256xf32, #tpu.memory_space<vmem>>, vector<16x256xf32>
    tpu.vector_store %arg7[%c0_6, %c0_7], %7 {strides = array<i32>} : memref<16x256xf32, #tpu.memory_space<vmem>>, vector<16x256xf32>,
    %c0_i32_8 = arith.constant 0 : i32
    %9 = arith.cmpi eq, %arg2, %c0_i32_8 : i32
    %10 = arith.extui %9 : i1 to i32
    %c0_i32_9 = arith.constant 0 : i32
    %11 = arith.cmpi ne, %10, %c0_i32_9 : i32
    scf.if %11 {
      %c0_10 = arith.constant 0 : index
      %c0_11 = arith.constant 0 : index
      %12 = vector.load %arg7[%c0_10, %c0_11] : memref<16x256xf32, #tpu.memory_space<vmem>>, vector<16x256xf32>
      %c0_12 = arith.constant 0 : index
      %c0_13 = arith.constant 0 : index
      %13 = vector.load %arg5[%c0_12, %c0_13] : memref<1x256xf32, #tpu.memory_space<vmem>>, vector<1x256xf32>
      %14 = vector.broadcast %13 : vector<1x256xf32> to vector<16x256xf32>
      %15 = arith.addf %12, %14 : vector<16x256xf32>
      %c0_14 = arith.constant 0 : index
      %c0_15 = arith.constant 0 : index
      %16 = vector.load %arg6[%c0_14, %c0_15] : memref<16x256xf32, #tpu.memory_space<vmem>>, vector<16x256xf32>
      tpu.vector_store %arg6[%c0_14, %c0_15], %15 {strides = array<i32>} : memref<16x256xf32, #tpu.memory_space<vmem>>, vector<16x256xf32>,
    } else {
    }
    return
  }
  func.func @transform_0(%arg0: i32, %arg1: i32, %arg2: i32) -> (i32, i32) {
    %c0_i32 = arith.constant 0 : i32
    return %arg0, %arg2 : i32, i32
  }
  func.func @transform_1(%arg0: i32, %arg1: i32, %arg2: i32) -> (i32, i32) {
    %c0_i32 = arith.constant 0 : i32
    return %arg2, %arg1 : i32, i32
  }
  func.func @transform_2(%arg0: i32, %arg1: i32, %arg2: i32) -> (i32, i32) {
    %c0_i32 = arith.constant 0 : i32
    %c0_i32_0 = arith.constant 0 : i32
    return %c0_i32, %arg1 : i32, i32
  }
  func.func @transform_3(%arg0: i32, %arg1: i32, %arg2: i32) -> (i32, i32) {
    %c0_i32 = arith.constant 0 : i32
    return %arg0, %arg1 : i32, i32
  }
}

module attributes {stable_mosaic.version = 11 : i64} {
  func.func @_gemm_bias_act_kernel(%arg0: i32, %arg1: i32, %arg2: i32, %arg3: memref<16x64xbf16, #tpu.memory_space<vmem>>, %arg4: memref<64x16xbf16, #tpu.memory_space<vmem>>, %arg5: memref<1x16xf32, #tpu.memory_space<vmem>>, %arg6: memref<16x16xf32, #tpu.memory_space<vmem>>, %arg7: memref<16x16xf32, #tpu.memory_space<vmem>>) attributes {dimension_semantics = [#tpu.dimension_semantics<parallel>, #tpu.dimension_semantics<parallel>, #tpu.dimension_semantics<arbitrary>], iteration_bounds = array<i64: 1, 1, 1>, scalar_prefetch = 0 : i64, scratch_operands = 1 : i64, tpu.core_type = #tpu.core_type<tc>, window_params = [{transform_indices = @transform_0, window_bounds = array<i64: 16, 64>}, {transform_indices = @transform_1, window_bounds = array<i64: 64, 16>}, {transform_indices = @transform_2, window_bounds = array<i64: 1, 16>}, {transform_indices = @transform_3, window_bounds = array<i64: 16, 16>}]} {
    %c0_i32 = arith.constant 0 : i32
    %0 = arith.cmpi eq, %arg2, %c0_i32 : i32
    %1 = arith.extui %0 : i1 to i32
    %c0_i32_0 = arith.constant 0 : i32
    %2 = arith.cmpi ne, %1, %c0_i32_0 : i32
    scf.if %2 {
      %cst_10 = arith.constant 0.000000e+00 : f32
      %12 = vector.broadcast %cst_10 : f32 to vector<16x16xf32>
      %c0_11 = arith.constant 0 : index
      %c0_12 = arith.constant 0 : index
      %13 = vector.load %arg7[%c0_11, %c0_12] : memref<16x16xf32, #tpu.memory_space<vmem>>, vector<16x16xf32>
      tpu.vector_store %arg7[%c0_11, %c0_12], %12 {strides = array<i32>} : memref<16x16xf32, #tpu.memory_space<vmem>>, vector<16x16xf32>,
    } else {
    }
    %c0 = arith.constant 0 : index
    %c0_1 = arith.constant 0 : index
    %3 = vector.load %arg7[%c0, %c0_1] : memref<16x16xf32, #tpu.memory_space<vmem>>, vector<16x16xf32>
    %c0_2 = arith.constant 0 : index
    %c0_3 = arith.constant 0 : index
    %4 = vector.load %arg3[%c0_2, %c0_3] : memref<16x64xbf16, #tpu.memory_space<vmem>>, vector<16x64xbf16>
    %c0_4 = arith.constant 0 : index
    %c0_5 = arith.constant 0 : index
    %5 = vector.load %arg4[%c0_4, %c0_5] : memref<64x16xbf16, #tpu.memory_space<vmem>>, vector<64x16xbf16>
    %cst = arith.constant dense<0.000000e+00> : vector<16x16xf32>
    %6 = tpu.matmul %4, %5, %cst {dimension_numbers = #tpu.dot_dimension_numbers<[1], [0], [0], [1], [0, 0, 1, 1], [], []>} : vector<16x64xbf16>, vector<64x16xbf16>, vector<16x16xf32> -> vector<16x16xf32>
    %7 = arith.addf %3, %6 : vector<16x16xf32>
    %c0_6 = arith.constant 0 : index
    %c0_7 = arith.constant 0 : index
    %8 = vector.load %arg7[%c0_6, %c0_7] : memref<16x16xf32, #tpu.memory_space<vmem>>, vector<16x16xf32>
    tpu.vector_store %arg7[%c0_6, %c0_7], %7 {strides = array<i32>} : memref<16x16xf32, #tpu.memory_space<vmem>>, vector<16x16xf32>,
    %c0_i32_8 = arith.constant 0 : i32
    %9 = arith.cmpi eq, %arg2, %c0_i32_8 : i32
    %10 = arith.extui %9 : i1 to i32
    %c0_i32_9 = arith.constant 0 : i32
    %11 = arith.cmpi ne, %10, %c0_i32_9 : i32
    scf.if %11 {
      %c0_10 = arith.constant 0 : index
      %c0_11 = arith.constant 0 : index
      %12 = vector.load %arg7[%c0_10, %c0_11] : memref<16x16xf32, #tpu.memory_space<vmem>>, vector<16x16xf32>
      %c0_12 = arith.constant 0 : index
      %c0_13 = arith.constant 0 : index
      %13 = vector.load %arg5[%c0_12, %c0_13] : memref<1x16xf32, #tpu.memory_space<vmem>>, vector<1x16xf32>
      %14 = vector.broadcast %13 : vector<1x16xf32> to vector<16x16xf32>
      %15 = arith.addf %12, %14 : vector<16x16xf32>
      %16 = arith.negf %15 : vector<16x16xf32>
      %17 = math.exp %16 : vector<16x16xf32>
      %cst_14 = arith.constant 1.000000e+00 : f32
      %18 = vector.broadcast %cst_14 : f32 to vector<16x16xf32>
      %19 = arith.addf %18, %17 : vector<16x16xf32>
      %20 = arith.divf %18, %19 : vector<16x16xf32>
      %c0_15 = arith.constant 0 : index
      %c0_16 = arith.constant 0 : index
      %21 = vector.load %arg6[%c0_15, %c0_16] : memref<16x16xf32, #tpu.memory_space<vmem>>, vector<16x16xf32>
      tpu.vector_store %arg6[%c0_15, %c0_16], %20 {strides = array<i32>} : memref<16x16xf32, #tpu.memory_space<vmem>>, vector<16x16xf32>,
    } else {
    }
    return
  }
  func.func @transform_0(%arg0: i32, %arg1: i32, %arg2: i32) -> (i32, i32) {
    %c0_i32 = arith.constant 0 : i32
    return %arg0, %arg2 : i32, i32
  }
  func.func @transform_1(%arg0: i32, %arg1: i32, %arg2: i32) -> (i32, i32) {
    %c0_i32 = arith.constant 0 : i32
    return %arg2, %arg1 : i32, i32
  }
  func.func @transform_2(%arg0: i32, %arg1: i32, %arg2: i32) -> (i32, i32) {
    %c0_i32 = arith.constant 0 : i32
    %c0_i32_0 = arith.constant 0 : i32
    return %c0_i32, %arg1 : i32, i32
  }
  func.func @transform_3(%arg0: i32, %arg1: i32, %arg2: i32) -> (i32, i32) {
    %c0_i32 = arith.constant 0 : i32
    return %arg0, %arg1 : i32, i32
  }
}

</mosaic_0001>

<bundles_post_ra>
// kernel: crnn_transcriber_forward.9
= control target key start
LH: loop header
LB: loop body
LE: loop exit
PB: predicated region body
PF: predicated region fallthrough
CT: control target
= control target key end

     0   :  { %v290_v34 = vlaneseq  ;;  %s534_s1 = inlined_call_operand.vmem [shape: bf16[256,256], index: 1, kind: input, shape index: {}]   ;;  %s535_s0 = inlined_call_operand.vmem [shape: bf16[16,256], index: 0, kind: input, shape index: {}]   ;;  %s536_s2 = inlined_call_operand.vmem [shape: f32[1,256], index: 2, kind: input, shape index: {}]   ;;  %s537_s3 = inlined_call_operand.vmem [shape: f32[16,256], index: 3, kind: output, shape index: {}]  }
   0x1   :  { %v346_v0 = vld [vmem:[%s534_s1 + $0x74] ss:$8 sps:$4 sm:$0xff]   ;;  %v348_v1 = vld [vmem:[%s534_s1 + $0x70] ss:$8 sps:$4 sm:$0xff]   ;;  %v349_v2 = vld [vmem:[%s534_s1 + $0x64] ss:$8 sps:$4 sm:$0xff]  }
   0x2   :  { %230 = vmatprep.subr.bf16.mxu0 %v346_v0  ;;  %v351_v3 = vld [vmem:[%s534_s1 + $0x60] ss:$8 sps:$4 sm:$0xff]   ;;  %v352_v4 = vld [vmem:[%s534_s1 + $0x54] ss:$8 sps:$4 sm:$0xff]   ;;  %v354_v5 = vld [vmem:[%s534_s1 + $0x50] ss:$8 sps:$4 sm:$0xff]  }
   0x3   :  { %231 = vmatpush1.bf16.msra.mxu0 %v348_v1  ;;  %v355_v6 = vld [vmem:[%s534_s1 + $0x44] ss:$8 sps:$4 sm:$0xff]   ;;  %v357_v7 = vld [vmem:[%s534_s1 + $0x40] ss:$8 sps:$4 sm:$0xff]   ;;  %v358_v8 = vld [vmem:[%s534_s1 + $0x34] ss:$8 sps:$4 sm:$0xff]  }
   0x4   :  { %232 = vmatprep.subr.bf16.mxu0 %v349_v2  ;;  %v360_v9 = vld [vmem:[%s534_s1 + $0x30] ss:$8 sps:$4 sm:$0xff]   ;;  %v361_v10 = vld [vmem:[%s534_s1 + $0x24] ss:$8 sps:$4 sm:$0xff]   ;;  %v363_v11 = vld [vmem:[%s534_s1 + $0x20] ss:$8 sps:$4 sm:$0xff]  }
   0x5   :  { %v364_v12 = vld [vmem:[%s534_s1 + $0x14] ss:$8 sps:$4 sm:$0xff]   ;;  %v396_v13 = vld [vmem:[%s535_s0 + $0x4] ss:$8 sps:$4 sm:$0xff]   ;;  %v366_v14 = vld [vmem:[%s534_s1 + $0x10] ss:$8 sps:$4 sm:$0xff]  }
   0x6   :  { %v367_v15 = vld [vmem:[%s534_s1 + $0x4] ss:$8 sps:$4 sm:$0xff]   ;;  %262 = vmatprep.mubr.bf16.mxu0 %v396_v13  ;;  %v369_v16 = vld [vmem:[%s534_s1] ss:$8 sps:$4 sm:$0xff]   ;;  %v370_v17 = vld [vmem:[%s534_s1 + $0xf4] ss:$8 sps:$4 sm:$0xff]  }
   0x7   :  { %233 = vmatpush1.bf16.msra.mxu0 %v351_v3  ;;  %v372_v18 = vld [vmem:[%s534_s1 + $0xf0] ss:$8 sps:$4 sm:$0xff]   ;;  %v373_v19 = vld [vmem:[%s534_s1 + $0xe4] ss:$8 sps:$4 sm:$0xff]   ;;  %v375_v20 = vld [vmem:[%s534_s1 + $0xe0] ss:$8 sps:$4 sm:$0xff]  }
   0x8   :  { %234 = vmatprep.subr.bf16.mxu0 %v352_v4  ;;  %v376_v21 = vld [vmem:[%s534_s1 + $0xd4] ss:$8 sps:$4 sm:$0xff]   ;;  %v378_v22 = vld [vmem:[%s534_s1 + $0xd0] ss:$8 sps:$4 sm:$0xff]   ;;  %v379_v23 = vld [vmem:[%s534_s1 + $0xc4] ss:$8 sps:$4 sm:$0xff]  }
   0x9   :  { %v381_v24 = vld [vmem:[%s534_s1 + $0xc0] ss:$8 sps:$4 sm:$0xff]   ;;  %v382_v25 = vld [vmem:[%s534_s1 + $0xb4] ss:$8 sps:$4 sm:$0xff]   ;;  %v384_v26 = vld [vmem:[%s534_s1 + $0xb0] ss:$8 sps:$4 sm:$0xff]  }
   0xa   :  { %v385_v27 = vld [vmem:[%s534_s1 + $0xa4] ss:$8 sps:$4 sm:$0xff]   ;;  %v387_v28 = vld [vmem:[%s534_s1 + $0xa0] ss:$8 sps:$4 sm:$0xff]   ;;  %v388_v29 = vld [vmem:[%s534_s1 + $0x94] ss:$8 sps:$4 sm:$0xff]  }
   0xb   :  { %235 = vmatpush1.bf16.msra.mxu0 %v354_v5  ;;  %v390_v30 = vld [vmem:[%s534_s1 + $0x90] ss:$8 sps:$4 sm:$0xff]   ;;  %v391_v31 = vld [vmem:[%s534_s1 + $0x84] ss:$8 sps:$4 sm:$0xff]   ;;  %v393_v32 = vld [vmem:[%s534_s1 + $0x80] ss:$8 sps:$4 sm:$0xff]  }
   0xc   :  { %236 = vmatprep.subr.bf16.mxu0 %v355_v6  ;;  %v394_v33 = vld [vmem:[%s535_s0] ss:$8 sps:$4 sm:$0xff]   ;;  %v291_v35 = vshrl.u32 %v290_v34, 7 }
   0xd   :  { %v288_v37 = vld [vmem:[%s536_s2] sm:$0x3] }
   0xe   :  { %v292_v36 = vsub.s32 0, %v291_v35  ;;  %v296_v38 = vsub.s32 1, %v291_v35 }
   0xf   :  { %237 = vmatpush1.bf16.msra.mxu0 %v357_v7 }
  0x10   :  { %238 = vmatprep.subr.bf16.mxu0 %v358_v8  ;;  %v293_v39 = vrot.slane %v288_v37, %v292_v36  ;;  %v297_v40 = vrot.slane %v288_v37, %v296_v38 }
  0x13   :  { %239 = vmatpush1.bf16.msra.mxu0 %v360_v9 }
  0x14   :  { %240 = vmatprep.subr.bf16.mxu0 %v361_v10 }
  0x17   :  { %241 = vmatpush1.bf16.msra.mxu0 %v363_v11 }
  0x18   :  { %242 = vmatprep.subr.bf16.mxu0 %v364_v12 }
  0x1b   :  { %243 = vmatpush1.bf16.msra.mxu0 %v366_v14 }
  0x1c   :  { %244 = vmatprep.subr.bf16.mxu0 %v367_v15 }
  0x1f   :  { %245 = vmatpush1.bf16.msra.mxu0 %v369_v16 }
  0x20   :  { %246 = vmatprep.subr.bf16.mxu0 %v370_v17 }
  0x23   :  { %247 = vmatpush2.bf16.msra.mxu0 %v372_v18 }
  0x24   :  { %248 = vmatprep.subr.bf16.mxu0 %v373_v19 }
  0x27   :  { %249 = vmatpush2.bf16.msra.mxu0 %v375_v20 }
  0x28   :  { %250 = vmatprep.subr.bf16.mxu0 %v376_v21 }
  0x2b   :  { %251 = vmatpush2.bf16.msra.mxu0 %v378_v22 }
  0x2c   :  { %252 = vmatprep.subr.bf16.mxu0 %v379_v23 }
  0x2f   :  { %253 = vmatpush2.bf16.msra.mxu0 %v381_v24 }
  0x30   :  { %254 = vmatprep.subr.bf16.mxu0 %v382_v25 }
  0x33   :  { %255 = vmatpush2.bf16.msra.mxu0 %v384_v26 }
  0x34   :  { %256 = vmatprep.subr.bf16.mxu0 %v385_v27 }
  0x37   :  { %257 = vmatpush2.bf16.msra.mxu0 %v387_v28 }
  0x38   :  { %258 = vmatprep.subr.bf16.mxu0 %v388_v29 }
  0x3b   :  { %259 = vmatpush2.bf16.msra.mxu0 %v390_v30 }
  0x3c   :  { %260 = vmatprep.subr.bf16.mxu0 %v391_v31 }
  0x3f   :  { %261 = vmatpush2.bf16.msra.mxu0 %v393_v32 }
  0x42   :  { %263 = vmatmul.mubr.bf16.vlgmr.msra.gmra.mxu0 %v394_v33 }
 0x102   :  { %v264_v41 = vpop.f32.mrf.mxu0 }
 0x103   :  { %v300_v42 = vadd.f32 %v293_v39, %v264_v41 }
 0x104   :  { %v266_v43 = vpop.f32.mrf.mxu0 }
 0x105   :  { %304 = vst [vmem:[%s537_s3] sm:$0xff] %v300_v42  ;;  %v301_v44 = vadd.f32 %v297_v40, %v266_v43 }
 0x106   :  { %v268_v45 = vpop.f32.mrf.mxu0 }
 0x107   :  { %305 = vst [vmem:[%s537_s3 + $0x8] sm:$0xff] %v301_v44  ;;  %v302_v46 = vadd.f32 %v293_v39, %v268_v45 }
 0x108   :  { %v270_v47 = vpop.f32.mrf.mxu0 }
 0x109   :  { %306 = vst [vmem:[%s537_s3 + $0x10] sm:$0xff] %v302_v46  ;;  %v303_v48 = vadd.f32 %v297_v40, %v270_v47 }
 0x10b   :  { %307 = vst [vmem:[%s537_s3 + $0x18] sm:$0xff] %v303_v48 }

// kernel: crnn_transcriber_forward.7
= control target key start
LH: loop header
LB: loop body
LE: loop exit
PB: predicated region body
PF: predicated region fallthrough
CT: control target
= control target key end

     0   :  { %s1795_s12 = smov 0   ;;  %s1797_s13 = smov 0   ;;  %s2693_s0 = inlined_call_operand.vmem [shape: f32[2,1,18,10,1], index: 0, kind: input, shape index: {}]   ;;  %s2694_s1 = inlined_call_operand.vmem [shape: f32[9,1,32], index: 1, kind: input, shape index: {}]   ;;  %s2695_s2 = inlined_call_operand.vmem [shape: f32[1,32], index: 2, kind: input, shape index: {}]   ;;  %s2696_s3 = inlined_call_operand.vmem [shape: bf16[2,8,8,32], index: 3, kind: output, shape index: {}]  }
   0x1   :  { %s1799_s14 = smov 0  }
   0x2 LB: > { %s25_s15 = sadd.s32 1, %s1768_s13  ;;  %p1601_p0 = scmp.ge.s32.totalorder %s1772_s14, 1  ;;  %s1772_s14 = sphi %s1799_s14, %s13_s14   ;;  %s1768_s13 = sphi %s1797_s13, %s2783_s13   ;;  %s1764_s12 = sphi %s1795_s12, %s2782_s12  }
   0x3   : > { %p27_p1 = scmp.ge.s32.totalorder %s25_s15, 2  ;;  %p157_p2 = scmp.lt.s32.totalorder %s1772_s14, 3 }
   0x5   : > { %s2785_s15 = smov (%p27_p1, %s25_s15), 0  ;;  %p158_p3 = pnand %p1601_p0, %p157_p2 }
   0x7   : > { %161 = sbr.rel (%p158_p3) target bundleno = 442 (0x1ba), region = 32 }
   0xc   : > { %p188_p4 = scmp.lt.s32.totalorder %s1764_s12, 1  ;;  %v1774_v0 = vmov 0   ;;  %vm1469_vm0 = vcmask 261120   ;;  %vm1502_vm1 = vcmask 257024  }
   0xd   : > { %1749 = vset.pattern.permute.xlu1 %v1774_v0  ;;  %1748 = vset.pattern.permute.xlu0 %v1774_v0 }
   0xe   : > { %s2787_s12 = smov (!%p188_p4, %s1764_s12), 1 }
   0xf   : > { %s1722_s16 = smul.u32 288, %s2787_s12  ;;  %s1721_s17 = sshll.u32 %s2787_s12, 5 }
  0x11   : > { %s1819_s19 = scalar_lea.vmem %s2693_s0, %s1722_s16 }
  0x12   : > { %v1822_v1 = vld [vmem:[%s1819_s19 + $0x20] sm:$0xff]  ;;  %v1827_v3 = vld [vmem:[%s1819_s19 + $0x30] sm:$0xff] }
  0x13   : > { %v205_v2 = vld [vmem:[%s1819_s19] sm:$0xff]  ;;  %234 = vperm.xlu1 %1749, %v1822_v1   ;;  %v1830_v4 = vld [vmem:[%s1819_s19 + $0x10] sm:$0xff] }
  0x14   : > { %224 = vperm.xlu0 %1748, %v205_v2   ;;  %v1835_v5 = vld [vmem:[%s1819_s19 + $0x50] sm:$0xff]  ;;  %v1838_v6 = vld [vmem:[%s1819_s19 + $0x40] sm:$0xff] }
  0x15   : > { %v1843_v7 = vld [vmem:[%s1819_s19 + $0x70] sm:$0xff]  ;;  %v1846_v8 = vld [vmem:[%s1819_s19 + $0x60] sm:$0xff] }
  0x16   : > { %v1851_v9 = vld [vmem:[%s1819_s19 + $0x90] sm:$0xff]  ;;  %v1854_v10 = vld [vmem:[%s1819_s19 + $0x80] sm:$0xff] }
  0x17   : > { %239 = vperm.xlu1 %1749, %v1827_v3   ;;  %v1859_v11 = vld [vmem:[%s1819_s19 + $0xb0] sm:$0xff]  ;;  %v1862_v12 = vld [vmem:[%s1819_s19 + $0xa0] sm:$0xff] }
  0x18   : > { %229 = vperm.xlu0 %1748, %v1830_v4   ;;  %v1867_v13 = vld [vmem:[%s1819_s19 + $0xd0] sm:$0xff]  ;;  %v1870_v14 = vld [vmem:[%s1819_s19 + $0xc0] sm:$0xff] }
  0x19   : > { %v1875_v15 = vld [vmem:[%s1819_s19 + $0xf0] sm:$0xff]  ;;  %v1878_v16 = vld [vmem:[%s1819_s19 + $0xe0] sm:$0xff] }
  0x1a   : > { %v1883_v17 = vld [vmem:[%s1819_s19 + $0x11] sm:$0xff]  ;;  %v340_v18 = vld [vmem:[%s1819_s19 + $0x1] sm:$0xff] }
  0x1b   : > { %249 = vperm.xlu1 %1749, %v1835_v5   ;;  %v1888_v19 = vld [vmem:[%s1819_s19 + $0x31] sm:$0xff]  ;;  %v1891_v20 = vld [vmem:[%s1819_s19 + $0x21] sm:$0xff] }
  0x1c   : > { %244 = vperm.xlu0 %1748, %v1838_v6   ;;  %v1896_v21 = vld [vmem:[%s1819_s19 + $0x51] sm:$0xff]  ;;  %v1899_v22 = vld [vmem:[%s1819_s19 + $0x41] sm:$0xff] }
  0x1d   : > { %v1904_v23 = vld [vmem:[%s1819_s19 + $0x71] sm:$0xff]  ;;  %v1907_v24 = vld [vmem:[%s1819_s19 + $0x61] sm:$0xff] }
  0x1e   : > { %v1912_v25 = vld [vmem:[%s1819_s19 + $0x91] sm:$0xff]  ;;  %v1915_v26 = vld [vmem:[%s1819_s19 + $0x81] sm:$0xff] }
  0x1f   : > { %259 = vperm.xlu1 %1749, %v1843_v7   ;;  %v1920_v27 = vld [vmem:[%s1819_s19 + $0xb1] sm:$0xff]  ;;  %v1923_v28 = vld [vmem:[%s1819_s19 + $0xa1] sm:$0xff] }
  0x20   : > { %254 = vperm.xlu0 %1748, %v1846_v8   ;;  %v1928_v29 = vld [vmem:[%s1819_s19 + $0xd1] sm:$0xff]  ;;  %v1931_v30 = vld [vmem:[%s1819_s19 + $0xc1] sm:$0xff] }
  0x21   : > { %2716 = vst [vmem:[#allocation2_spill] sm:$0xff] %v1928_v29  ;;  %2717 = vst [vmem:[#allocation3_spill] sm:$0xff] %v1931_v30  ;;  %v1936_v31 = vld [vmem:[%s1819_s19 + $0xf1] sm:$0xff]  ;;  %v1939_v32 = vld [vmem:[%s1819_s19 + $0xe1] sm:$0xff] }
  0x22   : > { %2718 = vst [vmem:[#allocation4_spill] sm:$0xff] %v1936_v31  ;;  %2719 = vst [vmem:[#allocation5_spill] sm:$0xff] %v1939_v32  ;;  %v1944_v33 = vld [vmem:[%s1819_s19 + $0x12] sm:$0xff]  ;;  %v476_v34 = vld [vmem:[%s1819_s19 + $0x2] sm:$0xff] }
  0x23   : > { %269 = vperm.xlu1 %1749, %v1851_v9   ;;  %v1949_v35 = vld [vmem:[%s1819_s19 + $0x32] sm:$0xff]  ;;  %v1952_v36 = vld [vmem:[%s1819_s19 + $0x22] sm:$0xff] }
  0x24   : > { %264 = vperm.xlu0 %1748, %v1854_v10   ;;  %2720 = vst [vmem:[#allocation6_spill] sm:$0xff] %v1952_v36  ;;  %v1957_v37 = vld [vmem:[%s1819_s19 + $0x52] sm:$0xff]  ;;  %v1960_v38 = vld [vmem:[%s1819_s19 + $0x42] sm:$0xff] }
  0x25   : > { %2721 = vst [vmem:[#allocation7_spill] sm:$0xff] %v1957_v37  ;;  %2722 = vst [vmem:[#allocation8_spill] sm:$0xff] %v1960_v38  ;;  %v1965_v39 = vld [vmem:[%s1819_s19 + $0x72] sm:$0xff]  ;;  %v1968_v40 = vld [vmem:[%s1819_s19 + $0x62] sm:$0xff] }
  0x26   : > { %2723 = vst [vmem:[#allocation9_spill] sm:$0xff] %v1965_v39  ;;  %2724 = vst [vmem:[#allocation10_spill] sm:$0xff] %v1968_v40  ;;  %v1973_v41 = vld [vmem:[%s1819_s19 + $0x92] sm:$0xff]  ;;  %v1976_v42 = vld [vmem:[%s1819_s19 + $0x82] sm:$0xff] }
  0x27   : > { %279 = vperm.xlu1 %1749, %v1859_v11   ;;  %2725 = vst [vmem:[#allocation11_spill] sm:$0xff] %v1973_v41  ;;  %2726 = vst [vmem:[#allocation12_spill] sm:$0xff] %v1976_v42  ;;  %v1981_v43 = vld [vmem:[%s1819_s19 + $0xb2] sm:$0xff]  ;;  %v1984_v44 = vld [vmem:[%s1819_s19 + $0xa2] sm:$0xff] }
  0x28   : > { %274 = vperm.xlu0 %1748, %v1862_v12   ;;  %2727 = vst [vmem:[#allocation13_spill] sm:$0xff] %v1981_v43  ;;  %2728 = vst [vmem:[#allocation14_spill] sm:$0xff] %v1984_v44  ;;  %v1989_v45 = vld [vmem:[%s1819_s19 + $0xd2] sm:$0xff]  ;;  %v1992_v46 = vld [vmem:[%s1819_s19 + $0xc2] sm:$0xff] }
  0x29   : > { %2729 = vst [vmem:[#allocation15_spill] sm:$0xff] %v1989_v45  ;;  %2730 = vst [vmem:[#allocation16_spill] sm:$0xff] %v1992_v46  ;;  %v1997_v47 = vld [vmem:[%s1819_s19 + $0xf2] sm:$0xff]  ;;  %v2000_v48 = vld [vmem:[%s1819_s19 + $0xe2] sm:$0xff] }
  0x2a   : > { %2731 = vst [vmem:[#allocation17_spill] sm:$0xff] %v1997_v47  ;;  %2732 = vst [vmem:[#allocation18_spill] sm:$0xff] %v2000_v48  ;;  %v2019_v49 = vld [vmem:[%s1819_s19 + $0x100] sm:$0xff] }
  0x2b   : > { %289 = vperm.xlu1 %1749, %v1867_v13  }
  0x2c   : > { %284 = vperm.xlu0 %1748, %v1870_v14  }
  0x2f   : > { %299 = vperm.xlu1 %1749, %v1875_v15  }
  0x30   : > { %294 = vperm.xlu0 %1748, %v1878_v16  }
  0x33   : > { %365 = vperm.xlu1 %1749, %v1883_v17  }
  0x34   : > { %360 = vperm.xlu0 %1748, %v340_v18  }
  0x37   : > { %375 = vperm.xlu1 %1749, %v1888_v19  }
  0x38   : > { %370 = vperm.xlu0 %1748, %v1891_v20  }
  0x3b   : > { %385 = vperm.xlu1 %1749, %v1896_v21  }
  0x3c   : > { %380 = vperm.xlu0 %1748, %v1899_v22  }
  0x3f   : > { %395 = vperm.xlu1 %1749, %v1904_v23  }
  0x40   : > { %390 = vperm.xlu0 %1748, %v1907_v24  }
  0x43   : > { %405 = vperm.xlu1 %1749, %v1912_v25  }
  0x44   : > { %400 = vperm.xlu0 %1748, %v1915_v26  }
  0x47   : > { %415 = vperm.xlu1 %1749, %v1920_v27  }
  0x48   : > { %410 = vperm.xlu0 %1748, %v1923_v28  }
  0x4b   : > { %425 = vperm.xlu1 %1749, %v1928_v29  }
  0x4c   : > { %420 = vperm.xlu0 %1748, %v1931_v30  }
  0x4f   : > { %435 = vperm.xlu1 %1749, %v1936_v31  }
  0x50   : > { %430 = vperm.xlu0 %1748, %v1939_v32  }
  0x53   : > { %501 = vperm.xlu1 %1749, %v1944_v33  }
  0x54   : > { %496 = vperm.xlu0 %1748, %v476_v34  }
  0x57   : > { %511 = vperm.xlu1 %1749, %v1949_v35  }
  0x58   : > { %506 = vperm.xlu0 %1748, %v1952_v36  }
  0x5b   : > { %521 = vperm.xlu1 %1749, %v1957_v37  }
  0x5c   : > { %516 = vperm.xlu0 %1748, %v1960_v38  }
  0x5f   : > { %531 = vperm.xlu1 %1749, %v1965_v39  }
  0x60   : > { %526 = vperm.xlu0 %1748, %v1968_v40  }
  0x63   : > { %541 = vperm.xlu1 %1749, %v1973_v41  }
  0x64   : > { %536 = vperm.xlu0 %1748, %v1976_v42  }
  0x67   : > { %551 = vperm.xlu1 %1749, %v1981_v43  }
  0x68   : > { %546 = vperm.xlu0 %1748, %v1984_v44  }
  0x6b   : > { %561 = vperm.xlu1 %1749, %v1989_v45  }
  0x6c   : > { %556 = vperm.xlu0 %1748, %v1992_v46  }
  0x6f   : > { %571 = vperm.xlu1 %1749, %v1997_v47  }
  0x70   : > { %566 = vperm.xlu0 %1748, %v2000_v48  }
  0x73   : > { %638 = vperm.xlu1 %1749, %v1822_v1  }
  0x74   : > { %633 = vperm.xlu0 %1748, %v1830_v4   ;;  %v2070_v4 = vld [vmem:[%s1819_s19 + $0x101] sm:$0xff] }
  0x75   : > { %2734 = vst [vmem:[#allocation20_spill] sm:$0xff] %v2070_v4 }
  0x77   : > { %648 = vperm.xlu1 %1749, %v1838_v6  }
  0x78   : > { %643 = vperm.xlu0 %1748, %v1827_v3  }
  0x7b   : > { %658 = vperm.xlu1 %1749, %v1846_v8  }
  0x7c   : > { %653 = vperm.xlu0 %1748, %v1835_v5  }
  0x7f   : > { %668 = vperm.xlu1 %1749, %v1854_v10  }
  0x80   : > { %663 = vperm.xlu0 %1748, %v1843_v7  }
  0x83   : > { %678 = vperm.xlu1 %1749, %v1862_v12  }
  0x84   : > { %673 = vperm.xlu0 %1748, %v1851_v9  }
  0x87   : > { %688 = vperm.xlu1 %1749, %v1870_v14  }
  0x88   : > { %683 = vperm.xlu0 %1748, %v1859_v11  }
  0x8b   : > { %698 = vperm.xlu1 %1749, %v1878_v16  }
  0x8c   : > { %693 = vperm.xlu0 %1748, %v1867_v13  }
  0x8e   : > { %v2021_v50 = vpop.permute.xlu1 %234 }
  0x8f   : > { %v2023_v51 = vpop.permute.xlu0 %224  ;;  %708 = vperm.xlu1 %1749, %v2019_v49  }
  0x90   : > { %703 = vperm.xlu0 %1748, %v1875_v15  }
  0x92   : > { %v2027_v52 = vpop.permute.xlu1 %239 }
  0x93   : > { %v2029_v53 = vpop.permute.xlu0 %229  ;;  %774 = vperm.xlu1 %1749, %v1891_v20  }
  0x94   : > { %769 = vperm.xlu0 %1748, %v1883_v17  }
  0x96   : > { %v2033_v54 = vpop.permute.xlu1 %249 }
  0x97   : > { %v2035_v55 = vpop.permute.xlu0 %244  ;;  %784 = vperm.xlu1 %1749, %v1899_v22  }
  0x98   : > { %779 = vperm.xlu0 %1748, %v1888_v19  }
  0x9a   : > { %v2039_v56 = vpop.permute.xlu1 %259 }
  0x9b   : > { %v2041_v57 = vpop.permute.xlu0 %254  ;;  %794 = vperm.xlu1 %1749, %v1907_v24  }
  0x9c   : > { %789 = vperm.xlu0 %1748, %v1896_v21  }
  0x9e   : > { %v2045_v58 = vpop.permute.xlu1 %269 }
  0x9f   : > { %v2047_v59 = vpop.permute.xlu0 %264  ;;  %804 = vperm.xlu1 %1749, %v1915_v26  }
  0xa0   : > { %799 = vperm.xlu0 %1748, %v1904_v23  }
  0xa2   : > { %v2051_v60 = vpop.permute.xlu1 %279 }
  0xa3   : > { %v2053_v61 = vpop.permute.xlu0 %274  ;;  %814 = vperm.xlu1 %1749, %v1923_v28  }
  0xa4   : > { %809 = vperm.xlu0 %1748, %v1912_v25  }
  0xa6   : > { %v2057_v62 = vpop.permute.xlu1 %289 }
  0xa7   : > { %v2059_v63 = vpop.permute.xlu0 %284  ;;  %824 = vperm.xlu1 %1749, %v1931_v30  }
  0xa8   : > { %2733 = vst [vmem:[#allocation19_spill] sm:$0xff] %v2059_v63  ;;  %819 = vperm.xlu0 %1748, %v1920_v27  }
  0xaa   : > { %v2063_v0 = vpop.permute.xlu1 %299 }
  0xab   : > { %v2065_v2 = vpop.permute.xlu0 %294  ;;  %834 = vperm.xlu1 %1749, %v1939_v32  }
  0xac   : > { %829 = vperm.xlu0 %1748, %v1928_v29  }
  0xae   : > { %v2072_v17 = vpop.permute.xlu1 %365 }
  0xaf   : > { %v2074_v18 = vpop.permute.xlu0 %360  ;;  %844 = vperm.xlu1 %1749, %v2070_v4  }
  0xb0   : > { %839 = vperm.xlu0 %1748, %v1936_v31  }
  0xb2   : > { %v2078_v34 = vpop.permute.xlu1 %375 }
  0xb3   : > { %v2080_v63 = vpop.permute.xlu0 %370  ;;  %910 = vperm.xlu1 %1749, %v1952_v36  }
  0xb4   : > { %905 = vperm.xlu0 %1748, %v1944_v33  }
  0xb6   : > { %v2084_v32 = vpop.permute.xlu1 %385 }
  0xb7   : > { %v2086_v30 = vpop.permute.xlu0 %380  ;;  %920 = vperm.xlu1 %1749, %v1960_v38  }
  0xb8   : > { %915 = vperm.xlu0 %1748, %v1949_v35  }
  0xba   : > { %v2090_v29 = vpop.permute.xlu1 %395 }
  0xbb   : > { %v2092_v4 = vpop.permute.xlu0 %390  ;;  %930 = vperm.xlu1 %1749, %v1968_v40  }
  0xbc   : > { %925 = vperm.xlu0 %1748, %v1957_v37  }
  0xbe   : > { %v2096_v31 = vpop.permute.xlu1 %405 }
  0xbf   : > { %v2098_v33 = vpop.permute.xlu0 %400  ;;  %940 = vperm.xlu1 %1749, %v1976_v42  }
  0xc0   : > { %2735 = vst [vmem:[#allocation21_spill] sm:$0xff] %v2098_v33  ;;  %935 = vperm.xlu0 %1748, %v1965_v39   ;;  %v2121_v39 = vld [vmem:[%s1819_s19 + $0x102] sm:$0xff] }
  0xc1   : > { %2738 = vst [vmem:[#allocation24_spill] sm:$0xff] %v2121_v39 }
  0xc2   : > { %v2102_v38 = vpop.permute.xlu1 %415 }
  0xc3   : > { %v2104_v36 = vpop.permute.xlu0 %410  ;;  %950 = vperm.xlu1 %1749, %v1984_v44  }
  0xc4   : > { %945 = vperm.xlu0 %1748, %v1973_v41  }
  0xc6   : > { %v2108_v40 = vpop.permute.xlu1 %425 }
  0xc7   : > { %2736 = vst [vmem:[#allocation22_spill] sm:$0xff] %v2108_v40  ;;  %v2110_v37 = vpop.permute.xlu0 %420  ;;  %960 = vperm.xlu1 %1749, %v1992_v46  }
  0xc8   : > { %2737 = vst [vmem:[#allocation23_spill] sm:$0xff] %v2110_v37  ;;  %955 = vperm.xlu0 %1748, %v1981_v43  }
  0xca   : > { %v2114_v33 = vpop.permute.xlu1 %435 }
  0xcb   : > { %v2116_v42 = vpop.permute.xlu0 %430  ;;  %970 = vperm.xlu1 %1749, %v2000_v48  }
  0xcc   : > { %965 = vperm.xlu0 %1748, %v1989_v45  }
  0xce   : > { %v2123_v44 = vpop.permute.xlu1 %501 }
  0xcf   : > { %v2125_v41 = vpop.permute.xlu0 %496  ;;  %980 = vperm.xlu1 %1749, %v2121_v39  }
  0xd0   : > { %975 = vperm.xlu0 %1748, %v1997_v47  }
  0xd2   : > { %v2129_v46 = vpop.permute.xlu1 %511 }
  0xd3   : > { %v2131_v43 = vpop.permute.xlu0 %506  ;;  %1047 = vperm.xlu1 %1749, %v1827_v3  }
  0xd4   : > { %1042 = vperm.xlu0 %1748, %v1822_v1  }
  0xd6   : > { %v2135_v48 = vpop.permute.xlu1 %521 }
  0xd7   : > { %v2137_v45 = vpop.permute.xlu0 %516  ;;  %1057 = vperm.xlu1 %1749, %v1835_v5  }
  0xd8   : > { %1052 = vperm.xlu0 %1748, %v1838_v6  }
  0xda   : > { %v2141_v37 = vpop.permute.xlu1 %531 }
  0xdb   : > { %v2143_v39 = vpop.permute.xlu0 %526  ;;  %1067 = vperm.xlu1 %1749, %v1843_v7  }
  0xdc   : > { %1062 = vperm.xlu0 %1748, %v1846_v8  }
  0xde   : > { %v2147_v47 = vpop.permute.xlu1 %541 }
  0xdf   : > { %v2149_v1 = vpop.permute.xlu0 %536  ;;  %1077 = vperm.xlu1 %1749, %v1851_v9  }
  0xe0   : > { %1072 = vperm.xlu0 %1748, %v1854_v10   ;;  %v1679_v10 = vld [vmem:[%s1819_s19 + $0x110] sm:$0xff] }
  0xe2   : > { %v2153_v3 = vpop.permute.xlu1 %551 }
  0xe3   : > { %2739 = vst [vmem:[#allocation25_spill] sm:$0xff] %v2153_v3  ;;  %v2155_v5 = vpop.permute.xlu0 %546  ;;  %1087 = vperm.xlu1 %1749, %v1859_v11  }
  0xe4   : > { %2740 = vst [vmem:[#allocation26_spill] sm:$0xff] %v2155_v5  ;;  %1082 = vperm.xlu0 %1748, %v1862_v12  }
  0xe6   : > { %v2159_v6 = vpop.permute.xlu1 %561 }
  0xe7   : > { %2741 = vst [vmem:[#allocation27_spill] sm:$0xff] %v2159_v6  ;;  %v2161_v7 = vpop.permute.xlu0 %556  ;;  %1097 = vperm.xlu1 %1749, %v1867_v13  }
  0xe8   : > { %2742 = vst [vmem:[#allocation28_spill] sm:$0xff] %v2161_v7  ;;  %1092 = vperm.xlu0 %1748, %v1870_v14  }
  0xea   : > { %v572_v8 = vpop.permute.xlu1 %571 }
  0xeb   : > { %v567_v9 = vpop.permute.xlu0 %566  ;;  %1107 = vperm.xlu1 %1749, %v1875_v15  }
  0xec   : > { %1102 = vperm.xlu0 %1748, %v1878_v16  }
  0xee   : > { %v2168_v40 = vpop.permute.xlu1 %638 }
  0xef   : > { %v2170_v11 = vpop.permute.xlu0 %633  ;;  %1117 = vperm.xlu1 %1749, %v1679_v10  }
  0xf0   : > { %1112 = vperm.xlu0 %1748, %v2019_v49  }
  0xf2   : > { %v2173_v12 = vpop.permute.xlu1 %648 }
  0xf3   : > { %v2175_v7 = vpop.permute.xlu0 %643  ;;  %1183 = vperm.xlu1 %1749, %v1888_v19   ;;  %v2194_v19 = vld [vmem:[%s2694_s1] ss:$0 sm:$0xff] }
  0xf4   : > { %1178 = vperm.xlu0 %1748, %v1891_v20   ;;  %v309_v10 = vmul.f32 %v2194_v19, %v2029_v53  ;;  %v2221_v6 = vmul.f32 %v2194_v19, %v2039_v56 }
  0xf6   : > { %v2179_v13 = vpop.permute.xlu1 %658 }
  0xf7   : > { %v2181_v14 = vpop.permute.xlu0 %653  ;;  %1193 = vperm.xlu1 %1749, %v1896_v21   ;;  %v2205_v21 = vld [vmem:[%s2694_s1 + $0x1] ss:$0 sm:$0xff] }
  0xf8   : > { %1188 = vperm.xlu0 %1748, %v1899_v22   ;;  %v310_v22 = vmul.f32 %v2194_v19, %v2021_v50  ;;  %v445_v53 = vmul.f32 %v2205_v21, %v2072_v17  ;;  %v459_v56 = vmul.f32 %v2205_v21, %v2114_v33  ;;  %v2262_v17 = vld [vmem:[%s2694_s1 + $0x2] ss:$0 sm:$0xff] }
  0xfa   : > { %v2185_v15 = vpop.permute.xlu1 %668 }
  0xfb   : > { %v2187_v16 = vpop.permute.xlu0 %663  ;;  %1203 = vperm.xlu1 %1749, %v1904_v23   ;;  %v308_v23 = vmul.f32 %v2194_v19, %v2023_v51  ;;  %v2229_v51 = vmul.f32 %v2194_v19, %v2041_v57  ;;  %v458_v57 = vmul.f32 %v2205_v21, %v2116_v42  ;;  %v322_v42 = vmul.f32 %v2194_v19, %v2065_v2 }
  0xfc   : > { %1198 = vperm.xlu0 %1748, %v1907_v24   ;;  %v311_v24 = vmul.f32 %v2194_v19, %v2027_v52  ;;  %v2233_v52 = vmul.f32 %v2194_v19, %v2045_v58  ;;  %v2251_v58 = vmul.f32 %v2194_v19, %v2051_v60  ;;  %v449_v60 = vmul.f32 %v2205_v21, %v2084_v32  ;;  %v2285_v32 = vld [vmem:[%s2694_s1 + $0x3] ss:$0 sm:$0xff] }
  0xfd   : > { %v461_v2 = vadd.f32 %v445_v53, %v309_v10  ;;  %v580_v10 = vmul.f32 %v2262_v17, %v2125_v41  ;;  %v451_v41 = vmul.f32 %v2205_v21, %v2090_v29  ;;  %v450_v29 = vmul.f32 %v2205_v21, %v2092_v4 }
  0xfe   : > { %v2196_v20 = vpop.permute.xlu1 %678 }
  0xff   : > { %v2198_v49 = vpop.permute.xlu0 %673  ;;  %1213 = vperm.xlu1 %1749, %v1912_v25   ;;  %v313_v25 = vmul.f32 %v2194_v19, %v2033_v54  ;;  %v2241_v54 = vmul.f32 %v2194_v19, %v2047_v59  ;;  %v446_v59 = vmul.f32 %v2205_v21, %v2080_v63  ;;  %v2276_v63 = vmul.f32 %v2194_v19, %v2053_v61 }
 0x100   : > { %1208 = vperm.xlu0 %1748, %v1915_v26   ;;  %v312_v26 = vmul.f32 %v2194_v19, %v2035_v55  ;;  %v444_v55 = vmul.f32 %v2205_v21, %v2074_v18  ;;  %v595_v18 = vmul.f32 %v2262_v17, %v572_v8  ;;  %v2749_v8 = vld [vmem:[#allocation2_spill] sm:$0xff]  ;;  %v581_v61 = vmul.f32 %v2262_v17, %v2123_v44 }
 0x101   : > { %2747 = vst [vmem:[#allocation33_spill] sm:$0xff] %v2276_v63  ;;  %v462_v63 = vadd.f32 %v446_v59, %v310_v22  ;;  %v465_v53 = vadd.f32 %v449_v60, %v313_v25  ;;  %v717_v44 = vmul.f32 %v2285_v32, %v2170_v11  ;;  %v2312_v11 = vld [vmem:[%s2694_s1 + $0x4] ss:$0 sm:$0xff] }
 0x102   : > { %v2223_v50 = vpop.permute.xlu1 %688  ;;  %v597_v25 = vadd.f32 %v581_v61, %v461_v2 }
 0x103   : > { %2743 = vst [vmem:[#allocation29_spill] sm:$0xff] %v2223_v50  ;;  %v2225_v5 = vpop.permute.xlu0 %683  ;;  %1223 = vperm.xlu1 %1749, %v1920_v27   ;;  %v323_v27 = vmul.f32 %v2194_v19, %v2063_v0  ;;  %v594_v0 = vmul.f32 %v2262_v17, %v567_v9  ;;  %v2750_v9 = vld [vmem:[#allocation3_spill] sm:$0xff]  ;;  %v474_v50 = vadd.f32 %v458_v57, %v322_v42  ;;  %v2752_v57 = vld [vmem:[#allocation5_spill] sm:$0xff] }
 0x104   : > { %2744 = vst [vmem:[#allocation30_spill] sm:$0xff] %v2225_v5  ;;  %1218 = vperm.xlu0 %1748, %v1923_v28   ;;  %v447_v28 = vmul.f32 %v2205_v21, %v2078_v34  ;;  %v2280_v5 = vmul.f32 %v2194_v19, %v2057_v62  ;;  %v448_v62 = vmul.f32 %v2205_v21, %v2086_v30  ;;  %v2751_v30 = vld [vmem:[#allocation4_spill] sm:$0xff] }
 0x106   : > { %v2270_v33 = vpop.permute.xlu1 %698  ;;  %2748 = vst [vmem:[#allocation34_spill] sm:$0xff] %v2280_v5  ;;  %v463_v3 = vadd.f32 %v447_v28, %v311_v24  ;;  %v464_v28 = vadd.f32 %v448_v62, %v312_v26  ;;  %v584_v62 = vmul.f32 %v2262_v17, %v2137_v45 }
 0x107   : > { %2745 = vst [vmem:[#allocation31_spill] sm:$0xff] %v2270_v33  ;;  %v2272_v34 = vpop.permute.xlu0 %693  ;;  %1233 = vperm.xlu1 %1749, %v2749_v8   ;;  %v460_v33 = vadd.f32 %v444_v55, %v308_v23  ;;  %v610_v8 = vadd.f32 %v594_v0, %v474_v50  ;;  %v718_v23 = vmul.f32 %v2285_v32, %v2168_v40 }
 0x108   : > { %2746 = vst [vmem:[#allocation32_spill] sm:$0xff] %v2272_v34  ;;  %1228 = vperm.xlu0 %1748, %v2750_v9   ;;  %v475_v34 = vadd.f32 %v459_v56, %v323_v27  ;;  %v583_v40 = vmul.f32 %v2262_v17, %v2129_v46  ;;  %v582_v50 = vmul.f32 %v2262_v17, %v2131_v43  ;;  %v1697_v27 = vld [vmem:[%s1819_s19 + $0x111] sm:$0xff] }
 0x109   : > { %v596_v59 = vadd.f32 %v580_v10, %v460_v33  ;;  %v720_v46 = vmul.f32 %v2285_v32, %v2173_v12  ;;  %v719_v43 = vmul.f32 %v2285_v32, %v2175_v7  ;;  %v2753_v33 = vld [vmem:[#allocation20_spill] sm:$0xff]  ;;  %v467_v9 = vadd.f32 %v451_v41, %v2221_v6 }
 0x10a   : > { %v611_v5 = vadd.f32 %v595_v18, %v475_v34  ;;  %v709_v55 = vpop.permute.xlu1 %708  ;;  %v734_v18 = vadd.f32 %v718_v23, %v597_v25  ;;  %v599_v4 = vadd.f32 %v583_v40, %v463_v3  ;;  %v598_v61 = vadd.f32 %v582_v50, %v462_v63 }
 0x10b   : > { %v704_v56 = vpop.permute.xlu0 %703  ;;  %v732_v22 = vmul.f32 %v2285_v32, %v709_v55  ;;  %1243 = vperm.xlu1 %1749, %v2751_v30   ;;  %v733_v2 = vadd.f32 %v717_v44, %v596_v59  ;;  %v585_v12 = vmul.f32 %v2262_v17, %v2135_v48  ;;  %v453_v7 = vmul.f32 %v2205_v21, %v2096_v31  ;;  %v2754_v44 = vld [vmem:[#allocation6_spill] sm:$0xff]  ;;  %v2756_v59 = vld [vmem:[#allocation7_spill] sm:$0xff] }
 0x10c   : > { %v731_v24 = vmul.f32 %v2285_v32, %v704_v56  ;;  %1238 = vperm.xlu0 %1748, %v2752_v57   ;;  %v466_v23 = vadd.f32 %v450_v29, %v2229_v51  ;;  %v736_v55 = vadd.f32 %v720_v46, %v599_v4  ;;  %v735_v56 = vadd.f32 %v719_v43, %v598_v61  ;;  %v2757_v29 = vld [vmem:[#allocation8_spill] sm:$0xff]  ;;  %v2758_v4 = vld [vmem:[#allocation9_spill] sm:$0xff]  ;;  %v2759_v61 = vld [vmem:[#allocation10_spill] sm:$0xff] }
 0x10d   : > { %v2315_v42 = vadd.f32 %v732_v22, %v611_v5  ;;  %v722_v3 = vmul.f32 %v2285_v32, %v2179_v13  ;;  %v721_v48 = vmul.f32 %v2285_v32, %v2181_v14  ;;  %v2755_v22 = vld [vmem:[#allocation21_spill] sm:$0xff]  ;;  %v587_v13 = vmul.f32 %v2262_v17, %v2141_v37 }
 0x10e   : > { %v2317_v60 = vadd.f32 %v731_v24, %v610_v8  ;;  %v775_v0 = vpop.permute.xlu1 %774  ;;  %v452_v51 = vmul.f32 %v2205_v21, %v2755_v22  ;;  %v601_v24 = vadd.f32 %v585_v12, %v465_v53  ;;  %v586_v30 = vmul.f32 %v2262_v17, %v2143_v39  ;;  %v2760_v12 = vld [vmem:[#allocation33_spill] sm:$0xff] }
 0x10f   : > { %v770_v34 = vpop.permute.xlu0 %769  ;;  %v854_v26 = vmul.f32 %v2312_v11, %v775_v0  ;;  %1253 = vperm.xlu1 %1749, %v1697_v27   ;;  %v469_v14 = vadd.f32 %v453_v7, %v2233_v52  ;;  %v600_v57 = vadd.f32 %v584_v62, %v464_v28  ;;  %v724_v53 = vmul.f32 %v2285_v32, %v2185_v15  ;;  %v2761_v62 = vld [vmem:[#allocation25_spill] sm:$0xff] }
 0x110   : > { %v853_v5 = vmul.f32 %v2312_v11, %v770_v34  ;;  %1248 = vperm.xlu0 %1748, %v2753_v33   ;;  %v738_v40 = vadd.f32 %v722_v3, %v601_v24  ;;  %v723_v37 = vmul.f32 %v2285_v32, %v2187_v16  ;;  %v602_v46 = vadd.f32 %v586_v30, %v466_v23 }
 0x111   : > { %v2335_v10 = vadd.f32 %v854_v26, %v734_v18  ;;  %v737_v39 = vadd.f32 %v721_v48, %v600_v57  ;;  %v603_v18 = vadd.f32 %v587_v13, %v467_v9  ;;  %v589_v15 = vmul.f32 %v2262_v17, %v2147_v47  ;;  %v2764_v48 = vld [vmem:[#allocation23_spill] sm:$0xff] }
 0x112   : > { %v2337_v8 = vadd.f32 %v853_v5, %v733_v2  ;;  %v785_v6 = vpop.permute.xlu1 %784  ;;  %v468_v16 = vadd.f32 %v452_v51, %v2241_v54  ;;  %v588_v43 = vmul.f32 %v2262_v17, %v2149_v1  ;;  %v739_v5 = vadd.f32 %v723_v37, %v602_v46  ;;  %v2766_v51 = vld [vmem:[#allocation30_spill] sm:$0xff]  ;;  %v2769_v37 = vld [vmem:[#allocation19_spill] sm:$0xff] }
 0x113   : > { %v780_v63 = vpop.permute.xlu0 %779  ;;  %v856_v31 = vmul.f32 %v2312_v11, %v785_v6  ;;  %1319 = vperm.xlu1 %1749, %v1949_v35   ;;  %v455_v35 = vmul.f32 %v2205_v21, %v2102_v38  ;;  %v454_v38 = vmul.f32 %v2205_v21, %v2104_v36  ;;  %v740_v26 = vadd.f32 %v724_v53, %v603_v18  ;;  %v2768_v53 = vld [vmem:[#allocation12_spill] sm:$0xff] }
 0x114   : > { %v855_v45 = vmul.f32 %v2312_v11, %v780_v63  ;;  %1314 = vperm.xlu0 %1748, %v2754_v44   ;;  %v726_v36 = vmul.f32 %v2285_v32, %v2196_v20  ;;  %v725_v47 = vmul.f32 %v2285_v32, %v2198_v49  ;;  %v605_v7 = vadd.f32 %v589_v15, %v469_v14  ;;  %v2762_v20 = vld [vmem:[#allocation26_spill] sm:$0xff]  ;;  %v2765_v44 = vld [vmem:[#allocation29_spill] sm:$0xff] }
 0x115   : > { %v2355_v41 = vadd.f32 %v856_v31, %v736_v55  ;;  %v471_v2 = vadd.f32 %v455_v35, %v2251_v58  ;;  %v470_v58 = vadd.f32 %v454_v38, %v2760_v12  ;;  %v591_v23 = vmul.f32 %v2262_v17, %v2761_v62 }
 0x116   : > { %v2357_v25 = vadd.f32 %v855_v45, %v735_v56  ;;  %v795_v50 = vpop.permute.xlu1 %794  ;;  %v590_v55 = vmul.f32 %v2262_v17, %v2762_v20  ;;  %v2763_v56 = vld [vmem:[#allocation22_spill] sm:$0xff]  ;;  %v604_v3 = vadd.f32 %v588_v43, %v468_v16  ;;  %v456_v31 = vmul.f32 %v2205_v21, %v2764_v48 }
 0x117   : > { %v790_v27 = vpop.permute.xlu0 %789  ;;  %v858_v52 = vmul.f32 %v2312_v11, %v795_v50  ;;  %1329 = vperm.xlu1 %1749, %v2756_v59   ;;  %v457_v49 = vmul.f32 %v2205_v21, %v2763_v56  ;;  %v742_v45 = vadd.f32 %v726_v36, %v605_v7  ;;  %v728_v22 = vmul.f32 %v2285_v32, %v2765_v44  ;;  %v2774_v36 = vld [vmem:[#allocation32_spill] sm:$0xff] }
 0x118   : > { %v857_v28 = vmul.f32 %v2312_v11, %v790_v27  ;;  %1324 = vperm.xlu0 %1748, %v2757_v29   ;;  %v727_v24 = vmul.f32 %v2285_v32, %v2766_v51  ;;  %v741_v14 = vadd.f32 %v725_v47, %v604_v3  ;;  %v320_v21 = vmul.f32 %v2194_v19, %v2769_v37  ;;  %v2772_v29 = vld [vmem:[#allocation28_spill] sm:$0xff]  ;;  %v2780_v51 = vld [vmem:[#allocation18_spill] sm:$0xff] }
 0x119   : > { %v2376_v0 = vadd.f32 %v858_v52, %v738_v40  ;;  %v2767_v40 = vld [vmem:[#allocation11_spill] sm:$0xff]  ;;  %v607_v50 = vadd.f32 %v591_v23, %v471_v2  ;;  %v606_v27 = vadd.f32 %v590_v55, %v470_v58  ;;  %v592_v38 = vmul.f32 %v2262_v17, %v2772_v29  ;;  %v2778_v56 = vld [vmem:[#allocation16_spill] sm:$0xff] }
 0x11a   : > { %v2378_v34 = vadd.f32 %v857_v28, %v737_v39  ;;  %v805_v33 = vpop.permute.xlu1 %804  ;;  %v2770_v39 = vld [vmem:[#allocation27_spill] sm:$0xff]  ;;  %v2771_v28 = vld [vmem:[#allocation34_spill] sm:$0xff]  ;;  %v472_v15 = vadd.f32 %v456_v31, %v320_v21  ;;  %v2781_v37 = vld [vmem:[#allocation24_spill] sm:$0xff] }
 0x11b   : > { %v800_v9 = vpop.permute.xlu0 %799  ;;  %v860_v54 = vmul.f32 %v2312_v11, %v805_v33  ;;  %1339 = vperm.xlu1 %1749, %v2758_v4   ;;  %v593_v52 = vmul.f32 %v2262_v17, %v2770_v39  ;;  %v473_v59 = vadd.f32 %v457_v49, %v2771_v28  ;;  %v744_v16 = vadd.f32 %v728_v22, %v607_v50  ;;  %v2775_v17 = vld [vmem:[#allocation13_spill] sm:$0xff]  ;;  %v2777_v55 = vld [vmem:[#allocation15_spill] sm:$0xff] }
 0x11c   : > { %v859_v1 = vmul.f32 %v2312_v11, %v800_v9  ;;  %1334 = vperm.xlu0 %1748, %v2759_v61   ;;  %v743_v43 = vadd.f32 %v727_v24, %v606_v27  ;;  %v729_v33 = vmul.f32 %v2285_v32, %v2774_v36  ;;  %v608_v4 = vadd.f32 %v592_v38, %v472_v15  ;;  %v2779_v22 = vld [vmem:[#allocation17_spill] sm:$0xff]  ;;  %v1663_v24 = vld [vmem:[%s2694_s1 + $0x5] ss:$0 sm:$0xff] }
 0x11d   : > { %v2396_v6 = vadd.f32 %v860_v54, %v740_v26  ;;  %v2773_v26 = vld [vmem:[#allocation31_spill] sm:$0xff]  ;;  %v2776_v54 = vld [vmem:[#allocation14_spill] sm:$0xff] }
 0x11e   : > { %v2398_v63 = vadd.f32 %v859_v1, %v739_v5  ;;  %v815_v13 = vpop.permute.xlu1 %814  ;;  %v730_v19 = vmul.f32 %v2285_v32, %v2773_v26  ;;  %v609_v1 = vadd.f32 %v593_v52, %v473_v59  ;;  %v745_v23 = vadd.f32 %v729_v33, %v608_v4 }
 0x11f   : > { %v810_v30 = vpop.permute.xlu0 %809  ;;  %v862_v57 = vmul.f32 %v2312_v11, %v815_v13  ;;  %1349 = vperm.xlu1 %1749, %v2767_v40   ;;  %v1715_v13 = vld [vmem:[%s1819_s19 + $0x112] sm:$0xff]  ;;  %s2607_s19 = scalar_lea.vmem %s2696_s3, %s1721_s17 }
 0x120   : > { %v861_v35 = vmul.f32 %v2312_v11, %v810_v30  ;;  %1344 = vperm.xlu0 %1748, %v2768_v53   ;;  %v746_v58 = vadd.f32 %v730_v19, %v609_v1 }
 0x121   : > { %v2417_v18 = vadd.f32 %v862_v57, %v742_v45 }
 0x122   : > { %v2419_v46 = vadd.f32 %v861_v35, %v741_v14  ;;  %v825_v2 = vpop.permute.xlu1 %824 }
 0x123   : > { %v820_v5 = vpop.permute.xlu0 %819  ;;  %v864_v9 = vmul.f32 %v2312_v11, %v825_v2  ;;  %1359 = vperm.xlu1 %1749, %v2775_v17  }
 0x124   : > { %v863_v47 = vmul.f32 %v2312_v11, %v820_v5  ;;  %1354 = vperm.xlu0 %1748, %v2776_v54  }
 0x125   : > { %v880_v61 = vadd.f32 %v864_v9, %v744_v16 }
 0x126   : > { %v879_v12 = vadd.f32 %v863_v47, %v743_v43  ;;  %v835_v7 = vpop.permute.xlu1 %834 }
 0x127   : > { %v830_v62 = vpop.permute.xlu0 %829  ;;  %v866_v20 = vmul.f32 %v2312_v11, %v835_v7  ;;  %1369 = vperm.xlu1 %1749, %v2777_v55  }
 0x128   : > { %v865_v32 = vmul.f32 %v2312_v11, %v830_v62  ;;  %1364 = vperm.xlu0 %1748, %v2778_v56  }
 0x129   : > { %v882_v49 = vadd.f32 %v866_v20, %v746_v58 }
 0x12a   : > { %v881_v3 = vadd.f32 %v865_v32, %v745_v23  ;;  %v845_v48 = vpop.permute.xlu1 %844 }
 0x12b   : > { %v840_v31 = vpop.permute.xlu0 %839  ;;  %v868_v45 = vmul.f32 %v2312_v11, %v845_v48  ;;  %1379 = vperm.xlu1 %1749, %v2779_v22  }
 0x12c   : > { %v867_v44 = vmul.f32 %v2312_v11, %v840_v31  ;;  %1374 = vperm.xlu0 %1748, %v2780_v51  }
 0x12d   : > { %v884_v30 = vadd.f32 %v868_v45, %v2315_v42 }
 0x12e   : > { %v883_v14 = vadd.f32 %v867_v44, %v2317_v60  ;;  %v911_v57 = vpop.permute.xlu1 %910 }
 0x12f   : > { %v906_v35 = vpop.permute.xlu0 %905  ;;  %v990_v40 = vmul.f32 %v1663_v24, %v911_v57  ;;  %1389 = vperm.xlu1 %1749, %v1715_v13  }
 0x130   : > { %v989_v53 = vmul.f32 %v1663_v24, %v906_v35  ;;  %1384 = vperm.xlu0 %1748, %v2781_v37  }
 0x131   : > { %v2445_v11 = vadd.f32 %v990_v40, %v2335_v10 }
 0x132   : > { %v2448_v21 = vadd.f32 %v989_v53, %v2337_v8  ;;  %v921_v50 = vpop.permute.xlu1 %920 }
 0x133   : > { %v916_v27 = vpop.permute.xlu0 %915  ;;  %v992_v39 = vmul.f32 %v1663_v24, %v921_v50 }
 0x134   : > { %v991_v52 = vmul.f32 %v1663_v24, %v916_v27 }
 0x135   : > { %v2451_v42 = vadd.f32 %v992_v39, %v2355_v41 }
 0x136   : > { %v2454_v60 = vadd.f32 %v991_v52, %v2357_v25  ;;  %v931_v28 = vpop.permute.xlu1 %930 }
 0x137   : > { %v926_v59 = vpop.permute.xlu0 %925  ;;  %v994_v29 = vmul.f32 %v1663_v24, %v931_v28 }
 0x138   : > { %v993_v38 = vmul.f32 %v1663_v24, %v926_v59 }
 0x139   : > { %v2457_v10 = vadd.f32 %v994_v29, %v2376_v0 }
 0x13a   : > { %v2460_v8 = vadd.f32 %v993_v38, %v2378_v34  ;;  %v941_v15 = vpop.permute.xlu1 %940 }
 0x13b   : > { %v936_v16 = vpop.permute.xlu0 %935  ;;  %v996_v43 = vmul.f32 %v1663_v24, %v941_v15  ;;  %v2507_v15 = vld [vmem:[%s2694_s1 + $0x6] ss:$0 sm:$0xff] }
 0x13c   : > { %v995_v26 = vmul.f32 %v1663_v24, %v936_v16 }
 0x13d   : > { %v2463_v41 = vadd.f32 %v996_v43, %v2396_v6 }
 0x13e   : > { %v2466_v25 = vadd.f32 %v995_v26, %v2398_v63  ;;  %v951_v19 = vpop.permute.xlu1 %950 }
 0x13f   : > { %v946_v2 = vpop.permute.xlu0 %945  ;;  %v998_v5 = vmul.f32 %v1663_v24, %v951_v19 }
 0x140   : > { %v997_v36 = vmul.f32 %v1663_v24, %v946_v2 }
 0x141   : > { %v2469_v0 = vadd.f32 %v998_v5, %v2417_v18 }
 0x142   : > { %v2472_v34 = vadd.f32 %v997_v36, %v2419_v46  ;;  %v961_v33 = vpop.permute.xlu1 %960  ;;  %v2520_v36 = vld [vmem:[%s2694_s1 + $0x7] ss:$0 sm:$0xff] }
 0x143   : > { %v956_v9 = vpop.permute.xlu0 %955  ;;  %v1000_v47 = vmul.f32 %v1663_v24, %v961_v33 }
 0x144   : > { %v999_v17 = vmul.f32 %v1663_v24, %v956_v9 }
 0x145   : > { %v2474_v54 = vadd.f32 %v1000_v47, %v880_v61 }
 0x146   : > { %v2476_v6 = vadd.f32 %v999_v17, %v879_v12  ;;  %v971_v63 = vpop.permute.xlu1 %970 }
 0x147   : > { %v966_v1 = vpop.permute.xlu0 %965  ;;  %v1002_v4 = vmul.f32 %v1663_v24, %v971_v63 }
 0x148   : > { %v1001_v58 = vmul.f32 %v1663_v24, %v966_v1 }
 0x149   : > { %v2478_v7 = vadd.f32 %v1002_v4, %v882_v49 }
 0x14a   : > { %v2480_v62 = vadd.f32 %v1001_v58, %v881_v3  ;;  %v981_v18 = vpop.permute.xlu1 %980 }
 0x14b   : > { %v976_v23 = vpop.permute.xlu0 %975  ;;  %v1004_v46 = vmul.f32 %v1663_v24, %v981_v18 }
 0x14c   : > { %v1003_v20 = vmul.f32 %v1663_v24, %v976_v23 }
 0x14d   : > { %v2482_v32 = vadd.f32 %v1004_v46, %v884_v30 }
 0x14e   : > { %v2484_v55 = vadd.f32 %v1003_v20, %v883_v14  ;;  %v1048_v61 = vpop.permute.xlu1 %1047 }
 0x14f   : > { %v1043_v56 = vpop.permute.xlu0 %1042  ;;  %v1127_v26 = vmul.f32 %v2507_v15, %v1048_v61 }
 0x150   : > { %v1126_v19 = vmul.f32 %v2507_v15, %v1043_v56  ;;  %v2540_v56 = vld [vmem:[%s2694_s1 + $0x8] ss:$0 sm:$0xff] }
 0x151   : > { %v1143_v1 = vadd.f32 %v1127_v26, %v2445_v11 }
 0x152   : > { %v1058_v12 = vpop.permute.xlu1 %1057  ;;  %v1142_v4 = vadd.f32 %v1126_v19, %v2448_v21 }
 0x153   : > { %v1053_v48 = vpop.permute.xlu0 %1052  ;;  %v1129_v2 = vmul.f32 %v2507_v15, %v1058_v12 }
 0x154   : > { %v1128_v5 = vmul.f32 %v2507_v15, %v1053_v48 }
 0x155   : > { %v1145_v23 = vadd.f32 %v1129_v2, %v2451_v42 }
 0x156   : > { %v1068_v31 = vpop.permute.xlu1 %1067  ;;  %v1144_v46 = vadd.f32 %v1128_v5, %v2454_v60 }
 0x157   : > { %v1063_v45 = vpop.permute.xlu0 %1062  ;;  %v1131_v33 = vmul.f32 %v2507_v15, %v1068_v31 }
 0x158   : > { %v1130_v9 = vmul.f32 %v2507_v15, %v1063_v45 }
 0x159   : > { %v1147_v11 = vadd.f32 %v1131_v33, %v2457_v10 }
 0x15a   : > { %v1078_v44 = vpop.permute.xlu1 %1077  ;;  %v1146_v21 = vadd.f32 %v1130_v9, %v2460_v8 }
 0x15b   : > { %v1073_v22 = vpop.permute.xlu0 %1072  ;;  %v1133_v47 = vmul.f32 %v2507_v15, %v1078_v44 }
 0x15c   : > { %v1132_v20 = vmul.f32 %v2507_v15, %v1073_v22 }
 0x15d   : > { %v1149_v60 = vadd.f32 %v1133_v47, %v2463_v41 }
 0x15e   : > { %v1088_v49 = vpop.permute.xlu1 %1087 }
 0x15f   : > { %v1083_v51 = vpop.permute.xlu0 %1082  ;;  %v1135_v61 = vmul.f32 %v2507_v15, %v1088_v49 }
 0x160   : > { %v1134_v12 = vmul.f32 %v2507_v15, %v1083_v51  ;;  %v1148_v51 = vadd.f32 %v1132_v20, %v2466_v25 }
 0x162   : > { %v1098_v3 = vpop.permute.xlu1 %1097 }
 0x163   : > { %v1093_v13 = vpop.permute.xlu0 %1092  ;;  %v1137_v42 = vmul.f32 %v2507_v15, %v1098_v3  ;;  %v1151_v3 = vadd.f32 %v1135_v61, %v2469_v0 }
 0x164   : > { %v1136_v48 = vmul.f32 %v2507_v15, %v1093_v13 }
 0x166   : > { %v1108_v57 = vpop.permute.xlu1 %1107  ;;  %v2568_v0 = vadd.f32 %v1136_v48, %v2476_v6 }
 0x167   : > { %v1103_v35 = vpop.permute.xlu0 %1102  ;;  %v1139_v41 = vmul.f32 %v2507_v15, %v1108_v57 }
 0x168   : > { %v1138_v13 = vmul.f32 %v2507_v15, %v1103_v35 }
 0x169   : > { %v2576_v47 = vadd.f32 %v1139_v41, %v2478_v7 }
 0x16a   : > { %v2486_v40 = vpop.permute.xlu1 %1117  ;;  %v2579_v6 = vadd.f32 %v1138_v13, %v2480_v62 }
 0x16b   : > { %v2488_v24 = vpop.permute.xlu0 %1112 }
 0x16c   : > { %v2591_v7 = vmul.f32 %v2507_v15, %v2488_v24 }
 0x16e   : > { %v1184_v30 = vpop.permute.xlu1 %1183 }
 0x16f   : > { %v1179_v14 = vpop.permute.xlu0 %1178  ;;  %v1263_v58 = vmul.f32 %v2520_v36, %v1184_v30 }
 0x170   : > { %v1262_v18 = vmul.f32 %v2520_v36, %v1179_v14  ;;  %v2559_v14 = vld [vmem:[%s2695_s2] ss:$0 sm:$0xff] }
 0x171   : > { %v1279_v49 = vadd.f32 %v1263_v58, %v1143_v1 }
 0x172   : > { %v1194_v53 = vpop.permute.xlu1 %1193  ;;  %v1278_v30 = vadd.f32 %v1262_v18, %v1142_v4 }
 0x173   : > { %v1189_v37 = vpop.permute.xlu0 %1188  ;;  %v1265_v31 = vmul.f32 %v2520_v36, %v1194_v53  ;;  %v2562_v53 = vadd.f32 %v1134_v12, %v2472_v34 }
 0x174   : > { %v1264_v45 = vmul.f32 %v2520_v36, %v1189_v37  ;;  %v2565_v37 = vadd.f32 %v1137_v42, %v2474_v54 }
 0x175   : > { %v1281_v57 = vadd.f32 %v1265_v31, %v1145_v23 }
 0x176   : > { %v1204_v50 = vpop.permute.xlu1 %1203  ;;  %v1280_v19 = vadd.f32 %v1264_v45, %v1144_v46  ;;  %v2587_v46 = vmul.f32 %v2507_v15, %v2486_v40 }
 0x177   : > { %v2490_v27 = vpop.permute.xlu0 %1198  ;;  %v1267_v35 = vmul.f32 %v2520_v36, %v1204_v50 }
 0x178   : > { %v1266_v50 = vmul.f32 %v2520_v36, %v2490_v27 }
 0x179   : > { %v1283_v62 = vadd.f32 %v1267_v35, %v1147_v11 }
 0x17a   : > { %v2492_v39 = vpop.permute.xlu1 %1213  ;;  %v1282_v48 = vadd.f32 %v1266_v50, %v1146_v21 }
 0x17b   : > { %v2494_v52 = vpop.permute.xlu0 %1208  ;;  %v1269_v1 = vmul.f32 %v2520_v36, %v2492_v39 }
 0x17c   : > { %v1268_v20 = vmul.f32 %v2520_v36, %v2494_v52 }
 0x17d   : > { %v1285_v11 = vadd.f32 %v1269_v1, %v1149_v60 }
 0x17e   : > { %v2496_v28 = vpop.permute.xlu1 %1223 }
 0x17f   : > { %v2498_v59 = vpop.permute.xlu0 %1218  ;;  %v1271_v52 = vmul.f32 %v2520_v36, %v2496_v28 }
 0x182   : > { %v2500_v29 = vpop.permute.xlu1 %1233 }
 0x183   : > { %v2502_v38 = vpop.permute.xlu0 %1228  ;;  %v1273_v35 = vmul.f32 %v2520_v36, %v2500_v29 }
 0x186   : > { %v2509_v16 = vpop.permute.xlu1 %1243 }
 0x187   : > { %v2511_v43 = vpop.permute.xlu0 %1238 }
 0x18a   : > { %v2525_v17 = vpop.permute.xlu1 %1253 }
 0x18b   : > { %v2527_v63 = vpop.permute.xlu0 %1248 }
 0x18e   : > { %v1320_v44 = vpop.permute.xlu1 %1319 }
 0x18f   : > { %v1315_v22 = vpop.permute.xlu0 %1314  ;;  %v1399_v10 = vmul.f32 %v2540_v56, %v1320_v44 }
 0x190   : > { %v1398_v8 = vmul.f32 %v2540_v56, %v1315_v22  ;;  %v1284_v22 = vadd.f32 %v1268_v20, %v1148_v51 }
 0x191   : > { %v1415_v26 = vadd.f32 %v1399_v10, %v1279_v49 }
 0x192   : > { %v1414_v25 = vadd.f32 %v1398_v8, %v1278_v30  ;;  %v1330_v2 = vpop.permute.xlu1 %1329 }
 0x193   : > { %v1325_v5 = vpop.permute.xlu0 %1324  ;;  %v1438_v33 = vadd.f32 %v2559_v14, %v1415_v26  ;;  %v1401_v54 = vmul.f32 %v2540_v56, %v1330_v2  ;;  %v1270_v26 = vmul.f32 %v2520_v36, %v2498_v59 }
 0x194   : > { %v1437_v34 = vadd.f32 %v2559_v14, %v1414_v25  ;;  %v1400_v9 = vmul.f32 %v2540_v56, %v1325_v5 }
 0x195   : > { %v1454_v4 = vmax.f32 %v1438_v33, 0.0  ;;  %v1417_v18 = vadd.f32 %v1401_v54, %v1281_v57  ;;  %v1272_v33 = vmul.f32 %v2520_v36, %v2502_v38  ;;  %v1286_v29 = vadd.f32 %v1270_v26, %v2562_v53 }
 0x196   : > { %v1453_v58 = vmax.f32 %v1437_v34, 0.0  ;;  %v1416_v23 = vadd.f32 %v1400_v9, %v1280_v19  ;;  %v1340_v27 = vpop.permute.xlu1 %1339  ;;  %v1287_v19 = vadd.f32 %v1271_v52, %v1151_v3  ;;  %v1274_v53 = vmul.f32 %v2520_v36, %v2511_v43 }
 0x197   : > { %v1335_v61 = vpop.permute.xlu0 %1334  ;;  %v1471_v39 = vsel %vm1469_vm0, %v1454_v4, -inf  ;;  %v1440_v42 = vadd.f32 %v2559_v14, %v1417_v18  ;;  %v1403_v24 = vmul.f32 %v2540_v56, %v1340_v27  ;;  %v1275_v18 = vmul.f32 %v2520_v36, %v2509_v16 }
 0x198   : > { %v1470_v12 = vsel %vm1469_vm0, %v1453_v58, -inf  ;;  %v1439_v40 = vadd.f32 %v2559_v14, %v1416_v23  ;;  %v1402_v15 = vmul.f32 %v2540_v56, %v1335_v61  ;;  %v1157_v43 = vadd.f32 %v2587_v46, %v2482_v32 }
 0x199   : > { %v1472_v31 = vmax.f32 %v1470_v12, %v1471_v39  ;;  %v1456_v45 = vmax.f32 %v1440_v42, 0.0  ;;  %v1419_v21 = vadd.f32 %v1403_v24, %v1283_v62  ;;  %v1289_v39 = vadd.f32 %v1273_v35, %v2565_v37 }
 0x19a   : > { %v1455_v44 = vmax.f32 %v1439_v40, 0.0  ;;  %v1418_v30 = vadd.f32 %v1402_v15, %v1282_v48  ;;  %v1350_v10 = vpop.permute.xlu1 %1349  ;;  %v1288_v12 = vadd.f32 %v1272_v33, %v2568_v0 }
 0x19b   : > { %v1494_v49 = vpack.c.bf16 %v1472_v31, %v1472_v31  ;;  %v1345_v8 = vpop.permute.xlu0 %1344  ;;  %v1474_v41 = vsel %vm1469_vm0, %v1456_v45, -inf  ;;  %v1405_v28 = vmul.f32 %v2540_v56, %v1350_v10  ;;  %v1442_v51 = vadd.f32 %v2559_v14, %v1419_v21 }
 0x19c   : > { %v1473_v60 = vsel %vm1469_vm0, %v1455_v44, -inf  ;;  %v1404_v13 = vmul.f32 %v2540_v56, %v1345_v8  ;;  %v1441_v57 = vadd.f32 %v2559_v14, %v1418_v30  ;;  %v1291_v45 = vadd.f32 %v1275_v18, %v2576_v47 }
 0x19d   : > { %1503 = vst.msk [vmem:[%s2607_s19] sm:$0xf] %vm1502_vm1, %v1494_v49  ;;  %v1475_v25 = vmax.f32 %v1473_v60, %v1474_v41  ;;  %v1421_v2 = vadd.f32 %v1405_v28, %v1285_v11  ;;  %v1458_v54 = vmax.f32 %v1442_v51, 0.0  ;;  %v1277_v44 = vmul.f32 %v2520_v36, %v2525_v17 }
 0x19e   : > { %v1420_v5 = vadd.f32 %v1404_v13, %v1284_v22  ;;  %v1457_v59 = vmax.f32 %v1441_v57, 0.0  ;;  %v1360_v9 = vpop.permute.xlu1 %1359  ;;  %v1290_v60 = vadd.f32 %v1274_v53, %v2579_v6  ;;  %v1276_v17 = vmul.f32 %v2520_v36, %v2527_v63 }
 0x19f   : > { %v1495_v34 = vpack.c.bf16 %v1475_v25, %v1475_v25  ;;  %v1355_v50 = vpop.permute.xlu0 %1354  ;;  %v1444_v1 = vadd.f32 %v2559_v14, %v1421_v2  ;;  %v1407_v3 = vmul.f32 %v2540_v56, %v1360_v9  ;;  %v1477_v38 = vsel %vm1469_vm0, %v1458_v54, -inf }
 0x1a0   : > { %v1443_v4 = vadd.f32 %v2559_v14, %v1420_v5  ;;  %v1406_v58 = vmul.f32 %v2540_v56, %v1355_v50  ;;  %v1476_v23 = vsel %vm1469_vm0, %v1457_v59, -inf  ;;  %v1156_v57 = vadd.f32 %v2591_v7, %v2484_v55 }
 0x1a1   : > { %1504 = vst.msk [vmem:[%s2607_s19 + $0x4] sm:$0xf] %vm1502_vm1, %v1495_v34  ;;  %v1478_v62 = vmax.f32 %v1476_v23, %v1477_v38  ;;  %v1460_v20 = vmax.f32 %v1444_v1, 0.0  ;;  %v1423_v61 = vadd.f32 %v1407_v3, %v1287_v19  ;;  %v1293_v19 = vadd.f32 %v1277_v44, %v1157_v43 }
 0x1a2   : > { %v1459_v27 = vmax.f32 %v1443_v4, 0.0  ;;  %v1422_v42 = vadd.f32 %v1406_v58, %v1286_v29  ;;  %v1370_v16 = vpop.permute.xlu1 %1369  ;;  %v1292_v59 = vadd.f32 %v1276_v17, %v1156_v57 }
 0x1a3   : > { %v1365_v40 = vpop.permute.xlu0 %1364  ;;  %v1496_v48 = vpack.c.bf16 %v1478_v62, %v1478_v62  ;;  %v1480_v31 = vsel %vm1469_vm0, %v1460_v20, -inf  ;;  %v1446_v15 = vadd.f32 %v2559_v14, %v1423_v61  ;;  %v1409_v37 = vmul.f32 %v2540_v56, %v1370_v16 }
 0x1a4   : > { %v1479_v24 = vsel %vm1469_vm0, %v1459_v27, -inf  ;;  %v1445_v52 = vadd.f32 %v2559_v14, %v1422_v42  ;;  %v1408_v0 = vmul.f32 %v2540_v56, %v1365_v40 }
 0x1a5   : > { %v1481_v11 = vmax.f32 %v1479_v24, %v1480_v31  ;;  %1505 = vst.msk [vmem:[%s2607_s19 + $0x8] sm:$0xf] %vm1502_vm1, %v1496_v48  ;;  %v1462_v22 = vmax.f32 %v1446_v15, 0.0  ;;  %v1425_v30 = vadd.f32 %v1409_v37, %v1289_v39 }
 0x1a6   : > { %v1461_v21 = vmax.f32 %v1445_v52, 0.0  ;;  %v1424_v10 = vadd.f32 %v1408_v0, %v1288_v12  ;;  %v1380_v8 = vpop.permute.xlu1 %1379 }
 0x1a7   : > { %v1497_v49 = vpack.c.bf16 %v1481_v11, %v1481_v11  ;;  %v1375_v41 = vpop.permute.xlu0 %1374  ;;  %v1483_v28 = vsel %vm1469_vm0, %v1462_v22, -inf  ;;  %v1411_v32 = vmul.f32 %v2540_v56, %v1380_v8  ;;  %v1448_v13 = vadd.f32 %v2559_v14, %v1425_v30 }
 0x1a8   : > { %v1410_v47 = vmul.f32 %v2540_v56, %v1375_v41  ;;  %v1482_v46 = vsel %vm1469_vm0, %v1461_v21, -inf  ;;  %v1447_v26 = vadd.f32 %v2559_v14, %v1424_v10 }
 0x1a9   : > { %1506 = vst.msk [vmem:[%s2607_s19 + $0xc] sm:$0xf] %vm1502_vm1, %v1497_v49  ;;  %v1484_v25 = vmax.f32 %v1482_v46, %v1483_v28  ;;  %v1427_v51 = vadd.f32 %v1411_v32, %v1291_v45  ;;  %v1464_v35 = vmax.f32 %v1448_v13, 0.0 }
 0x1aa   : > { %v1426_v6 = vadd.f32 %v1410_v47, %v1290_v60  ;;  %v1463_v2 = vmax.f32 %v1447_v26, 0.0  ;;  %v1390_v5 = vpop.permute.xlu1 %1389 }
 0x1ab   : > { %v1385_v36 = vpop.permute.xlu0 %1384  ;;  %v1498_v63 = vpack.c.bf16 %v1484_v25, %v1484_v25  ;;  %v1450_v33 = vadd.f32 %v2559_v14, %v1427_v51  ;;  %v1413_v54 = vmul.f32 %v2540_v56, %v1390_v5  ;;  %v1486_v9 = vsel %vm1469_vm0, %v1464_v35, -inf }
 0x1ac   : > { %v1449_v34 = vadd.f32 %v2559_v14, %v1426_v6  ;;  %v1485_v50 = vsel %vm1469_vm0, %v1463_v2, -inf  ;;  %v1412_v55 = vmul.f32 %v2540_v56, %v1385_v36 }
 0x1ad   : > { %1507 = vst.msk [vmem:[%s2607_s19 + $0x10] sm:$0xf] %vm1502_vm1, %v1498_v63  ;;  %v1487_v7 = vmax.f32 %v1485_v50, %v1486_v9  ;;  %v1466_v1 = vmax.f32 %v1450_v33, 0.0  ;;  %v1429_v3 = vadd.f32 %v1413_v54, %v1293_v19 }
 0x1ae   : > { %v1465_v4 = vmax.f32 %v1449_v34, 0.0  ;;  %v1428_v58 = vadd.f32 %v1412_v55, %v1292_v59 }
 0x1af   : > { %v1499_v29 = vpack.c.bf16 %v1487_v7, %v1487_v7  ;;  %v1489_v18 = vsel %vm1469_vm0, %v1466_v1, -inf  ;;  %v1452_v23 = vadd.f32 %v2559_v14, %v1429_v3 }
 0x1b0   : > { %v1488_v38 = vsel %vm1469_vm0, %v1465_v4, -inf  ;;  %v1451_v20 = vadd.f32 %v2559_v14, %v1428_v58 }
 0x1b1   : > { %v1490_v62 = vmax.f32 %v1488_v38, %v1489_v18  ;;  %1508 = vst.msk [vmem:[%s2607_s19 + $0x14] sm:$0xf] %vm1502_vm1, %v1499_v29  ;;  %v1468_v56 = vmax.f32 %v1452_v23, 0.0 }
 0x1b2   : > { %v1467_v61 = vmax.f32 %v1451_v20, 0.0 }
 0x1b3   : > { %v1500_v27 = vpack.c.bf16 %v1490_v62, %v1490_v62  ;;  %v1492_v39 = vsel %vm1469_vm0, %v1468_v56, -inf }
 0x1b4   : > { %v1491_v12 = vsel %vm1469_vm0, %v1467_v61, -inf }
 0x1b5   : > { %1509 = vst.msk [vmem:[%s2607_s19 + $0x18] sm:$0xf] %vm1502_vm1, %v1500_v27  ;;  %v1493_v53 = vmax.f32 %v1491_v12, %v1492_v39 }
 0x1b7   : > { %v1501_v42 = vpack.c.bf16 %v1493_v53, %v1493_v53 }
 0x1b9   : > { %1510 = vst.msk [vmem:[%s2607_s19 + $0x1c] sm:$0xf] %vm1502_vm1, %v1501_v42 }
 0x1ba PF: > { %s13_s14 = sadd.s32 1, %s1772_s14   ;;  %s2782_s12 = smov %s1768_s13 }
 0x1bb   : > { %p10_p5 = scmp.ge.s32.totalorder %s13_s14, 4   ;;  %s2783_s13 = smov %s2785_s15 }
 0x1bd   :  { %12 = sbr.rel (!%p10_p5) target bundleno = 2 (0x2), region = 72 }

// kernel: crnn_transcriber_forward.8
= control target key start
LH: loop header
LB: loop body
LE: loop exit
PB: predicated region body
PF: predicated region fallthrough
CT: control target
= control target key end

     0   :  { %s2434_s12 = smov 0   ;;  %s2436_s13 = smov 0   ;;  %s2969_s0 = inlined_call_operand.vmem [shape: bf16[2,1,10,10,32], index: 0, kind: input, shape index: {}]   ;;  %s2970_s1 = inlined_call_operand.vmem [shape: bf16[9,32,64], index: 1, kind: input, shape index: {}]   ;;  %s2971_s2 = inlined_call_operand.vmem [shape: f32[1,64], index: 2, kind: input, shape index: {}]   ;;  %s2972_s3 = inlined_call_operand.vmem [shape: bf16[2,4,8,64], index: 3, kind: output, shape index: {}]  }
   0x1   :  { %s2438_s14 = smov 0  }
   0x2 LB: > { %s25_s15 = sadd.s32 1, %s2408_s13  ;;  %p1951_p0 = scmp.ge.s32.totalorder %s2412_s14, 1  ;;  %s2412_s14 = sphi %s2438_s14, %s13_s14   ;;  %s2408_s13 = sphi %s2436_s13, %s2978_s13   ;;  %s2404_s12 = sphi %s2434_s12, %s2977_s12  }
   0x3   : > { %p27_p1 = scmp.ge.s32.totalorder %s25_s15, 2  ;;  %p157_p2 = scmp.lt.s32.totalorder %s2412_s14, 3 }
   0x5   : > { %s2980_s15 = smov (%p27_p1, %s25_s15), 0  ;;  %p158_p3 = pnand %p1951_p0, %p157_p2 }
   0x6   : > { %p188_p4 = scmp.lt.s32.totalorder (!%p158_p3), %s2404_s12, 1 }
   0x7   : > { %161 = sbr.rel (%p158_p3) target bundleno = 321 (0x141), region = 32 }
   0xc   : > { %v2360_v0 = vld [vmem:[%s2970_s1 + $0x18] sm:$0xff]   ;;  %v2361_v1 = vld [vmem:[%s2970_s1 + $0x10] sm:$0xff]   ;;  %s2982_s12 = smov (!%p188_p4, %s2404_s12), 1  ;;  %v2463_v2 = vld [vmem:[%s2970_s1 + $0x8] sm:$0xff]   ;;  %vm231_vm0 = vsmask.f32 3328 }
   0xd   : > { %2331 = vmatprep.subr.bf16.mxu1 %v2360_v0  ;;  %2223 = vmatprep.subr.bf16.mxu0 %v2360_v0  ;;  %s2335_s22 = smul.u32 80, %s2982_s12  ;;  %v2469_v3 = vld [vmem:[%s2970_s1 + $0x28] sm:$0xff]   ;;  %vm232_vm1 = vsmask.f32 7440  ;;  %vm370_vm2 = vcmask 261120   ;;  %vm586_vm4 = vcmask 1042432  }
   0xe   : > { %2333 = vmatpush3.bf16.msra.mxu1 %v2360_v0  ;;  %2224 = vmatpush3.bf16.msra.mxu0 %v2360_v0  ;;  %vm2515_vm3 = vmor %vm231_vm0, %vm232_vm1  ;;  %vm587_vm5 = vcmask 1046532   ;;  %vm1839_vm7 = vcmask 523264   ;;  %s2168_s8 = sshll.u32 %s2982_s12, 4  ;;  %vm1856_vm8 = vcmask 519168  }
   0xf   : > { %2332 = vmatprep.subr.bf16.mxu1 %v2361_v1  ;;  %2225 = vmatprep.subr.bf16.mxu0 %v2361_v1  ;;  %s2474_s27 = scalar_lea.vmem %s2969_s0, %s2335_s22  ;;  %vm2579_vm6 = vmor %vm586_vm4, %vm587_vm5  ;;  %s204_s12 = scalar_lea.vmem %s2972_s3, %s2168_s8 }
  0x10   : > { %v2477_v4 = vld [vmem:[%s2474_s27] sm:$0xf]  ;;  %v2480_v5 = vld [vmem:[%s2474_s27 + $0x8] sm:$0xf]  ;;  %v2483_v6 = vld [vmem:[%s2474_s27 + $0x4] sm:$0x1] }
  0x11   : > { %v2486_v7 = vld [vmem:[%s2474_s27 + $0xc] sm:$0x1]  ;;  %v235_v8 = vshrl.u32 %v2477_v4, 16  ;;  %v238_v9 = vshll.u32 %v2477_v4, 16  ;;  %v244_v10 = vshll.u32 %v2483_v6, 16  ;;  %v249_v11 = vshrl.u32 %v2480_v5, 16 }
  0x12   : > { %2334 = vmatpush3.bf16.msra.mxu1 %v2361_v1  ;;  %2226 = vmatpush3.bf16.msra.mxu0 %v2361_v1  ;;  %v252_v12 = vshll.u32 %v2480_v5, 16  ;;  %v258_v13 = vshll.u32 %v2486_v7, 16  ;;  %v591_v14 = vrot.slane %v2483_v6, 5  ;;  %v595_v15 = vrot.slane %v2486_v7, 5  ;;  %v2499_v16 = vld [vmem:[%s2474_s27 + $0x20] sm:$0xf] }
  0x13   : > { %2235 = vmatprep.subr.bf16.mxu1 %v2463_v2  ;;  %2247 = vmatprep.subr.bf16.mxu0 %v2469_v3  ;;  %v237_v17 = vrot.slane %v235_v8, 4  ;;  %v240_v18 = vrot.slane %v238_v9, 5  ;;  %v246_v19 = vrot.slane %v244_v10, 5  ;;  %v251_v20 = vrot.slane %v249_v11, 4  ;;  %v2502_v21 = vld [vmem:[%s2474_s27 + $0x28] sm:$0xf] }
  0x14   : > { %v254_v22 = vrot.slane %v252_v12, 5  ;;  %v260_v23 = vrot.slane %v258_v13, 5  ;;  %v2505_v24 = vld [vmem:[%s2474_s27 + $0x24] sm:$0x1]  ;;  %v2508_v25 = vld [vmem:[%s2474_s27 + $0x2c] sm:$0x1] }
  0x15   : > { %v241_v26 = vor.u32 %v240_v18, %v237_v17  ;;  %v291_v27 = vshrl.u32 %v2499_v16, 16  ;;  %v294_v28 = vshll.u32 %v2499_v16, 16  ;;  %v300_v29 = vshll.u32 %v2505_v24, 16  ;;  %v2523_v35 = vld [vmem:[%s2474_s27 + $0x10] sm:$0xf]  ;;  %v2364_v7 = vld [vmem:[%s2970_s1] sm:$0xff]  }
  0x16   : > { %v255_v31 = vor.u32 %v254_v22, %v251_v20  ;;  %v305_v32 = vshrl.u32 %v2502_v21, 16  ;;  %v308_v33 = vshll.u32 %v2502_v21, 16  ;;  %v314_v34 = vshll.u32 %v2508_v25, 16  ;;  %v2526_v40 = vld [vmem:[%s2474_s27 + $0x18] sm:$0xf] }
  0x17   : > { %v242_v36 = vrot.slane %v241_v26, 4  ;;  %v293_v37 = vrot.slane %v291_v27, 4  ;;  %v296_v38 = vrot.slane %v294_v28, 5  ;;  %v302_v39 = vrot.slane %v300_v29, 5  ;;  %v2529_v45 = vld [vmem:[%s2474_s27 + $0x14] sm:$0x1] }
  0x18   : > { %v256_v41 = vrot.slane %v255_v31, 4  ;;  %v307_v42 = vrot.slane %v305_v32, 4  ;;  %v310_v43 = vrot.slane %v308_v33, 5  ;;  %v316_v44 = vrot.slane %v314_v34, 5  ;;  %v2538_v52 = vld [vmem:[%s2474_s27 + $0x1c] sm:$0x1] }
  0x19   : > { %v247_v46 = vsel %vm2515_vm3, %v242_v36, %v246_v19  ;;  %v297_v47 = vor.u32 %v296_v38, %v293_v37  ;;  %v607_v48 = vrot.slane %v2505_v24, 5  ;;  %v611_v49 = vrot.slane %v2508_v25, 5  ;;  %v2543_v55 = vld [vmem:[%s2474_s27 + $0x30] sm:$0xf]  ;;  %v2548_v60 = vld [vmem:[%s2474_s27 + $0x34] sm:$0x1] }
  0x1a   : > { %v261_v50 = vsel %vm2515_vm3, %v256_v41, %v260_v23  ;;  %v311_v51 = vor.u32 %v310_v43, %v307_v42  ;;  %v263_v53 = vshrl.u32 %v2523_v35, 16  ;;  %v266_v54 = vshll.u32 %v2523_v35, 16  ;;  %v2552_v1 = vld [vmem:[%s2474_s27 + $0x38] sm:$0xf]  ;;  %v2555_v8 = vld [vmem:[%s2474_s27 + $0x3c] sm:$0x1] }
  0x1b   : > { %v1959_v56 = vcombine.low %v247_v46, %v261_v50  ;;  %v298_v57 = vrot.slane %v297_v47, 4  ;;  %v272_v58 = vshll.u32 %v2529_v45, 16  ;;  %v277_v59 = vshrl.u32 %v2526_v40, 16  ;;  %v557_v20 = vld [vmem:[%s2474_s27] sm:$0xe] }
  0x1c   : > { %v312_v61 = vrot.slane %v311_v51, 4  ;;  %v265_v62 = vrot.slane %v263_v53, 4  ;;  %v268_v63 = vrot.slane %v266_v54, 5  ;;  %v280_v0 = vshll.u32 %v2526_v40, 16  ;;  %v558_v28 = vld [vmem:[%s2474_s27 + $0x8] sm:$0xe] }
  0x1d   : > { %2227 = vmatprep.mubr.msk.bf16.mxu0 %vm370_vm2, %v1959_v56  ;;  %v303_v9 = vsel %vm2515_vm3, %v298_v57, %v302_v39  ;;  %v274_v10 = vrot.slane %v272_v58, 5  ;;  %v279_v11 = vrot.slane %v277_v59, 4  ;;  %v286_v12 = vshll.u32 %v2538_v52, 16  ;;  %v559_v34 = vld [vmem:[%s2474_s27 + $0x10] sm:$0xe] }
  0x1e   : > { %v317_v13 = vsel %vm2515_vm3, %v312_v61, %v316_v44  ;;  %v269_v17 = vor.u32 %v268_v63, %v265_v62  ;;  %v282_v18 = vrot.slane %v280_v0, 5  ;;  %v599_v19 = vrot.slane %v2529_v45, 5  ;;  %v560_v45 = vld [vmem:[%s2474_s27 + $0x18] sm:$0xe]  ;;  %v561_v46 = vld [vmem:[%s2474_s27 + $0x20] sm:$0xe] }
  0x1f   : > { %v1961_v22 = vcombine.low %v303_v9, %v317_v13  ;;  %v288_v23 = vrot.slane %v286_v12, 5  ;;  %v603_v26 = vrot.slane %v2538_v52, 5  ;;  %v319_v27 = vshrl.u32 %v2543_v55, 16  ;;  %v562_v53 = vld [vmem:[%s2474_s27 + $0x28] sm:$0xe]  ;;  %v2365_v62 = vld [vmem:[%s2970_s1 + $0x20] sm:$0xff]  }
  0x20   : > { %v270_v29 = vrot.slane %v269_v17, 4  ;;  %v283_v31 = vor.u32 %v282_v18, %v279_v11  ;;  %v322_v32 = vshll.u32 %v2543_v55, 16  ;;  %v328_v33 = vshll.u32 %v2548_v60, 16  ;;  %v563_v9 = vld [vmem:[%s2474_s27 + $0x30] sm:$0xe] }
  0x21   : > { %2231 = vmatprep.mubr.msk.bf16.mxu1 %vm370_vm2, %v1961_v22  ;;  %v321_v36 = vrot.slane %v319_v27, 4  ;;  %v333_v37 = vshrl.u32 %v2552_v1, 16  ;;  %v336_v38 = vshll.u32 %v2552_v1, 16  ;;  %v342_v39 = vshll.u32 %v2555_v8, 16  ;;  %v2023_v27 = vld [vmem:[%s2474_s27 + $0x8] sm:$0xf] }
  0x22   : > { %v275_v41 = vsel %vm2515_vm3, %v270_v29, %v274_v10  ;;  %v284_v42 = vrot.slane %v283_v31, 4  ;;  %v324_v43 = vrot.slane %v322_v32, 5  ;;  %v330_v47 = vrot.slane %v328_v33, 5  ;;  %v564_v10 = vld [vmem:[%s2474_s27 + $0x38] sm:$0xe] }
  0x23   : > { %v335_v50 = vrot.slane %v333_v37, 4  ;;  %v338_v51 = vrot.slane %v336_v38, 5  ;;  %v1983_v52 = vrot.slane %v557_v20, 9  ;;  %v344_v57 = vrot.slane %v342_v39, 5  ;;  %v2025_v29 = vld [vmem:[%s2474_s27 + $0x10] sm:$0xf] }
  0x24   : > { %v289_v54 = vsel %vm2515_vm3, %v284_v42, %v288_v23  ;;  %v325_v56 = vor.u32 %v324_v43, %v321_v36  ;;  %v1984_v58 = vrot.slane %v558_v28, 9  ;;  %v1985_v0 = vrot.slane %v559_v34, 9  ;;  %v2630_v28 = vld [vmem:[%s2474_s27 + $0xc] sm:$0x1]  ;;  %v2635_v36 = vld [vmem:[%s2474_s27 + $0x14] sm:$0x1] }
  0x25   : > { %v1960_v59 = vcombine.low %v275_v41, %v289_v54  ;;  %v339_v61 = vor.u32 %v338_v51, %v335_v50  ;;  %v592_v63 = vsel %vm2579_vm6, %v1983_v52, %v591_v14  ;;  %v1986_v13 = vrot.slane %v560_v45, 9  ;;  %v2367_v45 = vld [vmem:[%s2970_s1 + $0x38] sm:$0xff]  }
  0x26   : > { %v326_v11 = vrot.slane %v325_v56, 4  ;;  %v596_v12 = vsel %vm2579_vm6, %v1984_v58, %v595_v15  ;;  %v1987_v17 = vrot.slane %v561_v46, 9  ;;  %v600_v6 = vsel %vm2579_vm6, %v1985_v0, %v599_v19  ;;  %v2660_v54 = vld [vmem:[%s2474_s27 + $0x1c] sm:$0x1]  ;;  %v2029_v56 = vld [vmem:[%s2474_s27 + $0x20] sm:$0xf] }
  0x27   : > { %2228 = vmatmul.mubr.msk.bf16.vlgmr.msra.gmra.mxu0 %vm370_vm2, %v1960_v59  ;;  %v340_v18 = vrot.slane %v339_v61, 4  ;;  %v1991_v20 = vcombine.low %v592_v63, %v596_v12  ;;  %v1988_v14 = vrot.slane %v562_v53, 9  ;;  %v1969_v15 = vcombine.low %v2477_v4, %v2480_v5  ;;  %v2027_v53 = vld [vmem:[%s2474_s27 + $0x18] sm:$0xf] }
  0x28   : > { %v331_v22 = vsel %vm2515_vm3, %v326_v11, %v330_v47  ;;  %2248 = vmatpush3.bf16.msra.mxu0 %v2469_v3  ;;  %v604_v23 = vsel %vm2579_vm6, %v1986_v13, %v603_v26  ;;  %v2369_v3 = vld [vmem:[%s2970_s1 + $0x48] sm:$0xff]   ;;  %v608_v4 = vsel %vm2579_vm6, %v1987_v17, %v607_v48  ;;  %v1989_v26 = vrot.slane %v563_v9, 9 }
  0x29   : > { %v345_v19 = vsel %vm2515_vm3, %v340_v18, %v344_v57  ;;  %2249 = vmatprep.subr.bf16.mxu0 %v2365_v62  ;;  %2251 = vmatprep.mubr.msk.bf16.mxu0 %vm370_vm2, %v1991_v20  ;;  %v612_v5 = vsel %vm2579_vm6, %v1988_v14, %v611_v49  ;;  %v1992_v32 = vcombine.low %v600_v6, %v604_v23  ;;  %v615_v33 = vrot.slane %v2548_v60, 5  ;;  %v2668_v57 = vld [vmem:[%s2474_s27 + $0x24] sm:$0x1]  ;;  %v2675_v13 = vld [vmem:[%s2970_s1 + $0x68] sm:$0xff]  }
  0x2a   : > { %v1962_v31 = vcombine.low %v331_v22, %v345_v19  ;;  %v1990_v34 = vrot.slane %v564_v10, 9  ;;  %v619_v24 = vrot.slane %v2555_v8, 5  ;;  %v883_v37 = vshrl.u32 %v2023_v27, 16  ;;  %v2373_v8 = vld [vmem:[%s2970_s1 + $0x40] sm:$0xff]   ;;  %v2685_v22 = vld [vmem:[%s2970_s1 + $0x58] sm:$0xff]  }
  0x2b   : > { %v886_v48 = vshll.u32 %v2023_v27, 16  ;;  %v892_v25 = vshll.u32 %v2630_v28, 16  ;;  %v1993_v49 = vcombine.low %v608_v4, %v612_v5  ;;  %v897_v38 = vshrl.u32 %v2025_v29, 16  ;;  %v2031_v27 = vld [vmem:[%s2474_s27 + $0x28] sm:$0xf] }
  0x2c   : > { %2232 = vmatmul.mubr.msk.bf16.vlgmr.msra.gmra.mxu1 %vm370_vm2, %v1962_v31  ;;  %2250 = vmatpush3.bf16.msra.mxu0 %v2365_v62  ;;  %v900_v39 = vshll.u32 %v2025_v29, 16  ;;  %v906_v41 = vshll.u32 %v2635_v36, 16  ;;  %v1971_v60 = vcombine.low %v2499_v16, %v2502_v21  ;;  %v885_v42 = vrot.slane %v883_v37, 4  ;;  %v2690_v4 = vld [vmem:[%s2474_s27 + $0x2c] sm:$0x1] }
  0x2d   : > { %2236 = vmatpush3.bf16.msra.mxu1 %v2463_v2  ;;  %2239 = vmatprep.mubr.msk.bf16.mxu1 %vm370_vm2, %v1969_v15  ;;  %v888_v43 = vrot.slane %v886_v48, 5  ;;  %v894_v2 = vrot.slane %v892_v25, 5  ;;  %v899_v46 = vrot.slane %v897_v38, 4  ;;  %v1970_v21 = vcombine.low %v2523_v35, %v2526_v40  ;;  %v2371_v35 = vld [vmem:[%s2970_s1 + $0x30] sm:$0xff]  }
  0x2e   : > { %2237 = vmatprep.subr.bf16.mxu1 %v2364_v7  ;;  %2271 = vmatprep.subr.bf16.mxu0 %v2369_v3  ;;  %v902_v47 = vrot.slane %v900_v39, 5  ;;  %v908_v16 = vrot.slane %v906_v41, 5  ;;  %v616_v50 = vsel %vm2579_vm6, %v1989_v26, %v615_v33  ;;  %v620_v51 = vsel %vm2579_vm6, %v1990_v34, %v619_v24  ;;  %v2033_v5 = vld [vmem:[%s2474_s27 + $0x30] sm:$0xf]  ;;  %v2694_v26 = vld [vmem:[%s2474_s27 + $0x34] sm:$0x1] }
  0x2f   : > { %2252 = vmatmul.mubr.msk.bf16.vlgmr.msra.gmra.mxu0 %vm370_vm2, %v1992_v32  ;;  %v889_v52 = vor.u32 %v888_v43, %v885_v42  ;;  %v911_v58 = vshrl.u32 %v2027_v53, 16  ;;  %v914_v59 = vshll.u32 %v2027_v53, 16  ;;  %v920_v61 = vshll.u32 %v2660_v54, 16  ;;  %v2374_v41 = vld [vmem:[%s2474_s27 + $0x8] ss:$8 sps:$4 sm:$0xff]  }
  0x30   : > { %2272 = vmatpush3.bf16.msra.mxu0 %v2369_v3  ;;  %2255 = vmatprep.mubr.msk.bf16.mxu0 %vm370_vm2, %v1993_v49  ;;  %v903_v40 = vor.u32 %v902_v47, %v899_v46  ;;  %v925_v63 = vshrl.u32 %v2029_v56, 16  ;;  %v928_v0 = vshll.u32 %v2029_v56, 16  ;;  %v934_v9 = vshll.u32 %v2668_v57, 16 }
  0x31   : > { %2238 = vmatpush3.bf16.msra.mxu1 %v2364_v7  ;;  %2273 = vmatprep.subr.bf16.mxu0 %v2373_v8  ;;  %v890_v62 = vrot.slane %v889_v52, 4  ;;  %v913_v11 = vrot.slane %v911_v58, 4  ;;  %v916_v12 = vrot.slane %v914_v59, 5  ;;  %v1994_v17 = vcombine.low %v616_v50, %v620_v51  ;;  %v2381_v52 = vld [vmem:[%s2970_s1 + $0x60] sm:$0xff]  }
  0x32   : > { %2259 = vmatprep.subr.bf16.mxu1 %v2367_v45  ;;  %v904_v10 = vrot.slane %v903_v40, 4  ;;  %v927_v20 = vrot.slane %v925_v63, 4  ;;  %v930_v6 = vrot.slane %v928_v0, 5  ;;  %v922_v15 = vrot.slane %v920_v61, 5  ;;  %v2376_v63 = vld [vmem:[%s2474_s27 + $0x18] ss:$8 sps:$4 sm:$0xff]  }
  0x33   : > { %v895_v18 = vsel %vm2515_vm3, %v890_v62, %v894_v2  ;;  %v917_v7 = vor.u32 %v916_v12, %v913_v11  ;;  %v936_v23 = vrot.slane %v934_v9, 5  ;;  %v939_v31 = vshrl.u32 %v2031_v27, 16  ;;  %v2711_v2 = vld [vmem:[%s2474_s27 + $0x3c] sm:$0x1]  ;;  %v2053_v12 = vld [vmem:[%s2474_s27 + $0x8] sm:$0xe] }
  0x34   : > { %2240 = vmatmul.mubr.msk.bf16.vlgmr.msra.gmra.mxu1 %vm370_vm2, %v1970_v21  ;;  %2274 = vmatpush3.bf16.msra.mxu0 %v2373_v8  ;;  %v909_v14 = vsel %vm2515_vm3, %v904_v10, %v908_v16  ;;  %v931_v3 = vor.u32 %v930_v6, %v927_v20  ;;  %v942_v32 = vshll.u32 %v2031_v27, 16  ;;  %v948_v33 = vshll.u32 %v2690_v4, 16  ;;  %v2037_v16 = vld [vmem:[%s2474_s27 + $0x40] sm:$0xf]  ;;  %v2715_v21 = vld [vmem:[%s2474_s27 + $0x44] sm:$0x1] }
  0x35   : > { %2260 = vmatpush3.bf16.msra.mxu1 %v2367_v45  ;;  %2243 = vmatprep.mubr.msk.bf16.mxu1 %vm370_vm2, %v1971_v60  ;;  %v2043_v19 = vcombine.low %v895_v18, %v909_v14  ;;  %v918_v29 = vrot.slane %v917_v7, 4  ;;  %v953_v24 = vshrl.u32 %v2033_v5, 16  ;;  %v956_v37 = vshll.u32 %v2033_v5, 16  ;;  %v2035_v45 = vld [vmem:[%s2474_s27 + $0x38] sm:$0xf] }
  0x36   : > { %2261 = vmatprep.subr.bf16.mxu1 %v2371_v35  ;;  %2295 = vmatprep.subr.bf16.mxu0 %v2675_v13  ;;  %v932_v34 = vrot.slane %v931_v3, 4  ;;  %v962_v48 = vshll.u32 %v2694_v26, 16  ;;  %v1972_v25 = vcombine.low %v2543_v55, %v2552_v1  ;;  %v941_v38 = vrot.slane %v939_v31, 4  ;;  %v2054_v6 = vld [vmem:[%s2474_s27 + $0x10] sm:$0xe] }
  0x37   : > { %2256 = vmatmul.mubr.msk.bf16.gmra.mxu0 %vm370_vm2, %v1994_v17  ;;  %v923_v49 = vsel %vm2515_vm3, %v918_v29, %v922_v15  ;;  %v944_v39 = vrot.slane %v942_v32, 5  ;;  %v955_v8 = vrot.slane %v953_v24, 4  ;;  %v958_v42 = vrot.slane %v956_v37, 5  ;;  %v2378_v7 = vld [vmem:[%s2474_s27 + $0x28] ss:$8 sps:$4 sm:$0xff]  }
  0x38   : > { %2275 = vmatprep.mubr.msk.bf16.mxu0 %vm370_vm2, %v2043_v19  ;;  %v937_v60 = vsel %vm2515_vm3, %v932_v34, %v936_v23  ;;  %v950_v55 = vrot.slane %v948_v33, 5  ;;  %v964_v1 = vrot.slane %v962_v48, 5  ;;  %v967_v50 = vshrl.u32 %v2035_v45, 16  ;;  %v2379_v23 = vld [vmem:[%s2970_s1 + $0x50] sm:$0xff]   ;;  %v2055_v33 = vld [vmem:[%s2474_s27 + $0x18] sm:$0xe] }
  0x39   : > { %2262 = vmatpush3.bf16.msra.mxu1 %v2371_v35  ;;  %v945_v43 = vor.u32 %v944_v39, %v941_v38  ;;  %v2044_v46 = vcombine.low %v923_v49, %v937_v60  ;;  %v959_v47 = vor.u32 %v958_v42, %v955_v8  ;;  %v970_v51 = vshll.u32 %v2035_v45, 16  ;;  %v2382_v32 = vld [vmem:[%s2474_s27 + $0x10] ss:$8 sps:$4 sm:$0xff]   ;;  %v2746_v34 = vld [vmem:[%s2970_s1 + $0x88] sm:$0xff]  }
  0x3a   : > { %2283 = vmatprep.subr.bf16.mxu1 %v2685_v22  ;;  %v976_v56 = vshll.u32 %v2711_v2, 16  ;;  %v981_v35 = vshrl.u32 %v2037_v16, 16  ;;  %v984_v40 = vshll.u32 %v2037_v16, 16  ;;  %v969_v59 = vrot.slane %v967_v50, 4  ;;  %v2058_v60 = vld [vmem:[%s2474_s27 + $0x30] sm:$0xe] }
  0x3b   : > { %v946_v53 = vrot.slane %v945_v43, 4  ;;  %v960_v58 = vrot.slane %v959_v47, 4  ;;  %v972_v61 = vrot.slane %v970_v51, 5  ;;  %v990_v62 = vshll.u32 %v2715_v21, 16  ;;  %v2380_v42 = vld [vmem:[%s2474_s27 + $0x38] ss:$8 sps:$4 sm:$0xff]  }
  0x3c   : > { %2244 = vmatmul.mubr.msk.bf16.gmra.mxu1 %vm370_vm2, %v1972_v25  ;;  %v978_v9 = vrot.slane %v976_v56, 5  ;;  %v983_v10 = vrot.slane %v981_v35, 4  ;;  %v986_v11 = vrot.slane %v984_v40, 5  ;;  %v2065_v14 = vrot.slane %v2053_v12, 9  ;;  %v2384_v47 = vld [vmem:[%s2474_s27 + $0x20] ss:$8 sps:$4 sm:$0xff]  }
  0x3d   : > { %2263 = vmatprep.mubr.msk.bf16.mxu1 %vm370_vm2, %v2374_v41  ;;  %v951_v0 = vsel %vm2515_vm3, %v946_v53, %v950_v55  ;;  %v965_v17 = vsel %vm2515_vm3, %v960_v58, %v964_v1  ;;  %v973_v18 = vor.u32 %v972_v61, %v969_v59  ;;  %v992_v20 = vrot.slane %v990_v62, 5  ;;  %v2057_v41 = vld [vmem:[%s2474_s27 + $0x28] sm:$0xe]  ;;  %v2386_v53 = vld [vmem:[%s2474_s27 + $0x30] ss:$8 sps:$4 sm:$0xff]  }
  0x3e   : > { %v2045_v15 = vcombine.low %v951_v0, %v965_v17  ;;  %v987_v27 = vor.u32 %v986_v11, %v983_v10  ;;  %v1134_v19 = vrot.slane %v2630_v28, 5  ;;  %v2066_v3 = vrot.slane %v2054_v6, 9  ;;  %v2105_v40 = vld [vmem:[%s2474_s27 + $0x10] sm:$0xf]  ;;  %v2107_v61 = vld [vmem:[%s2474_s27 + $0x18] sm:$0xf] }
  0x3f   : > { %2276 = vmatmul.mubr.msk.bf16.vlgmr.msra.gmra.mxu0 %vm370_vm2, %v2044_v46  ;;  %v974_v5 = vrot.slane %v973_v18, 4  ;;  %v1138_v29 = vrot.slane %v2635_v36, 5  ;;  %v2067_v24 = vrot.slane %v2055_v33, 9  ;;  %v1142_v37 = vrot.slane %v2660_v54, 5  ;;  %v2060_v46 = vld [vmem:[%s2474_s27 + $0x40] sm:$0xe] }
  0x40   : > { %2296 = vmatpush3.bf16.msra.mxu0 %v2675_v13  ;;  %2279 = vmatprep.mubr.msk.bf16.mxu0 %vm370_vm2, %v2045_v15  ;;  %v988_v31 = vrot.slane %v987_v27, 4  ;;  %v2056_v13 = vld [vmem:[%s2474_s27 + $0x20] sm:$0xe]  ;;  %v1146_v25 = vrot.slane %v2668_v57, 5  ;;  %v1150_v49 = vrot.slane %v2690_v4, 5  ;;  %v1135_v54 = vsel %vm2579_vm6, %v2065_v14, %v1134_v19  ;;  %v2767_v57 = vld [vmem:[%s2970_s1 + $0x78] sm:$0xff]  }
  0x41   : > { %2297 = vmatprep.subr.bf16.mxu0 %v2381_v52  ;;  %v979_v28 = vsel %vm2515_vm3, %v974_v5, %v978_v9  ;;  %v2068_v48 = vrot.slane %v2056_v13, 9  ;;  %v1139_v39 = vsel %vm2579_vm6, %v2066_v3, %v1138_v29  ;;  %v2070_v4 = vrot.slane %v2058_v60, 9  ;;  %v2108_v62 = vld [vmem:[%s2474_s27 + $0x1c] sm:$0x1]  ;;  %v2389_v0 = vld [vmem:[%s2970_s1 + $0x80] sm:$0xff]  }
  0x42   : > { %v993_v36 = vsel %vm2515_vm3, %v988_v31, %v992_v20  ;;  %v1154_v8 = vrot.slane %v2694_v26, 5  ;;  %v2073_v43 = vcombine.low %v1135_v54, %v1139_v39  ;;  %v2776_v55 = vsel %vm2579_vm6, %v2067_v24, %v1142_v37  ;;  %v2059_v26 = vld [vmem:[%s2474_s27 + $0x38] sm:$0xe]  ;;  %v2135_v12 = vld [vmem:[%s2474_s27 + $0x10] sm:$0xe] }
  0x43   : > { %v2046_v38 = vcombine.low %v979_v28, %v993_v36  ;;  %v2780_v1 = vsel %vm2579_vm6, %v2068_v48, %v1146_v25  ;;  %v2071_v50 = vrot.slane %v2059_v26, 9  ;;  %v1158_v51 = vrot.slane %v2711_v2, 5  ;;  %v2136_v6 = vld [vmem:[%s2474_s27 + $0x18] sm:$0xe]  ;;  %v2109_v19 = vld [vmem:[%s2474_s27 + $0x20] sm:$0xf] }
  0x44   : > { %2264 = vmatmul.mubr.msk.bf16.vlgmr.msra.gmra.mxu1 %vm370_vm2, %v2376_v63  ;;  %2298 = vmatpush3.bf16.msra.mxu0 %v2381_v52  ;;  %v2791_v16 = vsel %vm2579_vm6, %v2070_v4, %v1154_v8  ;;  %v2072_v52 = vrot.slane %v2060_v46, 9  ;;  %v1162_v56 = vrot.slane %v2715_v21, 5  ;;  %v2074_v58 = vcombine.low %v2776_v55, %v2780_v1  ;;  %v2106_v21 = vld [vmem:[%s2474_s27 + $0x14] sm:$0x1]  ;;  %v2388_v33 = vld [vmem:[%s2474_s27 + $0x40] ss:$8 sps:$4 sm:$0xff]  }
  0x45   : > { %2284 = vmatpush3.bf16.msra.mxu1 %v2685_v22  ;;  %2267 = vmatprep.mubr.msk.bf16.mxu1 %vm370_vm2, %v2378_v7  ;;  %v2069_v22 = vrot.slane %v2057_v41, 9  ;;  %v2799_v35 = vsel %vm2579_vm6, %v2071_v50, %v1158_v51  ;;  %v1426_v9 = vshrl.u32 %v2105_v40, 16  ;;  %v1429_v10 = vshll.u32 %v2105_v40, 16  ;;  %v2111_v37 = vld [vmem:[%s2474_s27 + $0x28] sm:$0xf] }
  0x46   : > { %2285 = vmatprep.subr.bf16.mxu1 %v2379_v23  ;;  %2319 = vmatprep.subr.bf16.mxu0 %v2746_v34  ;;  %v2809_v59 = vsel %vm2579_vm6, %v2072_v52, %v1162_v56  ;;  %v1435_v11 = vshll.u32 %v2106_v21, 16  ;;  %v1440_v17 = vshrl.u32 %v2107_v61, 16  ;;  %v1443_v18 = vshll.u32 %v2107_v61, 16  ;;  %v2112_v25 = vld [vmem:[%s2474_s27 + $0x2c] sm:$0x1] }
  0x47   : > { %2280 = vmatmul.mubr.msk.bf16.gmra.mxu0 %vm370_vm2, %v2046_v38  ;;  %v2784_v45 = vsel %vm2579_vm6, %v2069_v22, %v1150_v49  ;;  %v2076_v63 = vcombine.low %v2799_v35, %v2809_v59  ;;  %v1449_v20 = vshll.u32 %v2108_v62, 16  ;;  %v2147_v14 = vrot.slane %v2135_v12, 9  ;;  %v2137_v4 = vld [vmem:[%s2474_s27 + $0x20] sm:$0xe]  ;;  %v2138_v1 = vld [vmem:[%s2474_s27 + $0x28] sm:$0xe] }
  0x48   : > { %2299 = vmatprep.mubr.msk.bf16.mxu0 %vm370_vm2, %v2382_v32  ;;  %v2075_v2 = vcombine.low %v2784_v45, %v2791_v16  ;;  %v1428_v7 = vrot.slane %v1426_v9, 4  ;;  %v1431_v15 = vrot.slane %v1429_v10, 5  ;;  %v1677_v27 = vrot.slane %v2106_v21, 5  ;;  %v2110_v32 = vld [vmem:[%s2474_s27 + $0x24] sm:$0x1] }
  0x49   : > { %2286 = vmatpush3.bf16.msra.mxu1 %v2379_v23  ;;  %v1437_v23 = vrot.slane %v1435_v11, 5  ;;  %v1442_v3 = vrot.slane %v1440_v17, 4  ;;  %v1445_v5 = vrot.slane %v1443_v18, 5  ;;  %v1451_v29 = vrot.slane %v1449_v20, 5  ;;  %v2113_v16 = vld [vmem:[%s2474_s27 + $0x30] sm:$0xf] }
  0x4a   : > { %2307 = vmatprep.subr.bf16.mxu1 %v2767_v57  ;;  %v2148_v31 = vrot.slane %v2136_v6, 9  ;;  %v1432_v13 = vor.u32 %v1431_v15, %v1428_v7  ;;  %v1678_v28 = vsel %vm2579_vm6, %v2147_v14, %v1677_v27  ;;  %v1681_v24 = vrot.slane %v2108_v62, 5  ;;  %v2114_v56 = vld [vmem:[%s2474_s27 + $0x34] sm:$0x1]  ;;  %v2115_v40 = vld [vmem:[%s2474_s27 + $0x38] sm:$0xf] }
  0x4b   : > { %v1454_v36 = vshrl.u32 %v2109_v19, 16  ;;  %v1446_v48 = vor.u32 %v1445_v5, %v1442_v3  ;;  %v1457_v49 = vshll.u32 %v2109_v19, 16  ;;  %v1463_v38 = vshll.u32 %v2110_v32, 16  ;;  %v2116_v11 = vld [vmem:[%s2474_s27 + $0x3c] sm:$0x1] }
  0x4c   : > { %2268 = vmatmul.mubr.msk.bf16.gmra.mxu1 %vm370_vm2, %v2380_v42  ;;  %v1468_v54 = vshrl.u32 %v2111_v37, 16  ;;  %v1433_v39 = vrot.slane %v1432_v13, 4  ;;  %v1682_v41 = vsel %vm2579_vm6, %v2148_v31, %v1681_v24  ;;  %v1471_v22 = vshll.u32 %v2111_v37, 16  ;;  %v2139_v15 = vld [vmem:[%s2474_s27 + $0x30] sm:$0xe] }
  0x4d   : > { %2287 = vmatprep.mubr.msk.bf16.mxu1 %vm370_vm2, %v2073_v43  ;;  %v1456_v60 = vrot.slane %v1454_v36, 4  ;;  %v1447_v8 = vrot.slane %v1446_v48, 4  ;;  %v2155_v42 = vcombine.low %v1678_v28, %v1682_v41  ;;  %v1459_v43 = vrot.slane %v1457_v49, 5  ;;  %v2118_v28 = vld [vmem:[%s2474_s27 + $0x44] sm:$0x1] }
  0x4e   : > { %v1465_v55 = vrot.slane %v1463_v38, 5  ;;  %v1438_v45 = vsel %vm2515_vm3, %v1433_v39, %v1437_v23  ;;  %v1470_v26 = vrot.slane %v1468_v54, 4  ;;  %v1473_v46 = vrot.slane %v1471_v22, 5  ;;  %v2140_v23 = vld [vmem:[%s2474_s27 + $0x38] sm:$0xe] }
  0x4f   : > { %2300 = vmatmul.mubr.msk.bf16.vlgmr.msra.gmra.mxu0 %vm370_vm2, %v2384_v47  ;;  %v1477_v47 = vshll.u32 %v2112_v25, 16  ;;  %v1452_v50 = vsel %vm2515_vm3, %v1447_v8, %v1451_v29  ;;  %v1460_v51 = vor.u32 %v1459_v43, %v1456_v60  ;;  %v2149_v52 = vrot.slane %v2137_v4, 9  ;;  %v2117_v29 = vld [vmem:[%s2474_s27 + $0x40] sm:$0xf]  ;;  %v2119_v48 = vld [vmem:[%s2474_s27 + $0x48] sm:$0xf] }
  0x50   : > { %2320 = vmatpush3.bf16.msra.mxu0 %v2746_v34  ;;  %2303 = vmatprep.mubr.msk.bf16.mxu0 %vm370_vm2, %v2386_v53  ;;  %v2387_v34 = vld [vmem:[%s2970_s1 + $0x70] sm:$0xff]   ;;  %v1685_v53 = vrot.slane %v2110_v32, 5  ;;  %v2150_v21 = vrot.slane %v2138_v1, 9  ;;  %v1482_v9 = vshrl.u32 %v2113_v16, 16  ;;  %v1485_v12 = vshll.u32 %v2113_v16, 16 }
  0x51   : > { %2321 = vmatprep.subr.bf16.mxu0 %v2389_v0  ;;  %v1461_v61 = vrot.slane %v1460_v51, 4  ;;  %v1491_v17 = vshll.u32 %v2114_v56, 16  ;;  %v1496_v18 = vshrl.u32 %v2115_v40, 16  ;;  %v1499_v7 = vshll.u32 %v2115_v40, 16  ;;  %v2120_v54 = vld [vmem:[%s2474_s27 + $0x4c] sm:$0x1] }
  0x52   : > { %v1686_v62 = vsel %vm2579_vm6, %v2149_v52, %v1685_v53  ;;  %v1484_v14 = vrot.slane %v1482_v9, 4  ;;  %v1487_v3 = vrot.slane %v1485_v12, 5  ;;  %v1505_v13 = vshll.u32 %v2116_v11, 16 }
  0x53   : > { %v1466_v20 = vsel %vm2515_vm3, %v1461_v61, %v1465_v55  ;;  %v1493_v5 = vrot.slane %v1491_v17, 5  ;;  %v1498_v32 = vrot.slane %v1496_v18, 4  ;;  %v2151_v37 = vrot.slane %v2139_v15, 9 }
  0x54   : > { %2288 = vmatmul.mubr.msk.bf16.vlgmr.msra.gmra.mxu1 %vm370_vm2, %v2074_v58  ;;  %2322 = vmatpush3.bf16.msra.mxu0 %v2389_v0  ;;  %v1474_v58 = vor.u32 %v1473_v46, %v1470_v26  ;;  %v1689_v0 = vrot.slane %v2112_v25, 5  ;;  %v1488_v24 = vor.u32 %v1487_v3, %v1484_v14  ;;  %v1693_v36 = vrot.slane %v2114_v56, 5 }
  0x55   : > { %2308 = vmatpush3.bf16.msra.mxu1 %v2767_v57  ;;  %2291 = vmatprep.mubr.msk.bf16.mxu1 %vm370_vm2, %v2075_v2  ;;  %v2125_v57 = vcombine.low %v1438_v45, %v1452_v50  ;;  %v1479_v2 = vrot.slane %v1477_v47, 5  ;;  %v1507_v49 = vrot.slane %v1505_v13, 5  ;;  %v1697_v38 = vrot.slane %v2116_v11, 5  ;;  %v2142_v45 = vld [vmem:[%s2474_s27 + $0x48] sm:$0xe] }
  0x56   : > { %2309 = vmatprep.subr.bf16.mxu1 %v2387_v34  ;;  %v1475_v10 = vrot.slane %v1474_v58, 4  ;;  %v1690_v6 = vsel %vm2579_vm6, %v2150_v21, %v1689_v0  ;;  %v1510_v35 = vshrl.u32 %v2117_v29, 16  ;;  %v1489_v59 = vrot.slane %v1488_v24, 4 }
  0x57   : > { %2304 = vmatmul.mubr.msk.bf16.gmra.mxu0 %vm370_vm2, %v2388_v33  ;;  %v2156_v19 = vcombine.low %v1686_v62, %v1690_v6  ;;  %v1501_v33 = vrot.slane %v1499_v7, 5  ;;  %v1513_v39 = vshll.u32 %v2117_v29, 16  ;;  %v1519_v41 = vshll.u32 %v2118_v28, 16 }
  0x58   : > { %2323 = vmatprep.mubr.msk.bf16.mxu0 %vm370_vm2, %v2155_v42  ;;  %v1480_v27 = vsel %vm2515_vm3, %v1475_v10, %v1479_v2  ;;  %v1512_v4 = vrot.slane %v1510_v35, 4  ;;  %v1524_v8 = vshrl.u32 %v2119_v48, 16  ;;  %v2141_v42 = vld [vmem:[%s2474_s27 + $0x40] sm:$0xe]  ;;  %v1494_v43 = vsel %vm2515_vm3, %v1489_v59, %v1493_v5 }
  0x59   : > { %2310 = vmatpush3.bf16.msra.mxu1 %v2387_v34  ;;  %v2126_v31 = vcombine.low %v1466_v20, %v1480_v27  ;;  %v2152_v34 = vrot.slane %v2140_v23, 9  ;;  %v1502_v25 = vor.u32 %v1501_v33, %v1498_v32  ;;  %v1515_v1 = vrot.slane %v1513_v39, 5 }
  0x5a   : > { %v1526_v46 = vrot.slane %v1524_v8, 4  ;;  %v1527_v47 = vshll.u32 %v2119_v48, 16  ;;  %v1533_v16 = vshll.u32 %v2120_v54, 16  ;;  %v2153_v52 = vrot.slane %v2141_v42, 9 }
  0x5b   : > { %v1503_v60 = vrot.slane %v1502_v25, 4  ;;  %v1698_v22 = vsel %vm2579_vm6, %v2152_v34, %v1697_v38  ;;  %v1516_v51 = vor.u32 %v1515_v1, %v1512_v4  ;;  %v1701_v53 = vrot.slane %v2118_v28, 5 }
  0x5c   : > { %2292 = vmatmul.mubr.msk.bf16.gmra.mxu1 %vm370_vm2, %v2076_v63  ;;  %v1694_v63 = vsel %vm2579_vm6, %v2151_v37, %v1693_v36  ;;  %v1521_v56 = vrot.slane %v1519_v41, 5  ;;  %v1529_v40 = vrot.slane %v1527_v47, 5  ;;  %v1705_v58 = vrot.slane %v2120_v54, 5 }
  0x5d   : > { %2311 = vmatprep.mubr.msk.bf16.mxu1 %vm370_vm2, %v2125_v57  ;;  %v2157_v55 = vcombine.low %v1694_v63, %v1698_v22  ;;  %v1508_v26 = vsel %vm2515_vm3, %v1503_v60, %v1507_v49  ;;  %v2154_v57 = vrot.slane %v2142_v45, 9  ;;  %v1517_v2 = vrot.slane %v1516_v51, 4 }
  0x5e   : > { %v2127_v50 = vcombine.low %v1494_v43, %v1508_v26  ;;  %v1702_v21 = vsel %vm2579_vm6, %v2153_v52, %v1701_v53  ;;  %v1530_v61 = vor.u32 %v1529_v40, %v1526_v46  ;;  %v1535_v62 = vrot.slane %v1533_v16, 5 }
  0x5f   : > { %2324 = vmatmul.mubr.msk.bf16.vlgmr.msra.gmra.mxu0 %vm370_vm2, %v2156_v19  ;;  %v1706_v0 = vsel %vm2579_vm6, %v2154_v57, %v1705_v58  ;;  %v1522_v10 = vsel %vm2515_vm3, %v1517_v2, %v1521_v56 }
  0x60   : > { %2327 = vmatprep.mubr.msk.bf16.mxu0 %vm370_vm2, %v2157_v55  ;;  %v2158_v9 = vcombine.low %v1702_v21, %v1706_v0  ;;  %v1531_v11 = vrot.slane %v1530_v61, 4 }
  0x62   : > { %v1536_v12 = vsel %vm2515_vm3, %v1531_v11, %v1535_v62 }
  0x63   : > { %v2128_v17 = vcombine.low %v1522_v10, %v1536_v12 }
  0x64   : > { %2312 = vmatmul.mubr.msk.bf16.vlgmr.msra.gmra.mxu1 %vm370_vm2, %v2126_v31 }
  0x65   : > { %2315 = vmatprep.mubr.msk.bf16.mxu1 %vm370_vm2, %v2127_v50 }
  0x67   : > { %2328 = vmatmul.mubr.msk.bf16.gmra.mxu0 %vm370_vm2, %v2158_v9 }
  0x6c   : > { %2316 = vmatmul.mubr.msk.bf16.gmra.mxu1 %vm370_vm2, %v2128_v17 }
  0xe7   : > { %v2229_v18 = vpop.f32.mrf.mxu0 }
  0xe9   : > { %v417_v20 = vpop.f32.mrf.mxu0 }
  0xeb   : > { %v2230_v6 = vpop.f32.mrf.mxu0 }
  0xec   : > { %v2233_v14 = vpop.f32.mrf.mxu1 }
  0xed   : > { %v420_v7 = vpop.f32.mrf.mxu0 }
  0xee   : > { %v433_v44 = vpop.f32.mrf.mxu1 }
  0xef   : > { %v2253_v15 = vpop.f32.mrf.mxu0 }
  0xf0   : > { %v2895_v23 = vpop.f32.mrf.mxu1 }
  0xf1   : > { %v691_v27 = vpop.f32.mrf.mxu0 }
  0xf2   : > { %v2897_v19 = vpop.f32.mrf.mxu1 }
  0xf3   : > { %v2254_v3 = vpop.f32.mrf.mxu0 }
  0xf4   : > { %v2241_v5 = vpop.f32.mrf.mxu1 }
  0xf5   : > { %v694_v29 = vpop.f32.mrf.mxu0  ;;  %v535_v26 = vadd.f32 %v2241_v5, %v2229_v18 }
  0xf6   : > { %v526_v30 = vpop.f32.mrf.mxu1 }
  0xf7   : > { %v2257_v31 = vpop.f32.mrf.mxu0  ;;  %v527_v16 = vadd.f32 %v526_v30, %v417_v20  ;;  %v724_v52 = vadd.f32 %v2253_v15, %v535_v26 }
  0xf8   : > { %v2242_v32 = vpop.f32.mrf.mxu1 }
  0xf9   : > { %v707_v33 = vpop.f32.mrf.mxu0  ;;  %v538_v53 = vadd.f32 %v2242_v32, %v2230_v6  ;;  %v722_v57 = vadd.f32 %v691_v27, %v527_v16 }
  0xfa   : > { %v529_v13 = vpop.f32.mrf.mxu1 }
  0xfb   : > { %v2899_v28 = vpop.f32.mrf.mxu0  ;;  %v530_v58 = vadd.f32 %v529_v13, %v420_v7  ;;  %v725_v62 = vadd.f32 %v2254_v3, %v538_v53 }
  0xfc   : > { %v2245_v24 = vpop.f32.mrf.mxu1 }
  0xfd   : > { %v2901_v37 = vpop.f32.mrf.mxu0  ;;  %v551_v10 = vadd.f32 %v2245_v24, %v2233_v14  ;;  %v723_v12 = vadd.f32 %v694_v29, %v530_v58 }
  0xfe   : > { %v542_v36 = vpop.f32.mrf.mxu1 }
  0xff   : > { %v2277_v34 = vpop.f32.mrf.mxu0  ;;  %v543_v6 = vadd.f32 %v542_v36, %v433_v44  ;;  %v728_v32 = vadd.f32 %v2257_v31, %v551_v10 }
 0x100   : > { %v2246_v48 = vpop.f32.mrf.mxu1 }
 0x101   : > { %v1064_v25 = vpop.f32.mrf.mxu0  ;;  %v554_v13 = vadd.f32 %v2246_v48, %v2895_v23  ;;  %v726_v14 = vadd.f32 %v707_v33, %v543_v6 }
 0x102   : > { %v545_v49 = vpop.f32.mrf.mxu1 }
 0x103   : > { %v2278_v38 = vpop.f32.mrf.mxu0  ;;  %v546_v29 = vadd.f32 %v545_v49, %v2897_v19  ;;  %v2927_v19 = vld [vmem:[%s2971_s2] ss:$0 sm:$0xff] }
 0x104   : > { %v2265_v35 = vpop.f32.mrf.mxu1 }
 0x105   : > { %v1067_v59 = vpop.f32.mrf.mxu0  ;;  %v855_v2 = vadd.f32 %v2265_v35, %v724_v52  ;;  %v727_v48 = vadd.f32 %v2901_v37, %v546_v29 }
 0x106   : > { %v822_v63 = vpop.f32.mrf.mxu1 }
 0x107   : > { %v2903_v54 = vpop.f32.mrf.mxu0  ;;  %v853_v0 = vadd.f32 %v822_v63, %v722_v57  ;;  %v1097_v17 = vadd.f32 %v2277_v34, %v855_v2 }
 0x108   : > { %v2266_v39 = vpop.f32.mrf.mxu1 }
 0x109   : > { %v2905_v41 = vpop.f32.mrf.mxu0  ;;  %v856_v18 = vadd.f32 %v2266_v39, %v725_v62  ;;  %v1095_v5 = vadd.f32 %v1064_v25, %v853_v0  ;;  %v729_v25 = vadd.f32 %v2899_v28, %v554_v13 }
 0x10a   : > { %v825_v60 = vpop.f32.mrf.mxu1 }
 0x10b   : > { %v2907_v22 = vpop.f32.mrf.mxu0  ;;  %v854_v27 = vadd.f32 %v825_v60, %v723_v12  ;;  %v1098_v35 = vadd.f32 %v2278_v38, %v856_v18 }
 0x10c   : > { %v2269_v4 = vpop.f32.mrf.mxu1 }
 0x10d   : > { %v2909_v8 = vpop.f32.mrf.mxu0  ;;  %v859_v24 = vadd.f32 %v2269_v4, %v728_v32  ;;  %v1096_v39 = vadd.f32 %v1067_v59, %v854_v27 }
 0x10e   : > { %v838_v42 = vpop.f32.mrf.mxu1 }
 0x10f   : > { %v2301_v43 = vpop.f32.mrf.mxu0  ;;  %v857_v60 = vadd.f32 %v838_v42, %v726_v14  ;;  %v1101_v38 = vadd.f32 %v2903_v54, %v859_v24 }
 0x110   : > { %v2270_v55 = vpop.f32.mrf.mxu1 }
 0x111   : > { %v1365_v1 = vpop.f32.mrf.mxu0  ;;  %v860_v33 = vadd.f32 %v2270_v55, %v729_v25  ;;  %v1099_v42 = vadd.f32 %v2905_v41, %v857_v60 }
 0x112   : > { %v841_v45 = vpop.f32.mrf.mxu1 }
 0x113   : > { %v2302_v46 = vpop.f32.mrf.mxu0  ;;  %v1102_v57 = vadd.f32 %v2907_v22, %v860_v33 }
 0x114   : > { %v2289_v47 = vpop.f32.mrf.mxu1 }
 0x115   : > { %v1368_v50 = vpop.f32.mrf.mxu0  ;;  %v1267_v7 = vadd.f32 %v2289_v47, %v1097_v17 }
 0x116   : > { %v1234_v51 = vpop.f32.mrf.mxu1 }
 0x117   : > { %v2911_v56 = vpop.f32.mrf.mxu0  ;;  %v1265_v63 = vadd.f32 %v1234_v51, %v1095_v5  ;;  %v1398_v16 = vadd.f32 %v2301_v43, %v1267_v7 }
 0x118   : > { %v2290_v40 = vpop.f32.mrf.mxu1 }
 0x119   : > { %v2913_v21 = vpop.f32.mrf.mxu0  ;;  %v1268_v44 = vadd.f32 %v2290_v40, %v1098_v35  ;;  %v1396_v31 = vadd.f32 %v1365_v1, %v1265_v63  ;;  %v858_v1 = vadd.f32 %v841_v45, %v727_v48 }
 0x11a   : > { %v1237_v61 = vpop.f32.mrf.mxu1 }
 0x11b   : > { %v2915_v9 = vpop.f32.mrf.mxu0  ;;  %v1266_v52 = vadd.f32 %v1237_v61, %v1096_v39  ;;  %v1399_v4 = vadd.f32 %v2302_v46, %v1268_v44  ;;  %v1100_v45 = vadd.f32 %v2909_v8, %v858_v1 }
 0x11c   : > { %v2293_v11 = vpop.f32.mrf.mxu1 }
 0x11d   : > { %v2917_v20 = vpop.f32.mrf.mxu0  ;;  %v1271_v51 = vadd.f32 %v2293_v11, %v1101_v38  ;;  %v1397_v40 = vadd.f32 %v1368_v50, %v1266_v52 }
 0x11e   : > { %v1250_v15 = vpop.f32.mrf.mxu1 }
 0x11f   : > { %v2325_v30 = vpop.f32.mrf.mxu0  ;;  %v1269_v58 = vadd.f32 %v1250_v15, %v1099_v42  ;;  %v1402_v10 = vadd.f32 %v2911_v56, %v1271_v51 }
 0x120   : > { %v2294_v3 = vpop.f32.mrf.mxu1 }
 0x121   : > { %v1777_v26 = vpop.f32.mrf.mxu0  ;;  %v1272_v41 = vadd.f32 %v2294_v3, %v1102_v57  ;;  %v1400_v22 = vadd.f32 %v2913_v21, %v1269_v58 }
 0x122   : > { %v1253_v34 = vpop.f32.mrf.mxu1 }
 0x123   : > { %v2326_v36 = vpop.f32.mrf.mxu0  ;;  %v1270_v15 = vadd.f32 %v1253_v34, %v1100_v45 }
 0x124   : > { %v2313_v47 = vpop.f32.mrf.mxu1 }
 0x125   : > { %v1640_v23 = vadd.f32 %v2313_v47, %v1398_v16  ;;  %v1780_v59 = vpop.f32.mrf.mxu0  ;;  %v1401_v24 = vadd.f32 %v2917_v20, %v1270_v15 }
 0x126   : > { %v1607_v49 = vpop.f32.mrf.mxu1 }
 0x127   : > { %v1810_v43 = vadd.f32 %v2325_v30, %v1640_v23  ;;  %v1638_v28 = vadd.f32 %v1607_v49, %v1396_v31  ;;  %v2329_v61 = vpop.f32.mrf.mxu0  ;;  %v1403_v30 = vadd.f32 %v2915_v9, %v1272_v41 }
 0x128   : > { %v2314_v53 = vpop.f32.mrf.mxu1 }
 0x129   : > { %v1825_v37 = vadd.f32 %v2927_v19, %v1810_v43  ;;  %v1808_v54 = vadd.f32 %v1777_v26, %v1638_v28  ;;  %v1641_v55 = vadd.f32 %v2314_v53, %v1399_v4  ;;  %v1793_v6 = vpop.f32.mrf.mxu0 }
 0x12a   : > { %v1610_v2 = vpop.f32.mrf.mxu1 }
 0x12b   : > { %v1823_v62 = vadd.f32 %v2927_v19, %v1808_v54  ;;  %v1811_v46 = vadd.f32 %v2326_v36, %v1641_v55  ;;  %v1639_v0 = vadd.f32 %v1610_v2, %v1397_v40  ;;  %v1833_v50 = vmax.f32 %v1825_v37, 0.0  ;;  %v2330_v29 = vpop.f32.mrf.mxu0 }
 0x12c   : > { %v2317_v17 = vpop.f32.mrf.mxu1 }
 0x12d   : > { %v1826_v11 = vadd.f32 %v2927_v19, %v1811_v46  ;;  %v1809_v12 = vadd.f32 %v1780_v59, %v1639_v0  ;;  %v1644_v18 = vadd.f32 %v2317_v17, %v1402_v10  ;;  %v1831_v5 = vmax.f32 %v1823_v62, 0.0  ;;  %v1796_v31 = vpop.f32.mrf.mxu0 }
 0x12e   : > { %v1623_v56 = vpop.f32.mrf.mxu1  ;;  %v1843_v13 = vsel %vm1839_vm7, %v1833_v50, -inf }
 0x12f   : > { %v1834_v27 = vmax.f32 %v1826_v11, 0.0  ;;  %v1824_v7 = vadd.f32 %v2927_v19, %v1809_v12  ;;  %v1814_v8 = vadd.f32 %v2329_v61, %v1644_v18  ;;  %v1642_v32 = vadd.f32 %v1623_v56, %v1400_v22 }
 0x130   : > { %v2318_v21 = vpop.f32.mrf.mxu1  ;;  %v1840_v34 = vsel %vm1839_vm7, %v1831_v5, -inf }
 0x131   : > { %v1844_v3 = vsel %vm1839_vm7, %v1834_v27, -inf  ;;  %v1832_v35 = vmax.f32 %v1824_v7, 0.0  ;;  %v1812_v26 = vadd.f32 %v1793_v6, %v1642_v32  ;;  %v1645_v14 = vadd.f32 %v2318_v21, %v1403_v30 }
 0x132   : > { %v1845_v63 = vmax.f32 %v1843_v13, %v1844_v3  ;;  %v1829_v39 = vadd.f32 %v2927_v19, %v1814_v8  ;;  %v1626_v16 = vpop.f32.mrf.mxu1 }
 0x133   : > { %v1841_v9 = vsel %vm1839_vm7, %v1832_v35, -inf  ;;  %v1827_v25 = vadd.f32 %v2927_v19, %v1812_v26  ;;  %v1815_v60 = vadd.f32 %v2330_v29, %v1645_v14  ;;  %v1643_v47 = vadd.f32 %v1626_v16, %v1401_v24 }
 0x134   : > { %v1853_v44 = vpack.c.bf16 %v1845_v63, %v1845_v63  ;;  %v1842_v36 = vmax.f32 %v1840_v34, %v1841_v9  ;;  %v1837_v52 = vmax.f32 %v1829_v39, 0.0 }
 0x135   : > { %v1830_v23 = vadd.f32 %v2927_v19, %v1815_v60  ;;  %v1813_v48 = vadd.f32 %v1796_v31, %v1643_v47  ;;  %v1835_v38 = vmax.f32 %v1827_v25, 0.0 }
 0x136   : > { %1858 = vst.msk [vmem:[%s204_s12 + $0x4] sm:$0xf] %vm1856_vm8, %v1853_v44  ;;  %v1852_v20 = vpack.c.bf16 %v1842_v36, %v1842_v36  ;;  %v1849_v59 = vsel %vm1839_vm7, %v1837_v52, -inf }
 0x137   : > { %v1838_v33 = vmax.f32 %v1830_v23, 0.0  ;;  %v1828_v49 = vadd.f32 %v2927_v19, %v1813_v48  ;;  %v1846_v42 = vsel %vm1839_vm7, %v1835_v38, -inf }
 0x138   : > { %1857 = vst.msk [vmem:[%s204_s12] sm:$0xf] %vm1856_vm8, %v1852_v20 }
 0x139   : > { %v1850_v4 = vsel %vm1839_vm7, %v1838_v33, -inf  ;;  %v1836_v43 = vmax.f32 %v1828_v49, 0.0 }
 0x13a   : > { %v1851_v28 = vmax.f32 %v1849_v59, %v1850_v4 }
 0x13b   : > { %v1847_v1 = vsel %vm1839_vm7, %v1836_v43, -inf }
 0x13c   : > { %v1855_v51 = vpack.c.bf16 %v1851_v28, %v1851_v28  ;;  %v1848_v53 = vmax.f32 %v1846_v42, %v1847_v1 }
 0x13e   : > { %1860 = vst.msk [vmem:[%s204_s12 + $0xc] sm:$0xf] %vm1856_vm8, %v1855_v51  ;;  %v1854_v40 = vpack.c.bf16 %v1848_v53, %v1848_v53 }
 0x140   : > { %1859 = vst.msk [vmem:[%s204_s12 + $0x8] sm:$0xf] %vm1856_vm8, %v1854_v40 }
 0x141 PF: > { %s13_s14 = sadd.s32 1, %s2412_s14   ;;  %s2977_s12 = smov %s2408_s13 }
 0x142   : > { %p10_p5 = scmp.ge.s32.totalorder %s13_s14, 4   ;;  %s2978_s13 = smov %s2980_s15 }
 0x144   :  { %12 = sbr.rel (!%p10_p5) target bundleno = 2 (0x2), region = 72 }

// kernel: crnn_transcriber_forward.10
= control target key start
LH: loop header
LB: loop body
LE: loop exit
PB: predicated region body
PF: predicated region fallthrough
CT: control target
= control target key end

     0   :  { %vm187_vm0 = vcmask 254976   ;;  %v586_v16 = vmov 0.0   ;;  %s674_s24 = smov 0   ;;  %s736_s0 = inlined_call_operand.vmem [shape: f32[8,2,256], index: 0, kind: input, shape index: {}, may-alias: {0,1}]   ;;  %s737_s1 = inlined_call_operand.vmem [shape: f32[8,2,256], index: 1, kind: input, shape index: {}, may-alias: {0,1}]   ;;  %s738_s2 = inlined_call_operand.vmem [shape: f32[32,128], index: 2, kind: input, shape index: {}]   ;;  %s739_s3 = inlined_call_operand.vmem [shape: f32[32,128], index: 3, kind: input, shape index: {}]   ;;  %s740_s4 = inlined_call_operand.vmem [shape: f32[8,2,32], index: 4, kind: output, shape index: {0}]   ;;  %s741_s5 = inlined_call_operand.vmem [shape: f32[8,2,32], index: 5, kind: output, shape index: {1}]  }
   0x1   :  { %v29_v0 = vld [vmem:[%s736_s0] sm:$0x3]  ;;  %v31_v1 = vld [vmem:[%s736_s0 + $0x4] sm:$0x3]  ;;  %v33_v2 = vld [vmem:[%s736_s0 + $0x8] sm:$0x3] }
   0x2   :  { %30 = vst [vmem:[#allocation6] sm:$0x3] %v29_v0  ;;  %32 = vst [vmem:[#allocation6 + $0x2] sm:$0x3] %v31_v1  ;;  %v35_v3 = vld [vmem:[%s736_s0 + $0xc] sm:$0x3] }
   0x3   :  { %34 = vst [vmem:[#allocation6 + $0x4] sm:$0x3] %v33_v2  ;;  %v37_v4 = vld [vmem:[%s736_s0 + $0x10] sm:$0x3]  ;;  %v39_v5 = vld [vmem:[%s736_s0 + $0x14] sm:$0x3] }
   0x4   :  { %36 = vst [vmem:[#allocation6 + $0x6] sm:$0x3] %v35_v3  ;;  %38 = vst [vmem:[#allocation6 + $0x8] sm:$0x3] %v37_v4  ;;  %v41_v6 = vld [vmem:[%s736_s0 + $0x18] sm:$0x3] }
   0x5   :  { %40 = vst [vmem:[#allocation6 + $0xa] sm:$0x3] %v39_v5  ;;  %v43_v7 = vld [vmem:[%s736_s0 + $0x1c] sm:$0x3]  ;;  %v502_v8 = vld [vmem:[%s737_s1 + $0x2] sm:$0x3] }
   0x6   :  { %42 = vst [vmem:[#allocation6 + $0xc] sm:$0x3] %v41_v6  ;;  %44 = vst [vmem:[#allocation6 + $0xe] sm:$0x3] %v43_v7  ;;  %v503_v9 = vld [vmem:[%s737_s1 + $0x6] sm:$0x3] }
   0x7   :  { %107 = vst [vmem:[#allocation7] sm:$0x3] %v502_v8  ;;  %v504_v10 = vld [vmem:[%s737_s1 + $0xa] sm:$0x3]  ;;  %v505_v11 = vld [vmem:[%s737_s1 + $0xe] sm:$0x3] }
   0x8   :  { %109 = vst [vmem:[#allocation7 + $0x2] sm:$0x3] %v503_v9  ;;  %111 = vst [vmem:[#allocation7 + $0x4] sm:$0x3] %v504_v10  ;;  %v506_v12 = vld [vmem:[%s737_s1 + $0x12] sm:$0x3] }
   0x9   :  { %113 = vst [vmem:[#allocation7 + $0x6] sm:$0x3] %v505_v11  ;;  %v507_v13 = vld [vmem:[%s737_s1 + $0x16] sm:$0x3]  ;;  %v508_v14 = vld [vmem:[%s737_s1 + $0x1a] sm:$0x3] }
   0xa   :  { %115 = vst [vmem:[#allocation7 + $0x8] sm:$0x3] %v506_v12  ;;  %117 = vst [vmem:[#allocation7 + $0xa] sm:$0x3] %v507_v13  ;;  %v509_v15 = vld [vmem:[%s737_s1 + $0x1e] sm:$0x3] }
   0xb   :  { %119 = vst [vmem:[#allocation7 + $0xc] sm:$0x3] %v508_v14  ;;  %121 = vst [vmem:[#allocation7 + $0xe] sm:$0x3] %v509_v15 }
   0xc   :  { %188 = vst.msk [vmem:[#allocation2] sm:$0x3] %vm187_vm0, %v586_v16  ;;  %189 = vst.msk [vmem:[#allocation3] sm:$0x3] %vm187_vm0, %v586_v16 }
   0xd   :  { %190 = vst.msk [vmem:[#allocation4] sm:$0x3] %vm187_vm0, %v586_v16  ;;  %191 = vst.msk [vmem:[#allocation5] sm:$0x3] %vm187_vm0, %v586_v16 }
   0xe LB: > { %v206_v17 = vld [vmem:[%s738_s2 + $0x18] sm:$0xff]  ;;  %v587_v19 = vmov 0.0   ;;  %v205_v20 = vld [vmem:[%s738_s2 + $0x10] sm:$0xff]  ;;  %v204_v22 = vld [vmem:[%s738_s2 + $0x8] sm:$0xff]  ;;  %vm588_vm1 = vmmov 0   ;;  %vm207_vm2 = vcmask 261120   ;;  %s584_s24 = sphi %s674_s24, %s197_s24  }
   0xf   : > { %v332_v18 = vld [vmem:[%s739_s3 + $0x18] sm:$0xff]  ;;  %526 = vmatprep.subr.mxu0 %v587_v19  ;;  %537 = vmatprep.subr.mxu1 %v587_v19  ;;  %v331_v21 = vld [vmem:[%s739_s3 + $0x10] sm:$0xff]  ;;  %v330_v23 = vld [vmem:[%s739_s3 + $0x8] sm:$0xff]  ;;  %s589_s15 = smov 32   ;;  %s323_s16 = ssub.s32 7, %s584_s24 }
  0x10   : > { %527 = vmatpush3.msra.mxu0 %v206_v17  ;;  %538 = vmatpush3.msra.mxu1 %v332_v18  ;;  %v203_v24 = vld [vmem:[%s738_s2] sm:$0xff]  ;;  %s510_s0 = sshll.u32 %s584_s24, 1  ;;  %s707_s17 = sshll.u32 %s323_s16, 1 }
  0x11   : > { %528 = vmatprep.subr.mxu0 %v587_v19  ;;  %539 = vmatprep.subr.mxu1 %v587_v19  ;;  %v329_v26 = vld [vmem:[%s739_s3] sm:$0xff]  ;;  %s199_s18 = scalar_lea.vmem [#allocation6], %s510_s0  ;;  %s325_s19 = scalar_lea.vmem [#allocation7], %s707_s17 }
  0x12   : > { %529 = vmatpush3.msra.mxu0 %v205_v20  ;;  %540 = vmatpush3.msra.mxu1 %v331_v21  ;;  %v200_v30 = vld [vmem:[%s199_s18] sm:$0x3]  ;;  %s590_s20 = smov 96   ;;  %s591_s21 = smov 64  }
  0x13   : > { %530 = vmatprep.subr.mxu0 %v587_v19  ;;  %541 = vmatprep.subr.mxu1 %v587_v19  ;;  %v201_v25 = vld [vmem:[#allocation2] sm:$0x3]  ;;  %v202_v27 = vld [vmem:[#allocation3] sm:$0x3]  ;;  %s321_s25 = scalar_lea.vmem %s740_s4, %s510_s0  ;;  %s445_s27 = scalar_lea.vmem %s741_s5, %s707_s17 }
  0x14   : > { %531 = vmatpush3.msra.mxu0 %v204_v22  ;;  %534 = vmatprep.mubr.msk.f32.mxu0 %vm588_vm1, %v587_v19  ;;  %v327_v28 = vld [vmem:[#allocation4] sm:$0x3]  ;;  %v328_v29 = vld [vmem:[#allocation5] sm:$0x3]  ;;  %v326_v32 = vld [vmem:[%s325_s19] sm:$0x3] }
  0x15   : > { %532 = vmatprep.subr.mxu0 %v587_v19  ;;  %542 = vmatpush3.msra.mxu1 %v330_v23  ;;  %s197_s24 = sadd.s32 1, %s584_s24  }
  0x16   : > { %533 = vmatpush3.msra.mxu0 %v203_v24  ;;  %543 = vmatprep.subr.mxu1 %v587_v19  ;;  %p194_p0 = scmp.ge.s32.totalorder %s197_s24, 8  }
  0x17   : > { %535 = vmatmul.mubr.msk.f32.vlgmr.msra.gmra.mxu0 %vm207_vm2, %v201_v25  ;;  %544 = vmatpush3.msra.mxu1 %v329_v26 }
  0x18   : > { %545 = vmatprep.mubr.msk.f32.mxu1 %vm588_vm1, %v587_v19  ;;  %290 = vrot.lane.b32.xlu1 %v202_v27, %s589_s15 }
  0x19   : > { %546 = vmatmul.mubr.msk.f32.vlgmr.msra.gmra.mxu1 %vm207_vm2, %v327_v28 }
  0x1c   : > { %415 = vrot.lane.b32.xlu1 %v328_v29, %s589_s15 }
  0x8a   : > { %v291_v52 = vpop.permute.xlu1 %290 }
  0x8e   : > { %v416_v54 = vpop.permute.xlu1 %415 }
  0xd7   : > { %v277_v31 = vpop.f32.mrf.mxu0 }
  0xd8   : > { %v281_v33 = vadd.f32 %v277_v31, %v200_v30 }
  0xd9   : > { %v536_v34 = vpop.f32.mrf.mxu0  ;;  %v402_v35 = vpop.f32.mrf.mxu1 }
  0xda   : > { %562 = vtanh.f32 %v281_v33  ;;  %v406_v36 = vadd.f32 %v402_v35, %v326_v32  ;;  %v512_v40 = vmul.f32 -1.442695, %v281_v33 }
  0xdb   : > { %v547_v37 = vpop.f32.mrf.mxu1 }
  0xdc   : > { %564 = vtanh.f32 %v406_v36  ;;  %v515_v41 = vmul.f32 -1.442695, %v406_v36 }
  0xdd   : > { %566 = vpow2.f32 %v512_v40 }
  0xde   : > { %568 = vpow2.f32 %v515_v41 }
  0xe7   : > { %v563_v38 = vpop.eup %562 }
  0xe8   : > { %295 = vrot.lane.b32.xlu0 %v563_v38, %s589_s15 }
  0xe9   : > { %v565_v39 = vpop.eup %564 }
  0xea   : > { %v567_v42 = vpop.eup %566 }
  0xeb   : > { %v285_v43 = vadd.f32 1.0, %v567_v42  ;;  %v569_v44 = vpop.eup %568 }
  0xec   : > { %420 = vrot.lane.b32.xlu0 %v565_v39, %s589_s15  ;;  %v410_v45 = vadd.f32 1.0, %v569_v44 }
  0xed   : > { %570 = vrcp.f32 %v285_v43 }
  0xee   : > { %572 = vrcp.f32 %v410_v45 }
  0xfa   : > { %v571_v46 = vpop.eup %570 }
  0xfb   : > { %v573_v49 = vpop.eup %572  ;;  %v293_v53 = vmul.f32 %v571_v46, %v291_v52 }
  0xfc   : > { %v418_v57 = vmul.f32 %v573_v49, %v416_v54 }
 0x15a   : > { %v296_v47 = vpop.permute.xlu0 %295 }
 0x15b   : > { %v298_v48 = vmul.f32 %v571_v46, %v296_v47 }
 0x15d   : > { %300 = vrot.lane.b32.xlu0 %v298_v48, %s589_s15 }
 0x15e   : > { %v421_v50 = vpop.permute.xlu0 %420 }
 0x15f   : > { %v423_v51 = vmul.f32 %v573_v49, %v421_v50 }
 0x161   : > { %425 = vrot.lane.b32.xlu1 %v423_v51, %s589_s15 }
 0x1cf   : > { %v301_v55 = vpop.permute.xlu0 %300 }
 0x1d0   : > { %v303_v56 = vadd.f32 %v301_v55, %v293_v53 }
 0x1d2   : > { %574 = vtanh.f32 %v303_v56 }
 0x1d3   : > { %v426_v58 = vpop.permute.xlu1 %425 }
 0x1d4   : > { %v428_v59 = vadd.f32 %v426_v58, %v418_v57 }
 0x1d6   : > { %576 = vtanh.f32 %v428_v59 }
 0x1df   : > { %v575_v60 = vpop.eup %574 }
 0x1e0   : > { %306 = vrot.lane.b32.xlu0 %v575_v60, %s589_s15 }
 0x1e3   : > { %v577_v61 = vpop.eup %576 }
 0x1e4   : > { %431 = vrot.lane.b32.xlu1 %v577_v61, %s589_s15 }
 0x1e8   : > { %317 = vrot.lane.b32.xlu1 %v303_v56, %s590_s20 }
 0x1ec   : > { %441 = vrot.lane.b32.xlu1 %v428_v59, %s590_s20 }
 0x252   : > { %v307_v62 = vpop.permute.xlu0 %306 }
 0x253   : > { %v309_v63 = vmul.f32 %v571_v46, %v307_v62 }
 0x255   : > { %311 = vrot.lane.b32.xlu0 %v309_v63, %s591_s21 }
 0x256   : > { %v432_v0 = vpop.permute.xlu1 %431 }
 0x257   : > { %v434_v1 = vmul.f32 %v573_v49, %v432_v0 }
 0x259   : > { %436 = vrot.lane.b32.xlu0 %v434_v1, %s591_s21 }
 0x25a   : > { %v318_v2 = vpop.permute.xlu1 %317 }
 0x25b   : > { %320 = vst.msk [vmem:[#allocation3] sm:$0x3] %vm187_vm0, %v318_v2 }
 0x25e   : > { %v442_v3 = vpop.permute.xlu1 %441 }
 0x25f   : > { %444 = vst.msk [vmem:[#allocation5] sm:$0x3] %vm187_vm0, %v442_v3 }
 0x2c7   : > { %v312_v4 = vpop.permute.xlu0 %311 }
 0x2c8   : > { %315 = vst.msk [vmem:[#allocation2] sm:$0x3] %vm187_vm0, %v312_v4  ;;  %322 = vst.msk [vmem:[%s321_s25] sm:$0x3] %vm187_vm0, %v312_v4  ;;  %196 = sbr.rel (!%p194_p0) target bundleno = 14 (0xe), region = 154 }
 0x2cb   : > { %v437_v5 = vpop.permute.xlu0 %436 }
 0x2cc   : > { %439 = vst.msk [vmem:[#allocation4] sm:$0x3] %vm187_vm0, %v437_v5  ;;  %446 = vst.msk [vmem:[%s445_s27] sm:$0x3] %vm187_vm0, %v437_v5 }

// kernel: crnn_transcriber_forward.11
= control target key start
LH: loop header
LB: loop body
LE: loop exit
PB: predicated region body
PF: predicated region fallthrough
CT: control target
= control target key end

     0   :  { %v192_v1 = vmov 0   ;;  %vm82_vm0 = vcmask 523264   ;;  %v146_v10 = vlaneseq  ;;  %s255_s1 = inlined_call_operand.vmem [shape: bf16[64,256], index: 1, kind: input, shape index: {}]   ;;  %s256_s0 = inlined_call_operand.vmem [shape: bf16[16,64], index: 0, kind: input, shape index: {}]   ;;  %s257_s2 = inlined_call_operand.vmem [shape: f32[1,256], index: 2, kind: input, shape index: {}]   ;;  %s258_s3 = inlined_call_operand.vmem [shape: f32[16,256], index: 3, kind: output, shape index: {}]  }
   0x1   :  { %v179_v0 = vld [vmem:[%s255_s1 + $0x34] ss:$8 sps:$4 sm:$0xff]   ;;  %118 = vmatprep.mubr.bf16.mxu0 %v192_v1  ;;  %v181_v2 = vld [vmem:[%s255_s1 + $0x30] ss:$8 sps:$4 sm:$0xff]   ;;  %v182_v3 = vld [vmem:[%s255_s1 + $0x24] ss:$8 sps:$4 sm:$0xff]  }
   0x2   :  { %94 = vmatprep.subr.bf16.mxu0 %v179_v0  ;;  %v184_v4 = vld [vmem:[%s255_s1 + $0x20] ss:$8 sps:$4 sm:$0xff]   ;;  %v185_v5 = vld [vmem:[%s255_s1 + $0x14] ss:$8 sps:$4 sm:$0xff]   ;;  %v187_v6 = vld [vmem:[%s255_s1 + $0x10] ss:$8 sps:$4 sm:$0xff]  }
   0x3   :  { %95 = vmatpush1.bf16.msra.mxu0 %v181_v2  ;;  %v188_v7 = vld [vmem:[%s255_s1 + $0x4] ss:$8 sps:$4 sm:$0xff]   ;;  %v190_v8 = vld [vmem:[%s255_s1] ss:$8 sps:$4 sm:$0xff]   ;;  %v147_v11 = vshrl.u32 %v146_v10, 7 }
   0x4   :  { %96 = vmatprep.subr.bf16.mxu0 %v182_v3  ;;  %v191_v9 = vld [vmem:[%s256_s0] sm:$0xff]  }
   0x5   :  { %v148_v12 = vsub.s32 0, %v147_v11  ;;  %v144_v13 = vld [vmem:[%s257_s2] sm:$0x3]  ;;  %v152_v14 = vsub.s32 1, %v147_v11 }
   0x7   :  { %97 = vmatpush1.bf16.msra.mxu0 %v184_v4  ;;  %v149_v15 = vrot.slane %v144_v13, %v148_v12  ;;  %v153_v16 = vrot.slane %v144_v13, %v152_v14 }
   0x8   :  { %98 = vmatprep.subr.bf16.mxu0 %v185_v5 }
   0xb   :  { %99 = vmatpush1.bf16.msra.mxu0 %v187_v6 }
   0xc   :  { %100 = vmatprep.subr.bf16.mxu0 %v188_v7 }
   0xf   :  { %101 = vmatpush1.bf16.msra.mxu0 %v190_v8 }
  0x12   :  { %177 = vmatmul.mubr.msk.bf16.vlgmr.msra.gmra.mxu0 %vm82_vm0, %v191_v9 }
  0xd2   :  { %v120_v17 = vpop.f32.mrf.mxu0 }
  0xd3   :  { %v156_v18 = vadd.f32 %v149_v15, %v120_v17 }
  0xd4   :  { %v122_v19 = vpop.f32.mrf.mxu0 }
  0xd5   :  { %160 = vst [vmem:[%s258_s3] sm:$0xff] %v156_v18  ;;  %v157_v20 = vadd.f32 %v153_v16, %v122_v19 }
  0xd6   :  { %v124_v21 = vpop.f32.mrf.mxu0 }
  0xd7   :  { %161 = vst [vmem:[%s258_s3 + $0x8] sm:$0xff] %v157_v20  ;;  %v158_v22 = vadd.f32 %v149_v15, %v124_v21 }
  0xd8   :  { %v126_v23 = vpop.f32.mrf.mxu0 }
  0xd9   :  { %162 = vst [vmem:[%s258_s3 + $0x10] sm:$0xff] %v158_v22  ;;  %v159_v24 = vadd.f32 %v153_v16, %v126_v23 }
  0xdb   :  { %163 = vst [vmem:[%s258_s3 + $0x18] sm:$0xff] %v159_v24 }

// kernel: crnn_transcriber_forward.13
= control target key start
LH: loop header
LB: loop body
LE: loop exit
PB: predicated region body
PF: predicated region fallthrough
CT: control target
= control target key end

     0   :  { %vm19_vm0 = vcmask 130048   ;;  %v186_v0 = vmov 0.0   ;;  %vm187_vm1 = vmmov 0   ;;  %vm63_vm2 = vcmask 523264   ;;  %s238_s1 = inlined_call_operand.vmem [shape: bf16[64,16], index: 1, kind: input, shape index: {}]   ;;  %s239_s0 = inlined_call_operand.vmem [shape: bf16[16,64], index: 0, kind: input, shape index: {}]   ;;  %s240_s2 = inlined_call_operand.vmem [shape: f32[1,16], index: 2, kind: input, shape index: {}]   ;;  %s241_s3 = inlined_call_operand.vmem [shape: f32[16,16], index: 3, kind: output, shape index: {}]  }
   0x1   :  { %159 = vmatprep.subr.bf16.mxu0 %v186_v0  ;;  %v173_v1 = vld [vmem:[%s238_s1 + $0x18] sm:$0xff]   ;;  %167 = vmatprep.mubr.msk.bf16.mxu0 %vm187_vm1, %v186_v0  ;;  %20 = vst.msk [vmem:[#allocation2] sm:$0xff] %vm19_vm0, %v186_v0  ;;  %21 = vst.msk [vmem:[#allocation2 + $0x8] sm:$0xff] %vm19_vm0, %v186_v0  ;;  %v174_v2 = vld [vmem:[%s238_s1 + $0x10] sm:$0xff]  }
   0x2   :  { %160 = vmatpush3.bf16.msra.mxu0 %v173_v1  ;;  %v175_v3 = vld [vmem:[%s238_s1 + $0x8] sm:$0xff]   ;;  %v176_v4 = vld [vmem:[%s238_s1] sm:$0xff]  }
   0x3   :  { %161 = vmatprep.subr.bf16.mxu0 %v186_v0  ;;  %v177_v5 = vld [vmem:[%s239_s0] sm:$0xff]  }
   0x4   :  { %v151_v14 = vld [vmem:[%s240_s2] ss:$0 sm:$0xff] }
   0x6   :  { %162 = vmatpush3.bf16.msra.mxu0 %v174_v2 }
   0x7   :  { %163 = vmatprep.subr.bf16.mxu0 %v186_v0 }
   0x8   :  { %v22_v6 = vld [vmem:[#allocation2] sm:$0xff]  ;;  %v23_v10 = vld [vmem:[#allocation2 + $0x8] sm:$0xff] }
   0xa   :  { %164 = vmatpush3.bf16.msra.mxu0 %v175_v3 }
   0xb   :  { %165 = vmatprep.subr.bf16.mxu0 %v186_v0 }
   0xe   :  { %166 = vmatpush3.bf16.msra.mxu0 %v176_v4 }
  0x11   :  { %168 = vmatmul.mubr.msk.bf16.vlgmr.msra.gmra.mxu0 %vm63_vm2, %v177_v5 }
  0xd1   :  { %v101_v7 = vpop.f32.mrf.mxu0 }
  0xd2   :  { %v108_v8 = vadd.f32 %v101_v7, %v22_v6 }
  0xd3   :  { %v169_v9 = vpop.f32.mrf.mxu0 }
  0xd4   :  { %111 = vst.msk [vmem:[#allocation2] sm:$0xff] %vm19_vm0, %v108_v8 }
  0xd5   :  { %v104_v11 = vpop.f32.mrf.mxu0 }
  0xd6   :  { %v109_v12 = vadd.f32 %v104_v11, %v23_v10 }
  0xd7   :  { %v170_v13 = vpop.f32.mrf.mxu0 }
  0xd8   :  { %112 = vst.msk [vmem:[#allocation2 + $0x8] sm:$0xff] %vm19_vm0, %v109_v12 }
  0xdb   :  { %v116_v15 = vld [vmem:[#allocation2] sm:$0xff] }
  0xdc   :  { %v125_v16 = vadd.f32 %v151_v14, %v116_v15 }
  0xde   :  { %v152_v17 = vmul.f32 -1.442695, %v125_v16 }
  0xdf   :  { %v117_v18 = vld [vmem:[#allocation2 + $0x8] sm:$0xff] }
  0xe0   :  { %178 = vpow2.f32 %v152_v17  ;;  %v126_v19 = vadd.f32 %v151_v14, %v117_v18 }
  0xe2   :  { %v153_v20 = vmul.f32 -1.442695, %v126_v19 }
  0xe4   :  { %180 = vpow2.f32 %v153_v20 }
  0xed   :  { %v179_v21 = vpop.eup %178 }
  0xee   :  { %v133_v22 = vadd.f32 1.0, %v179_v21 }
  0xf0   :  { %182 = vrcp.f32 %v133_v22 }
  0xf1   :  { %v181_v23 = vpop.eup %180 }
  0xf2   :  { %v134_v24 = vadd.f32 1.0, %v181_v23 }
  0xf4   :  { %184 = vrcp.f32 %v134_v24 }
  0xfd   :  { %v183_v25 = vpop.eup %182 }
  0xfe   :  { %139 = vst.msk [vmem:[%s241_s3] sm:$0xff] %vm19_vm0, %v183_v25 }
 0x101   :  { %v185_v26 = vpop.eup %184 }
 0x102   :  { %140 = vst.msk [vmem:[%s241_s3 + $0x8] sm:$0xff] %vm19_vm0, %v185_v26 }

</bundles_post_ra>
